<compile_context>
chip_gen: v6e
topology: v6e:2x2x1
jax: 0.10.0
libtpu: 0.0.40
codegen_flags: <defaults>
</compile_context>

<pallas_src>
import math

import jax
import jax.numpy as jnp
from jax.experimental import pallas as pl
from jax.experimental.pallas import tpu as pltpu

# ----------------------------- model config ---------------------------------
IMG = 32            # stands in for 224
PATCH = 8           # stands in for 32
WIDTH = 32          # transformer width (stands in for 768)
HEADS = 2
LAYERS = 2
FEAT_DIM = 16       # stands in for 512
NUM_CLASSES = 5
GRID = IMG // PATCH
NTOK = GRID * GRID + 1            # 17 tokens (CLS + patches)
T_PAD = ((NTOK + 7) // 8) * 8     # 24: pad token/sublane axis once
CPP = 3 * PATCH * PATCH           # flattened patch size (192)
DH = WIDTH // HEADS
SCALE = 1.0 / math.sqrt(DH)
LANE = 128                        # TPU lane width


# ----------------------------- packed-slab layout ---------------------------
def _build_layouts():
    """Static row offsets for the two packed weight slabs (width = 128 lanes)."""
    w_off, f_off = {}, {}

    def add(table, name, nrows, ncols, cursor):
        table[name] = (cursor, nrows, ncols)
        return cursor + nrows

    # bf16 slab: every matmul weight, pre-transposed to (K, N)
    r = 0
    r = add(w_off, "conv_wT", CPP, WIDTH, r)
    for l in range(LAYERS):
        r = add(w_off, f"in_wT{l}", WIDTH, 3 * WIDTH, r)
        r = add(w_off, f"out_wT{l}", WIDTH, WIDTH, r)
        r = add(w_off, f"mlp_w1T{l}", WIDTH, 4 * WIDTH, r)
        r = add(w_off, f"mlp_w2T{l}", 4 * WIDTH, WIDTH, r)
    r = add(w_off, "proj", WIDTH, FEAT_DIM, r)
    r = add(w_off, "head_wT", FEAT_DIM, LANE, r)       # zero-padded to 128 lanes
    w_rows = ((r + 15) // 16) * 16                     # bf16 packs 2 rows/sublane

    # f32 slab: LayerNorm params, biases, cls+pos prefix
    r = 0
    r = add(f_off, "prefix", T_PAD, WIDTH, r)
    r = add(f_off, "ln_pre_g", 1, WIDTH, r)
    r = add(f_off, "ln_pre_b", 1, WIDTH, r)
    for l in range(LAYERS):
        r = add(f_off, f"ln1_g{l}", 1, WIDTH, r)
        r = add(f_off, f"ln1_b{l}", 1, WIDTH, r)
        r = add(f_off, f"in_b{l}", 1, 3 * WIDTH, r)
        r = add(f_off, f"out_b{l}", 1, WIDTH, r)
        r = add(f_off, f"ln2_g{l}", 1, WIDTH, r)
        r = add(f_off, f"ln2_b{l}", 1, WIDTH, r)
        r = add(f_off, f"mlp_b1{l}", 1, 4 * WIDTH, r)
        r = add(f_off, f"mlp_b2{l}", 1, WIDTH, r)
    r = add(f_off, "ln_post_g", 1, WIDTH, r)
    r = add(f_off, "ln_post_b", 1, WIDTH, r)
    r = add(f_off, "head_b", 1, LANE, r)               # zero-padded to 128 lanes
    f_rows = ((r + 7) // 8) * 8
    return w_off, w_rows, f_off, f_rows


_W_OFF, _W_ROWS, _F_OFF, _F_ROWS = _build_layouts()


# ----------------------------- fused Pallas kernel --------------------------
def _clip_lp_kernel(patches_ref, wslab_ref, fslab_ref, out_ref):
    """Entire CLIP-ViT forward for BB images; all weights/activations on-chip."""
    eps = 1e-5
    BB = out_ref.shape[0]
    M = BB * T_PAD

    def wsl(name):  # bf16 matmul weight slice
        r, nr, nc = _W_OFF[name]
        return wslab_ref[pl.ds(r, nr), pl.ds(0, nc)]

    def fsl(name):  # f32 LN-param / bias / prefix slice
        r, nr, nc = _F_OFF[name]
        return fslab_ref[pl.ds(r, nr), pl.ds(0, nc)]

    def layernorm(x, g, b):
        mu = jnp.mean(x, axis=-1, keepdims=True)
        xc = x - mu
        var = jnp.mean(xc * xc, axis=-1, keepdims=True)
        return xc * jax.lax.rsqrt(var + eps) * g + b

    def mm(a, w):  # MXU matmul: bf16 operands, f32 accumulate
        return jnp.dot(a.astype(jnp.bfloat16), w,
                       preferred_element_type=jnp.float32)

    # --- patch embedding + class token + positional embedding ---------------
    # Padded rows (CLS slot 0 and NTOK..T_PAD-1) of `patches` are zero, so the
    # matmul leaves them zero; `prefix` supplies (cls_emb + pos[0]) / pos[1:] / 0.
    x = jnp.dot(patches_ref[...], wsl("conv_wT"),
                preferred_element_type=jnp.float32)                       # (M, W)
    prefix = fsl("prefix")                                                # (T_PAD, W)
    x = (x.reshape(BB, T_PAD, WIDTH) + prefix[None, :, :]).reshape(M, WIDTH)

    # --- ln_pre --------------------------------------------------------------
    x = layernorm(x, fsl("ln_pre_g"), fsl("ln_pre_b"))

    # key-padding mask: key columns >= NTOK are padding tokens.
    key_col = jax.lax.broadcasted_iota(jnp.int32, (1, T_PAD, T_PAD), 2)
    key_valid = key_col < NTOK

    # --- transformer residual blocks (unrolled: LAYERS is tiny) --------------
    for l in range(LAYERS):
        # attention: x = x + out_proj(MHA(LN1(x)))
        h = layernorm(x, fsl(f"ln1_g{l}"), fsl(f"ln1_b{l}"))
        qkv = mm(h, wsl(f"in_wT{l}")) + fsl(f"in_b{l}")                   # (M, 3W)
        qkv = qkv.reshape(BB, T_PAD, 3 * WIDTH)
        heads = []
        for hd in range(HEADS):
            q = qkv[:, :, hd * DH:(hd + 1) * DH].astype(jnp.bfloat16)
            k = qkv[:, :, WIDTH + hd * DH:WIDTH + (hd + 1) * DH].astype(jnp.bfloat16)
            v = qkv[:, :, 2 * WIDTH + hd * DH:2 * WIDTH + (hd + 1) * DH].astype(jnp.bfloat16)
            s = jnp.einsum('bqd,bkd->bqk', q, k,
                           preferred_element_type=jnp.float32) * SCALE    # (BB,T,T)
            s = jnp.where(key_valid, s, -1e30)
            m = jnp.max(s, axis=-1, keepdims=True)
            p = jnp.exp(s - m)
            p = p * pl.reciprocal(jnp.sum(p, axis=-1, keepdims=True), approx=True)
            heads.append(jnp.einsum('bqk,bkd->bqd', p.astype(jnp.bfloat16), v,
                                    preferred_element_type=jnp.float32))  # (BB,T,DH)
        # lane-concat heads, single fused output projection
        o = jnp.concatenate(heads, axis=-1).reshape(M, WIDTH)             # (M, W)
        x = x + mm(o, wsl(f"out_wT{l}")) + fsl(f"out_b{l}")

        # MLP with QuickGELU: x = x + W2( g(W1 LN2(x) + b1) ) + b2
        h = layernorm(x, fsl(f"ln2_g{l}"), fsl(f"ln2_b{l}"))
        h = mm(h, wsl(f"mlp_w1T{l}")) + fsl(f"mlp_b1{l}")                 # (M, 4W)
        h = h * jax.nn.sigmoid(1.702 * h)
        x = x + mm(h, wsl(f"mlp_w2T{l}")) + fsl(f"mlp_b2{l}")

    # --- ln_post on the BB CLS rows, projection, linear-probe head -----------
    # (CLS extraction via masked sublane-reduce: robust, no strided gather.)
    x3 = x.reshape(BB, T_PAD, WIDTH)
    onehot0 = (jax.lax.broadcasted_iota(jnp.int32, (1, T_PAD, 1), 1) == 0
               ).astype(jnp.float32)
    cls = jnp.sum(x3 * onehot0, axis=1)                                   # (BB, W)
    cls = layernorm(cls, fsl("ln_post_g"), fsl("ln_post_b"))
    feat = mm(cls, wsl("proj"))                                           # (BB, FEAT)
    # head weight/bias are zero-padded to 128 lanes -> lane-dense full store.
    logits = mm(feat, wsl("head_wT")) + fsl("head_b")                     # (BB, 128)
    out_ref[...] = logits


# ----------------------------- one-time weight packing ----------------------
def pack_params(params):
    """Pack all weights into two lane-dense slabs.  Call ONCE, outside jit."""
    blocks = params["blocks"]

    def fill(slab, off_table, name, mat):
        r, nr, nc = off_table[name]
        mat = jnp.asarray(mat, jnp.float32)
        assert mat.shape[0] <= nr and mat.shape[1] <= nc
        return slab.at[r:r + mat.shape[0], :mat.shape[1]].set(mat)

    wslab = jnp.zeros((_W_ROWS, LANE), jnp.float32)
    wslab = fill(wslab, _W_OFF, "conv_wT", params["conv_w"].reshape(WIDTH, CPP).T)
    for l, b in enumerate(blocks):
        wslab = fill(wslab, _W_OFF, f"in_wT{l}", b["attn"]["in_proj_w"].T)
        wslab = fill(wslab, _W_OFF, f"out_wT{l}", b["attn"]["out_proj_w"].T)
        wslab = fill(wslab, _W_OFF, f"mlp_w1T{l}", b["mlp_w1"].T)
        wslab = fill(wslab, _W_OFF, f"mlp_w2T{l}", b["mlp_w2"].T)
    wslab = fill(wslab, _W_OFF, "proj", params["proj"])
    wslab = fill(wslab, _W_OFF, "head_wT", params["head_w"].T)            # (FEAT, C)

    fslab = jnp.zeros((_F_ROWS, LANE), jnp.float32)
    prefix = jnp.zeros((T_PAD, WIDTH), jnp.float32)
    prefix = prefix.at[0].set(params["class_emb"] + params["pos_emb"][0])
    prefix = prefix.at[1:NTOK].set(params["pos_emb"][1:])
    fslab = fill(fslab, _F_OFF, "prefix", prefix)

    def row(v):
        return jnp.asarray(v, jnp.float32).reshape(1, -1)

    fslab = fill(fslab, _F_OFF, "ln_pre_g", row(params["ln_pre_g"]))
    fslab = fill(fslab, _F_OFF, "ln_pre_b", row(params["ln_pre_b"]))
    for l, b in enumerate(blocks):
        fslab = fill(fslab, _F_OFF, f"ln1_g{l}", row(b["ln1_g"]))
        fslab = fill(fslab, _F_OFF, f"ln1_b{l}", row(b["ln1_b"]))
        fslab = fill(fslab, _F_OFF, f"in_b{l}", row(b["attn"]["in_proj_b"]))
        fslab = fill(fslab, _F_OFF, f"out_b{l}", row(b["attn"]["out_proj_b"]))
        fslab = fill(fslab, _F_OFF, f"ln2_g{l}", row(b["ln2_g"]))
        fslab = fill(fslab, _F_OFF, f"ln2_b{l}", row(b["ln2_b"]))
        fslab = fill(fslab, _F_OFF, f"mlp_b1{l}", row(b["mlp_b1"]))
        fslab = fill(fslab, _F_OFF, f"mlp_b2{l}", row(b["mlp_b2"]))
    fslab = fill(fslab, _F_OFF, "ln_post_g", row(params["ln_post_g"]))
    fslab = fill(fslab, _F_OFF, "ln_post_b", row(params["ln_post_b"]))
    fslab = fill(fslab, _F_OFF, "head_b", row(params["head_b"]))

    return wslab.astype(jnp.bfloat16), fslab


# ----------------------------- wrapper ---------------------------------------
def _choose_block_batch(B):
    # Batch images per grid step (fills the MXU M-dim, amortizes per-step
    # overhead); when B is large enough, keep a grid of >= 2 so both v7x
    # TensorCores get work.  B is padded up to a multiple of BB.
    if B >= 4:
        return min(8, B // 2)
    return B


def clip_lp_forward(x, packed):
    wslab, fslab = packed
    # forward: x = x.view(-1, 3, IMG, IMG)
    x = x.reshape(-1, 3, IMG, IMG).astype(jnp.float32)
    B = x.shape[0]
    BB = _choose_block_batch(B)
    GB = -(-B // BB)
    B_pad = GB * BB

    # Patchify (stride==kernel conv as matmul input); row 0 of each image is
    # the CLS slot, rows NTOK..T_PAD-1 and any padded images are zeros.
    p = x.reshape(B, 3, GRID, PATCH, GRID, PATCH)
    p = p.transpose(0, 2, 4, 1, 3, 5).reshape(B, GRID * GRID, CPP)
    patches = jnp.pad(p, ((0, B_pad - B), (1, T_PAD - NTOK), (0, 0)))
    patches = patches.reshape(GB, BB * T_PAD, CPP).astype(jnp.bfloat16)

    out = pl.pallas_call(
        _clip_lp_kernel,
        grid=(GB,),
        out_shape=jax.ShapeDtypeStruct((GB, BB, LANE), jnp.float32),
        in_specs=[
            pl.BlockSpec((None, BB * T_PAD, CPP), lambda g: (g, 0, 0)),
            pl.BlockSpec((_W_ROWS, LANE), lambda g: (0, 0)),
            pl.BlockSpec((_F_ROWS, LANE), lambda g: (0, 0)),
        ],
        out_specs=pl.BlockSpec((None, BB, LANE), lambda g: (g, 0, 0)),
        compiler_params=pltpu.CompilerParams(
            dimension_semantics=("parallel",)),
    )(patches, wslab, fslab)

    logits = out.reshape(B_pad, LANE)[:B, :NUM_CLASSES]
    # Reference applies the same frozen head twice; compute once, return twice.
    return logits, logits


# ----------------------------- deterministic init ---------------------------
def init_params(key):
    keys = iter(jax.random.split(key, 32))

    def nrm(shape, std=0.02):
        return std * jax.random.normal(next(keys), shape, dtype=jnp.float32)

    params = {
        "conv_w": nrm((WIDTH, 3, PATCH, PATCH)),
        "class_emb": nrm((WIDTH,)),
        "pos_emb": nrm((NTOK, WIDTH)),
        "ln_pre_g": jnp.ones((WIDTH,), jnp.float32),
        "ln_pre_b": jnp.zeros((WIDTH,), jnp.float32),
        "ln_post_g": jnp.ones((WIDTH,), jnp.float32),
        "ln_post_b": jnp.zeros((WIDTH,), jnp.float32),
        "proj": nrm((WIDTH, FEAT_DIM)),
        "head_w": nrm((NUM_CLASSES, FEAT_DIM)),
        "head_b": jnp.zeros((NUM_CLASSES,), jnp.float32),
        "blocks": [],
    }
    for _ in range(LAYERS):
        params["blocks"].append({
            "ln1_g": jnp.ones((WIDTH,), jnp.float32),
            "ln1_b": jnp.zeros((WIDTH,), jnp.float32),
            "ln2_g": jnp.ones((WIDTH,), jnp.float32),
            "ln2_b": jnp.zeros((WIDTH,), jnp.float32),
            "attn": {
                "in_proj_w": nrm((3 * WIDTH, WIDTH)),
                "in_proj_b": jnp.zeros((3 * WIDTH,), jnp.float32),
                "out_proj_w": nrm((WIDTH, WIDTH)),
                "out_proj_b": jnp.zeros((WIDTH,), jnp.float32),
            },
            "mlp_w1": nrm((4 * WIDTH, WIDTH)),
            "mlp_b1": jnp.zeros((4 * WIDTH,), jnp.float32),
            "mlp_w2": nrm((WIDTH, 4 * WIDTH)),
            "mlp_b2": jnp.zeros((WIDTH,), jnp.float32),
        })
    return params


# ----------------------------- main ------------------------------------------
if __name__ == "__main__":
    root = jax.random.PRNGKey(0)
    k_x, k_p = jax.random.split(root)

    x = jax.random.normal(k_x, (2, 3, IMG, IMG), dtype=jnp.float32)   # NCHW
    params = init_params(k_p)
    packed = jax.block_until_ready(pack_params(params))   # hoisted, one-time packing

    fwd = jax.jit(clip_lp_forward)
    output, jvp = fwd(x, packed)
    jax.block_until_ready((output, jvp))

    assert output.shape == (2, NUM_CLASSES) and jvp.shape == (2, NUM_CLASSES)
    assert bool(jnp.all(jnp.isfinite(output))) and bool(jnp.all(jnp.isfinite(jvp)))
    print("KERNEL_OK")
</pallas_src>

<mosaic_0001>
module attributes {stable_mosaic.version = 11 : i64} {
  func.func @_clip_lp_kernel(%arg0: i32, %arg1: memref<1x48x192xbf16, #tpu.memory_space<vmem>>, %arg2: memref<688x128xbf16, #tpu.memory_space<vmem>>, %arg3: memref<48x128xf32, #tpu.memory_space<vmem>>, %arg4: memref<1x2x128xf32, #tpu.memory_space<vmem>>) attributes {dimension_semantics = [#tpu.dimension_semantics<parallel>], iteration_bounds = array<i64: 1>, scalar_prefetch = 0 : i64, scratch_operands = 0 : i64, tpu.core_type = #tpu.core_type<tc>, window_params = [{transform_indices = @transform_0, window_bounds = array<i64: 1, 48, 192>}, {pipeline_mode = #tpu.pipeline_mode<synchronous>, transform_indices = @transform_1, window_bounds = array<i64: 688, 128>}, {pipeline_mode = #tpu.pipeline_mode<synchronous>, transform_indices = @transform_2, window_bounds = array<i64: 48, 128>}, {transform_indices = @transform_3, window_bounds = array<i64: 1, 2, 128>}]} {
    %c0 = arith.constant 0 : index
    %c0_0 = arith.constant 0 : index
    %c0_1 = arith.constant 0 : index
    %0 = vector.load %arg1[%c0, %c0_0, %c0_1] : memref<1x48x192xbf16, #tpu.memory_space<vmem>>, vector<1x48x192xbf16>
    %1 = vector.shape_cast %0 : vector<1x48x192xbf16> to vector<48x192xbf16>
    %c0_2 = arith.constant 0 : index
    %c0_3 = arith.constant 0 : index
    %2 = vector.load %arg2[%c0_2, %c0_3] : memref<688x128xbf16, #tpu.memory_space<vmem>>, vector<192x32xbf16>
    %cst = arith.constant dense<0.000000e+00> : vector<48x32xf32>
    %3 = tpu.matmul %1, %2, %cst {dimension_numbers = #tpu.dot_dimension_numbers<[1], [0], [0], [1], [0, 0, 1, 1], [], []>} : vector<48x192xbf16>, vector<192x32xbf16>, vector<48x32xf32> -> vector<48x32xf32>
    %c0_4 = arith.constant 0 : index
    %c0_5 = arith.constant 0 : index
    %4 = vector.load %arg3[%c0_4, %c0_5] : memref<48x128xf32, #tpu.memory_space<vmem>>, vector<24x32xf32>
    %5 = vector.shape_cast %3 : vector<48x32xf32> to vector<2x24x32xf32>
    %6 = vector.shape_cast %4 : vector<24x32xf32> to vector<1x24x32xf32>
    %7 = vector.broadcast %6 : vector<1x24x32xf32> to vector<2x24x32xf32>
    %8 = arith.addf %5, %7 : vector<2x24x32xf32>
    %9 = vector.shape_cast %8 : vector<2x24x32xf32> to vector<48x32xf32>
    %c24 = arith.constant 24 : index
    %c0_6 = arith.constant 0 : index
    %10 = vector.load %arg3[%c24, %c0_6] : memref<48x128xf32, #tpu.memory_space<vmem>>, vector<1x32xf32>
    %c25 = arith.constant 25 : index
    %c0_7 = arith.constant 0 : index
    %11 = vector.load %arg3[%c25, %c0_7] : memref<48x128xf32, #tpu.memory_space<vmem>>, vector<1x32xf32>
    %cst_8 = arith.constant dense<0.000000e+00> : vector<48xf32>
    %12 = vector.multi_reduction <add>, %9, %cst_8 [1] : vector<48x32xf32> to vector<48xf32>
    %13 = vector.shape_cast %12 : vector<48xf32> to vector<48x1xf32>
    %cst_9 = arith.constant 3.200000e+01 : f32
    %14 = vector.broadcast %cst_9 : f32 to vector<48x1xf32>
    %15 = arith.divf %13, %14 : vector<48x1xf32>
    %16 = vector.broadcast %15 : vector<48x1xf32> to vector<48x32xf32>
    %17 = arith.subf %9, %16 : vector<48x32xf32>
    %18 = arith.mulf %17, %17 : vector<48x32xf32>
    %cst_10 = arith.constant dense<0.000000e+00> : vector<48xf32>
    %19 = vector.multi_reduction <add>, %18, %cst_10 [1] : vector<48x32xf32> to vector<48xf32>
    %20 = vector.shape_cast %19 : vector<48xf32> to vector<48x1xf32>
    %cst_11 = arith.constant 3.200000e+01 : f32
    %21 = vector.broadcast %cst_11 : f32 to vector<48x1xf32>
    %22 = arith.divf %20, %21 : vector<48x1xf32>
    %cst_12 = arith.constant 9.99999974E-6 : f32
    %23 = vector.broadcast %cst_12 : f32 to vector<48x1xf32>
    %24 = arith.addf %22, %23 : vector<48x1xf32>
    %25 = math.rsqrt %24 : vector<48x1xf32>
    %26 = vector.broadcast %25 : vector<48x1xf32> to vector<48x32xf32>
    %27 = arith.mulf %17, %26 : vector<48x32xf32>
    %28 = vector.broadcast %10 : vector<1x32xf32> to vector<48x32xf32>
    %29 = arith.mulf %27, %28 : vector<48x32xf32>
    %30 = vector.broadcast %11 : vector<1x32xf32> to vector<48x32xf32>
    %31 = arith.addf %29, %30 : vector<48x32xf32>
    %32 = tpu.iota {dimensions = array<i32: 2>} : vector<1x24x24xi32>
    %c17_i32 = arith.constant 17 : i32
    %33 = vector.broadcast %c17_i32 : i32 to vector<1x24x24xi32>
    %34 = arith.cmpi slt, %32, %33 : vector<1x24x24xi32>
    %c26 = arith.constant 26 : index
    %c0_13 = arith.constant 0 : index
    %35 = vector.load %arg3[%c26, %c0_13] : memref<48x128xf32, #tpu.memory_space<vmem>>, vector<1x32xf32>
    %c27 = arith.constant 27 : index
    %c0_14 = arith.constant 0 : index
    %36 = vector.load %arg3[%c27, %c0_14] : memref<48x128xf32, #tpu.memory_space<vmem>>, vector<1x32xf32>
    %cst_15 = arith.constant dense<0.000000e+00> : vector<48xf32>
    %37 = vector.multi_reduction <add>, %31, %cst_15 [1] : vector<48x32xf32> to vector<48xf32>
    %38 = vector.shape_cast %37 : vector<48xf32> to vector<48x1xf32>
    %cst_16 = arith.constant 3.200000e+01 : f32
    %39 = vector.broadcast %cst_16 : f32 to vector<48x1xf32>
    %40 = arith.divf %38, %39 : vector<48x1xf32>
    %41 = vector.broadcast %40 : vector<48x1xf32> to vector<48x32xf32>
    %42 = arith.subf %31, %41 : vector<48x32xf32>
    %43 = arith.mulf %42, %42 : vector<48x32xf32>
    %cst_17 = arith.constant dense<0.000000e+00> : vector<48xf32>
    %44 = vector.multi_reduction <add>, %43, %cst_17 [1] : vector<48x32xf32> to vector<48xf32>
    %45 = vector.shape_cast %44 : vector<48xf32> to vector<48x1xf32>
    %cst_18 = arith.constant 3.200000e+01 : f32
    %46 = vector.broadcast %cst_18 : f32 to vector<48x1xf32>
    %47 = arith.divf %45, %46 : vector<48x1xf32>
    %cst_19 = arith.constant 9.99999974E-6 : f32
    %48 = vector.broadcast %cst_19 : f32 to vector<48x1xf32>
    %49 = arith.addf %47, %48 : vector<48x1xf32>
    %50 = math.rsqrt %49 : vector<48x1xf32>
    %51 = vector.broadcast %50 : vector<48x1xf32> to vector<48x32xf32>
    %52 = arith.mulf %42, %51 : vector<48x32xf32>
    %53 = vector.broadcast %35 : vector<1x32xf32> to vector<48x32xf32>
    %54 = arith.mulf %52, %53 : vector<48x32xf32>
    %55 = vector.broadcast %36 : vector<1x32xf32> to vector<48x32xf32>
    %56 = arith.addf %54, %55 : vector<48x32xf32>
    %c192 = arith.constant 192 : index
    %c0_20 = arith.constant 0 : index
    %57 = vector.load %arg2[%c192, %c0_20] : memref<688x128xbf16, #tpu.memory_space<vmem>>, vector<32x96xbf16>
    %58 = arith.truncf %56 : vector<48x32xf32> to vector<48x32xbf16>
    %cst_21 = arith.constant dense<0.000000e+00> : vector<48x96xf32>
    %59 = tpu.matmul %58, %57, %cst_21 {dimension_numbers = #tpu.dot_dimension_numbers<[1], [0], [0], [1], [0, 0, 1, 1], [], []>} : vector<48x32xbf16>, vector<32x96xbf16>, vector<48x96xf32> -> vector<48x96xf32>
    %c28 = arith.constant 28 : index
    %c0_22 = arith.constant 0 : index
    %60 = vector.load %arg3[%c28, %c0_22] : memref<48x128xf32, #tpu.memory_space<vmem>>, vector<1x96xf32>
    %61 = vector.broadcast %60 : vector<1x96xf32> to vector<48x96xf32>
    %62 = arith.addf %59, %61 : vector<48x96xf32>
    %63 = vector.shape_cast %62 : vector<48x96xf32> to vector<2x24x96xf32>
    %64 = vector.extract_strided_slice %63 {offsets = [0, 0, 0], sizes = [2, 24, 16], strides = [1, 1, 1]} : vector<2x24x96xf32> to vector<2x24x16xf32>
    %65 = arith.truncf %64 : vector<2x24x16xf32> to vector<2x24x16xbf16>
    %66 = vector.extract_strided_slice %63 {offsets = [0, 0, 32], sizes = [2, 24, 16], strides = [1, 1, 1]} : vector<2x24x96xf32> to vector<2x24x16xf32>
    %67 = arith.truncf %66 : vector<2x24x16xf32> to vector<2x24x16xbf16>
    %68 = vector.extract_strided_slice %63 {offsets = [0, 0, 64], sizes = [2, 24, 16], strides = [1, 1, 1]} : vector<2x24x96xf32> to vector<2x24x16xf32>
    %69 = arith.truncf %68 : vector<2x24x16xf32> to vector<2x24x16xbf16>
    "tpu.trace_start"() <{level = 10 : i32, message = "bqd,bkd->bqk"}> : () -> ()
    %cst_23 = arith.constant dense<0.000000e+00> : vector<2x24x24xf32>
    %70 = tpu.matmul %65, %67, %cst_23 {dimension_numbers = #tpu.dot_dimension_numbers<[2], [2], [1], [1], [0, 0, 0, 1, 1, 1], [0], [0]>} : vector<2x24x16xbf16>, vector<2x24x16xbf16>, vector<2x24x24xf32> -> vector<2x24x24xf32>
    "tpu.trace_stop"() : () -> ()
    %cst_24 = arith.constant 2.500000e-01 : f32
    %71 = vector.broadcast %cst_24 : f32 to vector<2x24x24xf32>
    %72 = arith.mulf %70, %71 : vector<2x24x24xf32>
    %cst_25 = arith.constant -1.000000e+30 : f32
    %73 = vector.shape_cast %34 : vector<1x24x24xi1> to vector<1x24x24xi1>
    %74 = vector.broadcast %73 : vector<1x24x24xi1> to vector<2x24x24xi1>
    %75 = vector.broadcast %cst_25 : f32 to vector<2x24x24xf32>
    %76 = arith.select %74, %72, %75 : vector<2x24x24xi1>, vector<2x24x24xf32>
    %cst_26 = arith.constant dense<0xFF800000> : vector<2x24xf32>
    %77 = vector.multi_reduction <maximumf>, %76, %cst_26 [2] : vector<2x24x24xf32> to vector<2x24xf32>
    %78 = vector.shape_cast %77 : vector<2x24xf32> to vector<2x24x1xf32>
    %79 = vector.broadcast %78 : vector<2x24x1xf32> to vector<2x24x24xf32>
    %80 = arith.subf %76, %79 : vector<2x24x24xf32>
    %81 = math.exp %80 : vector<2x24x24xf32>
    %cst_27 = arith.constant dense<0.000000e+00> : vector<2x24xf32>
    %82 = vector.multi_reduction <add>, %81, %cst_27 [2] : vector<2x24x24xf32> to vector<2x24xf32>
    %83 = vector.shape_cast %82 : vector<2x24xf32> to vector<2x24x1xf32>
    %84 = tpu.reciprocal %83 {approx = true} : vector<2x24x1xf32> -> vector<2x24x1xf32>
    %85 = vector.broadcast %84 : vector<2x24x1xf32> to vector<2x24x24xf32>
    %86 = arith.mulf %81, %85 : vector<2x24x24xf32>
    %87 = arith.truncf %86 : vector<2x24x24xf32> to vector<2x24x24xbf16>
    "tpu.trace_start"() <{level = 10 : i32, message = "bqk,bkd->bqd"}> : () -> ()
    %cst_28 = arith.constant dense<0.000000e+00> : vector<2x24x16xf32>
    %88 = tpu.matmul %87, %69, %cst_28 {dimension_numbers = #tpu.dot_dimension_numbers<[2], [1], [1], [2], [0, 0, 0, 1, 1, 2], [0], [0]>} : vector<2x24x24xbf16>, vector<2x24x16xbf16>, vector<2x24x16xf32> -> vector<2x24x16xf32>
    "tpu.trace_stop"() : () -> ()
    %89 = vector.extract_strided_slice %63 {offsets = [0, 0, 16], sizes = [2, 24, 16], strides = [1, 1, 1]} : vector<2x24x96xf32> to vector<2x24x16xf32>
    %90 = arith.truncf %89 : vector<2x24x16xf32> to vector<2x24x16xbf16>
    %91 = vector.extract_strided_slice %63 {offsets = [0, 0, 48], sizes = [2, 24, 16], strides = [1, 1, 1]} : vector<2x24x96xf32> to vector<2x24x16xf32>
    %92 = arith.truncf %91 : vector<2x24x16xf32> to vector<2x24x16xbf16>
    %93 = vector.extract_strided_slice %63 {offsets = [0, 0, 80], sizes = [2, 24, 16], strides = [1, 1, 1]} : vector<2x24x96xf32> to vector<2x24x16xf32>
    %94 = arith.truncf %93 : vector<2x24x16xf32> to vector<2x24x16xbf16>
    "tpu.trace_start"() <{level = 10 : i32, message = "bqd,bkd->bqk"}> : () -> ()
    %cst_29 = arith.constant dense<0.000000e+00> : vector<2x24x24xf32>
    %95 = tpu.matmul %90, %92, %cst_29 {dimension_numbers = #tpu.dot_dimension_numbers<[2], [2], [1], [1], [0, 0, 0, 1, 1, 1], [0], [0]>} : vector<2x24x16xbf16>, vector<2x24x16xbf16>, vector<2x24x24xf32> -> vector<2x24x24xf32>
    "tpu.trace_stop"() : () -> ()
    %cst_30 = arith.constant 2.500000e-01 : f32
    %96 = vector.broadcast %cst_30 : f32 to vector<2x24x24xf32>
    %97 = arith.mulf %95, %96 : vector<2x24x24xf32>
    %cst_31 = arith.constant -1.000000e+30 : f32
    %98 = vector.shape_cast %34 : vector<1x24x24xi1> to vector<1x24x24xi1>
    %99 = vector.broadcast %98 : vector<1x24x24xi1> to vector<2x24x24xi1>
    %100 = vector.broadcast %cst_31 : f32 to vector<2x24x24xf32>
    %101 = arith.select %99, %97, %100 : vector<2x24x24xi1>, vector<2x24x24xf32>
    %cst_32 = arith.constant dense<0xFF800000> : vector<2x24xf32>
    %102 = vector.multi_reduction <maximumf>, %101, %cst_32 [2] : vector<2x24x24xf32> to vector<2x24xf32>
    %103 = vector.shape_cast %102 : vector<2x24xf32> to vector<2x24x1xf32>
    %104 = vector.broadcast %103 : vector<2x24x1xf32> to vector<2x24x24xf32>
    %105 = arith.subf %101, %104 : vector<2x24x24xf32>
    %106 = math.exp %105 : vector<2x24x24xf32>
    %cst_33 = arith.constant dense<0.000000e+00> : vector<2x24xf32>
    %107 = vector.multi_reduction <add>, %106, %cst_33 [2] : vector<2x24x24xf32> to vector<2x24xf32>
    %108 = vector.shape_cast %107 : vector<2x24xf32> to vector<2x24x1xf32>
    %109 = tpu.reciprocal %108 {approx = true} : vector<2x24x1xf32> -> vector<2x24x1xf32>
    %110 = vector.broadcast %109 : vector<2x24x1xf32> to vector<2x24x24xf32>
    %111 = arith.mulf %106, %110 : vector<2x24x24xf32>
    %112 = arith.truncf %111 : vector<2x24x24xf32> to vector<2x24x24xbf16>
    "tpu.trace_start"() <{level = 10 : i32, message = "bqk,bkd->bqd"}> : () -> ()
    %cst_34 = arith.constant dense<0.000000e+00> : vector<2x24x16xf32>
    %113 = tpu.matmul %112, %94, %cst_34 {dimension_numbers = #tpu.dot_dimension_numbers<[2], [1], [1], [2], [0, 0, 0, 1, 1, 2], [0], [0]>} : vector<2x24x24xbf16>, vector<2x24x16xbf16>, vector<2x24x16xf32> -> vector<2x24x16xf32>
    "tpu.trace_stop"() : () -> ()
    %114 = tpu.concatenate %88, %113 in 2 : vector<2x24x16xf32>, vector<2x24x16xf32> -> vector<2x24x32xf32>
    %115 = vector.shape_cast %114 : vector<2x24x32xf32> to vector<48x32xf32>
    %c224 = arith.constant 224 : index
    %c0_35 = arith.constant 0 : index
    %116 = vector.load %arg2[%c224, %c0_35] : memref<688x128xbf16, #tpu.memory_space<vmem>>, vector<32x32xbf16>
    %117 = arith.truncf %115 : vector<48x32xf32> to vector<48x32xbf16>
    %cst_36 = arith.constant dense<0.000000e+00> : vector<48x32xf32>
    %118 = tpu.matmul %117, %116, %cst_36 {dimension_numbers = #tpu.dot_dimension_numbers<[1], [0], [0], [1], [0, 0, 1, 1], [], []>} : vector<48x32xbf16>, vector<32x32xbf16>, vector<48x32xf32> -> vector<48x32xf32>
    %119 = arith.addf %31, %118 : vector<48x32xf32>
    %c29 = arith.constant 29 : index
    %c0_37 = arith.constant 0 : index
    %120 = vector.load %arg3[%c29, %c0_37] : memref<48x128xf32, #tpu.memory_space<vmem>>, vector<1x32xf32>
    %121 = vector.broadcast %120 : vector<1x32xf32> to vector<48x32xf32>
    %122 = arith.addf %119, %121 : vector<48x32xf32>
    %c30 = arith.constant 30 : index
    %c0_38 = arith.constant 0 : index
    %123 = vector.load %arg3[%c30, %c0_38] : memref<48x128xf32, #tpu.memory_space<vmem>>, vector<1x32xf32>
    %c31 = arith.constant 31 : index
    %c0_39 = arith.constant 0 : index
    %124 = vector.load %arg3[%c31, %c0_39] : memref<48x128xf32, #tpu.memory_space<vmem>>, vector<1x32xf32>
    %cst_40 = arith.constant dense<0.000000e+00> : vector<48xf32>
    %125 = vector.multi_reduction <add>, %122, %cst_40 [1] : vector<48x32xf32> to vector<48xf32>
    %126 = vector.shape_cast %125 : vector<48xf32> to vector<48x1xf32>
    %cst_41 = arith.constant 3.200000e+01 : f32
    %127 = vector.broadcast %cst_41 : f32 to vector<48x1xf32>
    %128 = arith.divf %126, %127 : vector<48x1xf32>
    %129 = vector.broadcast %128 : vector<48x1xf32> to vector<48x32xf32>
    %130 = arith.subf %122, %129 : vector<48x32xf32>
    %131 = arith.mulf %130, %130 : vector<48x32xf32>
    %cst_42 = arith.constant dense<0.000000e+00> : vector<48xf32>
    %132 = vector.multi_reduction <add>, %131, %cst_42 [1] : vector<48x32xf32> to vector<48xf32>
    %133 = vector.shape_cast %132 : vector<48xf32> to vector<48x1xf32>
    %cst_43 = arith.constant 3.200000e+01 : f32
    %134 = vector.broadcast %cst_43 : f32 to vector<48x1xf32>
    %135 = arith.divf %133, %134 : vector<48x1xf32>
    %cst_44 = arith.constant 9.99999974E-6 : f32
    %136 = vector.broadcast %cst_44 : f32 to vector<48x1xf32>
    %137 = arith.addf %135, %136 : vector<48x1xf32>
    %138 = math.rsqrt %137 : vector<48x1xf32>
    %139 = vector.broadcast %138 : vector<48x1xf32> to vector<48x32xf32>
    %140 = arith.mulf %130, %139 : vector<48x32xf32>
    %141 = vector.broadcast %123 : vector<1x32xf32> to vector<48x32xf32>
    %142 = arith.mulf %140, %141 : vector<48x32xf32>
    %143 = vector.broadcast %124 : vector<1x32xf32> to vector<48x32xf32>
    %144 = arith.addf %142, %143 : vector<48x32xf32>
    %c256 = arith.constant 256 : index
    %c0_45 = arith.constant 0 : index
    %145 = vector.load %arg2[%c256, %c0_45] : memref<688x128xbf16, #tpu.memory_space<vmem>>, vector<32x128xbf16>
    %146 = arith.truncf %144 : vector<48x32xf32> to vector<48x32xbf16>
    %cst_46 = arith.constant dense<0.000000e+00> : vector<48x128xf32>
    %147 = tpu.matmul %146, %145, %cst_46 {dimension_numbers = #tpu.dot_dimension_numbers<[1], [0], [0], [1], [0, 0, 1, 1], [], []>} : vector<48x32xbf16>, vector<32x128xbf16>, vector<48x128xf32> -> vector<48x128xf32>
    %c32 = arith.constant 32 : index
    %c0_47 = arith.constant 0 : index
    %148 = vector.load %arg3[%c32, %c0_47] : memref<48x128xf32, #tpu.memory_space<vmem>>, vector<1x128xf32>
    %149 = vector.broadcast %148 : vector<1x128xf32> to vector<48x128xf32>
    %150 = arith.addf %147, %149 : vector<48x128xf32>
    %cst_48 = arith.constant 1.702000e+00 : f32
    %151 = vector.broadcast %cst_48 : f32 to vector<48x128xf32>
    %152 = arith.mulf %151, %150 : vector<48x128xf32>
    %153 = arith.negf %152 : vector<48x128xf32>
    %154 = math.exp %153 : vector<48x128xf32>
    %cst_49 = arith.constant 1.000000e+00 : f32
    %155 = vector.broadcast %cst_49 : f32 to vector<48x128xf32>
    %156 = arith.addf %155, %154 : vector<48x128xf32>
    %157 = arith.divf %155, %156 : vector<48x128xf32>
    %158 = arith.mulf %150, %157 : vector<48x128xf32>
    %c288 = arith.constant 288 : index
    %c0_50 = arith.constant 0 : index
    %159 = vector.load %arg2[%c288, %c0_50] : memref<688x128xbf16, #tpu.memory_space<vmem>>, vector<128x32xbf16>
    %160 = arith.truncf %158 : vector<48x128xf32> to vector<48x128xbf16>
    %cst_51 = arith.constant dense<0.000000e+00> : vector<48x32xf32>
    %161 = tpu.matmul %160, %159, %cst_51 {dimension_numbers = #tpu.dot_dimension_numbers<[1], [0], [0], [1], [0, 0, 1, 1], [], []>} : vector<48x128xbf16>, vector<128x32xbf16>, vector<48x32xf32> -> vector<48x32xf32>
    %162 = arith.addf %122, %161 : vector<48x32xf32>
    %c33 = arith.constant 33 : index
    %c0_52 = arith.constant 0 : index
    %163 = vector.load %arg3[%c33, %c0_52] : memref<48x128xf32, #tpu.memory_space<vmem>>, vector<1x32xf32>
    %164 = vector.broadcast %163 : vector<1x32xf32> to vector<48x32xf32>
    %165 = arith.addf %162, %164 : vector<48x32xf32>
    %c34 = arith.constant 34 : index
    %c0_53 = arith.constant 0 : index
    %166 = vector.load %arg3[%c34, %c0_53] : memref<48x128xf32, #tpu.memory_space<vmem>>, vector<1x32xf32>
    %c35 = arith.constant 35 : index
    %c0_54 = arith.constant 0 : index
    %167 = vector.load %arg3[%c35, %c0_54] : memref<48x128xf32, #tpu.memory_space<vmem>>, vector<1x32xf32>
    %cst_55 = arith.constant dense<0.000000e+00> : vector<48xf32>
    %168 = vector.multi_reduction <add>, %165, %cst_55 [1] : vector<48x32xf32> to vector<48xf32>
    %169 = vector.shape_cast %168 : vector<48xf32> to vector<48x1xf32>
    %cst_56 = arith.constant 3.200000e+01 : f32
    %170 = vector.broadcast %cst_56 : f32 to vector<48x1xf32>
    %171 = arith.divf %169, %170 : vector<48x1xf32>
    %172 = vector.broadcast %171 : vector<48x1xf32> to vector<48x32xf32>
    %173 = arith.subf %165, %172 : vector<48x32xf32>
    %174 = arith.mulf %173, %173 : vector<48x32xf32>
    %cst_57 = arith.constant dense<0.000000e+00> : vector<48xf32>
    %175 = vector.multi_reduction <add>, %174, %cst_57 [1] : vector<48x32xf32> to vector<48xf32>
    %176 = vector.shape_cast %175 : vector<48xf32> to vector<48x1xf32>
    %cst_58 = arith.constant 3.200000e+01 : f32
    %177 = vector.broadcast %cst_58 : f32 to vector<48x1xf32>
    %178 = arith.divf %176, %177 : vector<48x1xf32>
    %cst_59 = arith.constant 9.99999974E-6 : f32
    %179 = vector.broadcast %cst_59 : f32 to vector<48x1xf32>
    %180 = arith.addf %178, %179 : vector<48x1xf32>
    %181 = math.rsqrt %180 : vector<48x1xf32>
    %182 = vector.broadcast %181 : vector<48x1xf32> to vector<48x32xf32>
    %183 = arith.mulf %173, %182 : vector<48x32xf32>
    %184 = vector.broadcast %166 : vector<1x32xf32> to vector<48x32xf32>
    %185 = arith.mulf %183, %184 : vector<48x32xf32>
    %186 = vector.broadcast %167 : vector<1x32xf32> to vector<48x32xf32>
    %187 = arith.addf %185, %186 : vector<48x32xf32>
    %c416 = arith.constant 416 : index
    %c0_60 = arith.constant 0 : index
    %188 = vector.load %arg2[%c416, %c0_60] : memref<688x128xbf16, #tpu.memory_space<vmem>>, vector<32x96xbf16>
    %189 = arith.truncf %187 : vector<48x32xf32> to vector<48x32xbf16>
    %cst_61 = arith.constant dense<0.000000e+00> : vector<48x96xf32>
    %190 = tpu.matmul %189, %188, %cst_61 {dimension_numbers = #tpu.dot_dimension_numbers<[1], [0], [0], [1], [0, 0, 1, 1], [], []>} : vector<48x32xbf16>, vector<32x96xbf16>, vector<48x96xf32> -> vector<48x96xf32>
    %c36 = arith.constant 36 : index
    %c0_62 = arith.constant 0 : index
    %191 = vector.load %arg3[%c36, %c0_62] : memref<48x128xf32, #tpu.memory_space<vmem>>, vector<1x96xf32>
    %192 = vector.broadcast %191 : vector<1x96xf32> to vector<48x96xf32>
    %193 = arith.addf %190, %192 : vector<48x96xf32>
    %194 = vector.shape_cast %193 : vector<48x96xf32> to vector<2x24x96xf32>
    %195 = vector.extract_strided_slice %194 {offsets = [0, 0, 0], sizes = [2, 24, 16], strides = [1, 1, 1]} : vector<2x24x96xf32> to vector<2x24x16xf32>
    %196 = arith.truncf %195 : vector<2x24x16xf32> to vector<2x24x16xbf16>
    %197 = vector.extract_strided_slice %194 {offsets = [0, 0, 32], sizes = [2, 24, 16], strides = [1, 1, 1]} : vector<2x24x96xf32> to vector<2x24x16xf32>
    %198 = arith.truncf %197 : vector<2x24x16xf32> to vector<2x24x16xbf16>
    %199 = vector.extract_strided_slice %194 {offsets = [0, 0, 64], sizes = [2, 24, 16], strides = [1, 1, 1]} : vector<2x24x96xf32> to vector<2x24x16xf32>
    %200 = arith.truncf %199 : vector<2x24x16xf32> to vector<2x24x16xbf16>
    "tpu.trace_start"() <{level = 10 : i32, message = "bqd,bkd->bqk"}> : () -> ()
    %cst_63 = arith.constant dense<0.000000e+00> : vector<2x24x24xf32>
    %201 = tpu.matmul %196, %198, %cst_63 {dimension_numbers = #tpu.dot_dimension_numbers<[2], [2], [1], [1], [0, 0, 0, 1, 1, 1], [0], [0]>} : vector<2x24x16xbf16>, vector<2x24x16xbf16>, vector<2x24x24xf32> -> vector<2x24x24xf32>
    "tpu.trace_stop"() : () -> ()
    %cst_64 = arith.constant 2.500000e-01 : f32
    %202 = vector.broadcast %cst_64 : f32 to vector<2x24x24xf32>
    %203 = arith.mulf %201, %202 : vector<2x24x24xf32>
    %cst_65 = arith.constant -1.000000e+30 : f32
    %204 = vector.shape_cast %34 : vector<1x24x24xi1> to vector<1x24x24xi1>
    %205 = vector.broadcast %204 : vector<1x24x24xi1> to vector<2x24x24xi1>
    %206 = vector.broadcast %cst_65 : f32 to vector<2x24x24xf32>
    %207 = arith.select %205, %203, %206 : vector<2x24x24xi1>, vector<2x24x24xf32>
    %cst_66 = arith.constant dense<0xFF800000> : vector<2x24xf32>
    %208 = vector.multi_reduction <maximumf>, %207, %cst_66 [2] : vector<2x24x24xf32> to vector<2x24xf32>
    %209 = vector.shape_cast %208 : vector<2x24xf32> to vector<2x24x1xf32>
    %210 = vector.broadcast %209 : vector<2x24x1xf32> to vector<2x24x24xf32>
    %211 = arith.subf %207, %210 : vector<2x24x24xf32>
    %212 = math.exp %211 : vector<2x24x24xf32>
    %cst_67 = arith.constant dense<0.000000e+00> : vector<2x24xf32>
    %213 = vector.multi_reduction <add>, %212, %cst_67 [2] : vector<2x24x24xf32> to vector<2x24xf32>
    %214 = vector.shape_cast %213 : vector<2x24xf32> to vector<2x24x1xf32>
    %215 = tpu.reciprocal %214 {approx = true} : vector<2x24x1xf32> -> vector<2x24x1xf32>
    %216 = vector.broadcast %215 : vector<2x24x1xf32> to vector<2x24x24xf32>
    %217 = arith.mulf %212, %216 : vector<2x24x24xf32>
    %218 = arith.truncf %217 : vector<2x24x24xf32> to vector<2x24x24xbf16>
    "tpu.trace_start"() <{level = 10 : i32, message = "bqk,bkd->bqd"}> : () -> ()
    %cst_68 = arith.constant dense<0.000000e+00> : vector<2x24x16xf32>
    %219 = tpu.matmul %218, %200, %cst_68 {dimension_numbers = #tpu.dot_dimension_numbers<[2], [1], [1], [2], [0, 0, 0, 1, 1, 2], [0], [0]>} : vector<2x24x24xbf16>, vector<2x24x16xbf16>, vector<2x24x16xf32> -> vector<2x24x16xf32>
    "tpu.trace_stop"() : () -> ()
    %220 = vector.extract_strided_slice %194 {offsets = [0, 0, 16], sizes = [2, 24, 16], strides = [1, 1, 1]} : vector<2x24x96xf32> to vector<2x24x16xf32>
    %221 = arith.truncf %220 : vector<2x24x16xf32> to vector<2x24x16xbf16>
    %222 = vector.extract_strided_slice %194 {offsets = [0, 0, 48], sizes = [2, 24, 16], strides = [1, 1, 1]} : vector<2x24x96xf32> to vector<2x24x16xf32>
    %223 = arith.truncf %222 : vector<2x24x16xf32> to vector<2x24x16xbf16>
    %224 = vector.extract_strided_slice %194 {offsets = [0, 0, 80], sizes = [2, 24, 16], strides = [1, 1, 1]} : vector<2x24x96xf32> to vector<2x24x16xf32>
    %225 = arith.truncf %224 : vector<2x24x16xf32> to vector<2x24x16xbf16>
    "tpu.trace_start"() <{level = 10 : i32, message = "bqd,bkd->bqk"}> : () -> ()
    %cst_69 = arith.constant dense<0.000000e+00> : vector<2x24x24xf32>
    %226 = tpu.matmul %221, %223, %cst_69 {dimension_numbers = #tpu.dot_dimension_numbers<[2], [2], [1], [1], [0, 0, 0, 1, 1, 1], [0], [0]>} : vector<2x24x16xbf16>, vector<2x24x16xbf16>, vector<2x24x24xf32> -> vector<2x24x24xf32>
    "tpu.trace_stop"() : () -> ()
    %cst_70 = arith.constant 2.500000e-01 : f32
    %227 = vector.broadcast %cst_70 : f32 to vector<2x24x24xf32>
    %228 = arith.mulf %226, %227 : vector<2x24x24xf32>
    %cst_71 = arith.constant -1.000000e+30 : f32
    %229 = vector.shape_cast %34 : vector<1x24x24xi1> to vector<1x24x24xi1>
    %230 = vector.broadcast %229 : vector<1x24x24xi1> to vector<2x24x24xi1>
    %231 = vector.broadcast %cst_71 : f32 to vector<2x24x24xf32>
    %232 = arith.select %230, %228, %231 : vector<2x24x24xi1>, vector<2x24x24xf32>
    %cst_72 = arith.constant dense<0xFF800000> : vector<2x24xf32>
    %233 = vector.multi_reduction <maximumf>, %232, %cst_72 [2] : vector<2x24x24xf32> to vector<2x24xf32>
    %234 = vector.shape_cast %233 : vector<2x24xf32> to vector<2x24x1xf32>
    %235 = vector.broadcast %234 : vector<2x24x1xf32> to vector<2x24x24xf32>
    %236 = arith.subf %232, %235 : vector<2x24x24xf32>
    %237 = math.exp %236 : vector<2x24x24xf32>
    %cst_73 = arith.constant dense<0.000000e+00> : vector<2x24xf32>
    %238 = vector.multi_reduction <add>, %237, %cst_73 [2] : vector<2x24x24xf32> to vector<2x24xf32>
    %239 = vector.shape_cast %238 : vector<2x24xf32> to vector<2x24x1xf32>
    %240 = tpu.reciprocal %239 {approx = true} : vector<2x24x1xf32> -> vector<2x24x1xf32>
    %241 = vector.broadcast %240 : vector<2x24x1xf32> to vector<2x24x24xf32>
    %242 = arith.mulf %237, %241 : vector<2x24x24xf32>
    %243 = arith.truncf %242 : vector<2x24x24xf32> to vector<2x24x24xbf16>
    "tpu.trace_start"() <{level = 10 : i32, message = "bqk,bkd->bqd"}> : () -> ()
    %cst_74 = arith.constant dense<0.000000e+00> : vector<2x24x16xf32>
    %244 = tpu.matmul %243, %225, %cst_74 {dimension_numbers = #tpu.dot_dimension_numbers<[2], [1], [1], [2], [0, 0, 0, 1, 1, 2], [0], [0]>} : vector<2x24x24xbf16>, vector<2x24x16xbf16>, vector<2x24x16xf32> -> vector<2x24x16xf32>
    "tpu.trace_stop"() : () -> ()
    %245 = tpu.concatenate %219, %244 in 2 : vector<2x24x16xf32>, vector<2x24x16xf32> -> vector<2x24x32xf32>
    %246 = vector.shape_cast %245 : vector<2x24x32xf32> to vector<48x32xf32>
    %c448 = arith.constant 448 : index
    %c0_75 = arith.constant 0 : index
    %247 = vector.load %arg2[%c448, %c0_75] : memref<688x128xbf16, #tpu.memory_space<vmem>>, vector<32x32xbf16>
    %248 = arith.truncf %246 : vector<48x32xf32> to vector<48x32xbf16>
    %cst_76 = arith.constant dense<0.000000e+00> : vector<48x32xf32>
    %249 = tpu.matmul %248, %247, %cst_76 {dimension_numbers = #tpu.dot_dimension_numbers<[1], [0], [0], [1], [0, 0, 1, 1], [], []>} : vector<48x32xbf16>, vector<32x32xbf16>, vector<48x32xf32> -> vector<48x32xf32>
    %250 = arith.addf %165, %249 : vector<48x32xf32>
    %c37 = arith.constant 37 : index
    %c0_77 = arith.constant 0 : index
    %251 = vector.load %arg3[%c37, %c0_77] : memref<48x128xf32, #tpu.memory_space<vmem>>, vector<1x32xf32>
    %252 = vector.broadcast %251 : vector<1x32xf32> to vector<48x32xf32>
    %253 = arith.addf %250, %252 : vector<48x32xf32>
    %c38 = arith.constant 38 : index
    %c0_78 = arith.constant 0 : index
    %254 = vector.load %arg3[%c38, %c0_78] : memref<48x128xf32, #tpu.memory_space<vmem>>, vector<1x32xf32>
    %c39 = arith.constant 39 : index
    %c0_79 = arith.constant 0 : index
    %255 = vector.load %arg3[%c39, %c0_79] : memref<48x128xf32, #tpu.memory_space<vmem>>, vector<1x32xf32>
    %cst_80 = arith.constant dense<0.000000e+00> : vector<48xf32>
    %256 = vector.multi_reduction <add>, %253, %cst_80 [1] : vector<48x32xf32> to vector<48xf32>
    %257 = vector.shape_cast %256 : vector<48xf32> to vector<48x1xf32>
    %cst_81 = arith.constant 3.200000e+01 : f32
    %258 = vector.broadcast %cst_81 : f32 to vector<48x1xf32>
    %259 = arith.divf %257, %258 : vector<48x1xf32>
    %260 = vector.broadcast %259 : vector<48x1xf32> to vector<48x32xf32>
    %261 = arith.subf %253, %260 : vector<48x32xf32>
    %262 = arith.mulf %261, %261 : vector<48x32xf32>
    %cst_82 = arith.constant dense<0.000000e+00> : vector<48xf32>
    %263 = vector.multi_reduction <add>, %262, %cst_82 [1] : vector<48x32xf32> to vector<48xf32>
    %264 = vector.shape_cast %263 : vector<48xf32> to vector<48x1xf32>
    %cst_83 = arith.constant 3.200000e+01 : f32
    %265 = vector.broadcast %cst_83 : f32 to vector<48x1xf32>
    %266 = arith.divf %264, %265 : vector<48x1xf32>
    %cst_84 = arith.constant 9.99999974E-6 : f32
    %267 = vector.broadcast %cst_84 : f32 to vector<48x1xf32>
    %268 = arith.addf %266, %267 : vector<48x1xf32>
    %269 = math.rsqrt %268 : vector<48x1xf32>
    %270 = vector.broadcast %269 : vector<48x1xf32> to vector<48x32xf32>
    %271 = arith.mulf %261, %270 : vector<48x32xf32>
    %272 = vector.broadcast %254 : vector<1x32xf32> to vector<48x32xf32>
    %273 = arith.mulf %271, %272 : vector<48x32xf32>
    %274 = vector.broadcast %255 : vector<1x32xf32> to vector<48x32xf32>
    %275 = arith.addf %273, %274 : vector<48x32xf32>
    %c480 = arith.constant 480 : index
    %c0_85 = arith.constant 0 : index
    %276 = vector.load %arg2[%c480, %c0_85] : memref<688x128xbf16, #tpu.memory_space<vmem>>, vector<32x128xbf16>
    %277 = arith.truncf %275 : vector<48x32xf32> to vector<48x32xbf16>
    %cst_86 = arith.constant dense<0.000000e+00> : vector<48x128xf32>
    %278 = tpu.matmul %277, %276, %cst_86 {dimension_numbers = #tpu.dot_dimension_numbers<[1], [0], [0], [1], [0, 0, 1, 1], [], []>} : vector<48x32xbf16>, vector<32x128xbf16>, vector<48x128xf32> -> vector<48x128xf32>
    %c40 = arith.constant 40 : index
    %c0_87 = arith.constant 0 : index
    %279 = vector.load %arg3[%c40, %c0_87] : memref<48x128xf32, #tpu.memory_space<vmem>>, vector<1x128xf32>
    %280 = vector.broadcast %279 : vector<1x128xf32> to vector<48x128xf32>
    %281 = arith.addf %278, %280 : vector<48x128xf32>
    %cst_88 = arith.constant 1.702000e+00 : f32
    %282 = vector.broadcast %cst_88 : f32 to vector<48x128xf32>
    %283 = arith.mulf %282, %281 : vector<48x128xf32>
    %284 = arith.negf %283 : vector<48x128xf32>
    %285 = math.exp %284 : vector<48x128xf32>
    %cst_89 = arith.constant 1.000000e+00 : f32
    %286 = vector.broadcast %cst_89 : f32 to vector<48x128xf32>
    %287 = arith.addf %286, %285 : vector<48x128xf32>
    %288 = arith.divf %286, %287 : vector<48x128xf32>
    %289 = arith.mulf %281, %288 : vector<48x128xf32>
    %c512 = arith.constant 512 : index
    %c0_90 = arith.constant 0 : index
    %290 = vector.load %arg2[%c512, %c0_90] : memref<688x128xbf16, #tpu.memory_space<vmem>>, vector<128x32xbf16>
    %291 = arith.truncf %289 : vector<48x128xf32> to vector<48x128xbf16>
    %cst_91 = arith.constant dense<0.000000e+00> : vector<48x32xf32>
    %292 = tpu.matmul %291, %290, %cst_91 {dimension_numbers = #tpu.dot_dimension_numbers<[1], [0], [0], [1], [0, 0, 1, 1], [], []>} : vector<48x128xbf16>, vector<128x32xbf16>, vector<48x32xf32> -> vector<48x32xf32>
    %293 = arith.addf %253, %292 : vector<48x32xf32>
    %c41 = arith.constant 41 : index
    %c0_92 = arith.constant 0 : index
    %294 = vector.load %arg3[%c41, %c0_92] : memref<48x128xf32, #tpu.memory_space<vmem>>, vector<1x32xf32>
    %295 = vector.broadcast %294 : vector<1x32xf32> to vector<48x32xf32>
    %296 = arith.addf %293, %295 : vector<48x32xf32>
    %297 = vector.shape_cast %296 : vector<48x32xf32> to vector<2x24x32xf32>
    %298 = tpu.iota {dimensions = array<i32: 1>} : vector<1x24x1xi32>
    %c0_i32 = arith.constant 0 : i32
    %299 = vector.broadcast %c0_i32 : i32 to vector<1x24x1xi32>
    %300 = arith.cmpi eq, %298, %299 : vector<1x24x1xi32>
    %301 = arith.extui %300 : vector<1x24x1xi1> to vector<1x24x1xi32>
    %302 = arith.sitofp %301 : vector<1x24x1xi32> to vector<1x24x1xf32>
    %303 = vector.broadcast %302 : vector<1x24x1xf32> to vector<2x24x32xf32>
    %304 = arith.mulf %297, %303 : vector<2x24x32xf32>
    %cst_93 = arith.constant dense<0.000000e+00> : vector<2x32xf32>
    %305 = vector.multi_reduction <add>, %304, %cst_93 [1] : vector<2x24x32xf32> to vector<2x32xf32>
    %c42 = arith.constant 42 : index
    %c0_94 = arith.constant 0 : index
    %306 = vector.load %arg3[%c42, %c0_94] : memref<48x128xf32, #tpu.memory_space<vmem>>, vector<1x32xf32>
    %c43 = arith.constant 43 : index
    %c0_95 = arith.constant 0 : index
    %307 = vector.load %arg3[%c43, %c0_95] : memref<48x128xf32, #tpu.memory_space<vmem>>, vector<1x32xf32>
    %cst_96 = arith.constant dense<0.000000e+00> : vector<2xf32>
    %308 = vector.multi_reduction <add>, %305, %cst_96 [1] : vector<2x32xf32> to vector<2xf32>
    %309 = vector.shape_cast %308 : vector<2xf32> to vector<2x1xf32>
    %cst_97 = arith.constant 3.200000e+01 : f32
    %310 = vector.broadcast %cst_97 : f32 to vector<2x1xf32>
    %311 = arith.divf %309, %310 : vector<2x1xf32>
    %312 = vector.broadcast %311 : vector<2x1xf32> to vector<2x32xf32>
    %313 = arith.subf %305, %312 : vector<2x32xf32>
    %314 = arith.mulf %313, %313 : vector<2x32xf32>
    %cst_98 = arith.constant dense<0.000000e+00> : vector<2xf32>
    %315 = vector.multi_reduction <add>, %314, %cst_98 [1] : vector<2x32xf32> to vector<2xf32>
    %316 = vector.shape_cast %315 : vector<2xf32> to vector<2x1xf32>
    %cst_99 = arith.constant 3.200000e+01 : f32
    %317 = vector.broadcast %cst_99 : f32 to vector<2x1xf32>
    %318 = arith.divf %316, %317 : vector<2x1xf32>
    %cst_100 = arith.constant 9.99999974E-6 : f32
    %319 = vector.broadcast %cst_100 : f32 to vector<2x1xf32>
    %320 = arith.addf %318, %319 : vector<2x1xf32>
    %321 = math.rsqrt %320 : vector<2x1xf32>
    %322 = vector.broadcast %321 : vector<2x1xf32> to vector<2x32xf32>
    %323 = arith.mulf %313, %322 : vector<2x32xf32>
    %324 = vector.broadcast %306 : vector<1x32xf32> to vector<2x32xf32>
    %325 = arith.mulf %323, %324 : vector<2x32xf32>
    %326 = vector.broadcast %307 : vector<1x32xf32> to vector<2x32xf32>
    %327 = arith.addf %325, %326 : vector<2x32xf32>
    %c640 = arith.constant 640 : index
    %c0_101 = arith.constant 0 : index
    %328 = vector.load %arg2[%c640, %c0_101] : memref<688x128xbf16, #tpu.memory_space<vmem>>, vector<32x16xbf16>
    %329 = arith.truncf %327 : vector<2x32xf32> to vector<2x32xbf16>
    %cst_102 = arith.constant dense<0.000000e+00> : vector<2x16xf32>
    %330 = tpu.matmul %329, %328, %cst_102 {dimension_numbers = #tpu.dot_dimension_numbers<[1], [0], [0], [1], [0, 0, 1, 1], [], []>} : vector<2x32xbf16>, vector<32x16xbf16>, vector<2x16xf32> -> vector<2x16xf32>
    %c672 = arith.constant 672 : index
    %c0_103 = arith.constant 0 : index
    %331 = vector.load %arg2[%c672, %c0_103] : memref<688x128xbf16, #tpu.memory_space<vmem>>, vector<16x128xbf16>
    %332 = arith.truncf %330 : vector<2x16xf32> to vector<2x16xbf16>
    %cst_104 = arith.constant dense<0.000000e+00> : vector<2x128xf32>
    %333 = tpu.matmul %332, %331, %cst_104 {dimension_numbers = #tpu.dot_dimension_numbers<[1], [0], [0], [1], [0, 0, 1, 1], [], []>} : vector<2x16xbf16>, vector<16x128xbf16>, vector<2x128xf32> -> vector<2x128xf32>
    %c44 = arith.constant 44 : index
    %c0_105 = arith.constant 0 : index
    %334 = vector.load %arg3[%c44, %c0_105] : memref<48x128xf32, #tpu.memory_space<vmem>>, vector<1x128xf32>
    %335 = vector.broadcast %334 : vector<1x128xf32> to vector<2x128xf32>
    %336 = arith.addf %333, %335 : vector<2x128xf32>
    %c0_106 = arith.constant 0 : index
    %c0_107 = arith.constant 0 : index
    %c0_108 = arith.constant 0 : index
    %337 = vector.load %arg4[%c0_106, %c0_107, %c0_108] : memref<1x2x128xf32, #tpu.memory_space<vmem>>, vector<1x2x128xf32>
    %338 = vector.shape_cast %337 : vector<1x2x128xf32> to vector<2x128xf32>
    %339 = vector.shape_cast %336 : vector<2x128xf32> to vector<1x2x128xf32>
    tpu.vector_store %arg4[%c0_106, %c0_107, %c0_108], %339 {strides = array<i32>} : memref<1x2x128xf32, #tpu.memory_space<vmem>>, vector<1x2x128xf32>,
    return
  }
  func.func @transform_0(%arg0: i32) -> (i32, i32, i32) {
    %c0_i32 = arith.constant 0 : i32
    %c0_i32_0 = arith.constant 0 : i32
    %c0_i32_1 = arith.constant 0 : i32
    return %arg0, %c0_i32, %c0_i32_0 : i32, i32, i32
  }
  func.func @transform_1(%arg0: i32) -> (i32, i32) {
    %c0_i32 = arith.constant 0 : i32
    %c0_i32_0 = arith.constant 0 : i32
    %c0_i32_1 = arith.constant 0 : i32
    return %c0_i32, %c0_i32_0 : i32, i32
  }
  func.func @transform_2(%arg0: i32) -> (i32, i32) {
    %c0_i32 = arith.constant 0 : i32
    %c0_i32_0 = arith.constant 0 : i32
    %c0_i32_1 = arith.constant 0 : i32
    return %c0_i32, %c0_i32_0 : i32, i32
  }
  func.func @transform_3(%arg0: i32) -> (i32, i32, i32) {
    %c0_i32 = arith.constant 0 : i32
    %c0_i32_0 = arith.constant 0 : i32
    %c0_i32_1 = arith.constant 0 : i32
    return %arg0, %c0_i32, %c0_i32_0 : i32, i32, i32
  }
}

</mosaic_0001>

<bundles_post_ra>
// kernel: clip_lp_forward.1
= control target key start
LH: loop header
LB: loop body
LE: loop exit
PB: predicated region body
PF: predicated region fallthrough
CT: control target
= control target key end

     0   :  { %v4194_v0 = vmov 0   ;;  %vm144_vm0 = vcmask 523264   ;;  %vm222_vm1 = vcmask 261120   ;;  %vm4196_vm2 = vmmov 0   ;;  %s4197_s13 = smov 96   ;;  %s4198_s14 = smov 64   ;;  %s5148_s1 = inlined_call_operand.vmem [shape: bf16[688,128], index: 1, kind: input, shape index: {}]   ;;  %s5149_s0 = inlined_call_operand.vmem [shape: bf16[1,48,192], index: 0, kind: input, shape index: {}]   ;;  %s5150_s2 = inlined_call_operand.vmem [shape: f32[48,128], index: 2, kind: input, shape index: {}]   ;;  %s5151_s3 = inlined_call_operand.vmem [shape: f32[1,2,128], index: 3, kind: output, shape index: {}]  }
   0x1   :  { %154 = vmatprep.subr.bf16.mxu0 %v4194_v0  ;;  %v3936_v1 = vld [vmem:[%s5148_s1 + $0x38] sm:$0xff]   ;;  %v3937_v2 = vld [vmem:[%s5148_s1 + $0x30] sm:$0xff]   ;;  %v3938_v3 = vld [vmem:[%s5148_s1 + $0x28] sm:$0xff]   ;;  %vm525_vm3 = vcmask 130048   ;;  %vm666_vm5 = vcmask 195584   ;;  %s4199_s15 = smov 80  }
   0x2   :  { %155 = vmatpush1.bf16.msra.mxu0 %v3936_v1  ;;  %v3939_v4 = vld [vmem:[%s5148_s1 + $0x20] sm:$0xff]   ;;  %v3940_v6 = vld [vmem:[%s5148_s1 + $0x18] sm:$0xff]   ;;  %v3941_v7 = vld [vmem:[%s5148_s1 + $0x10] sm:$0xff]   ;;  %vm748_vm6 = vcmask 1043456   ;;  %s4200_s16 = smov 112   ;;  %s4201_s17 = smov 48  }
   0x3   :  { %156 = vmatprep.subr.bf16.mxu0 %v4194_v0  ;;  %v3950_v5 = vld [vmem:[%s5149_s0 + $0x4] ss:$8 sps:$4 sm:$0xff]   ;;  %v3944_v10 = vld [vmem:[%s5148_s1 + $0x58] sm:$0xff]   ;;  %v3945_v11 = vld [vmem:[%s5148_s1 + $0x50] sm:$0xff]   ;;  %s4202_s22 = smov 16   ;;  %vm3145_vm8 = vcmask 1041409  }
   0x4   :  { %3338 = vmatprep.mubr.msk.bf16.mxu0 %vm144_vm0, %v3950_v5  ;;  %v3942_v8 = vld [vmem:[%s5148_s1 + $0x8] sm:$0xff]   ;;  %v3943_v9 = vld [vmem:[%s5148_s1] sm:$0xff]   ;;  %v3951_v15 = vld [vmem:[%s5149_s0 + $0x14] ss:$8 sps:$4 sm:$0xff]   ;;  %vm3148_vm9 = vcmask 254976  }
   0x5   :  { %v3946_v12 = vld [vmem:[%s5148_s1 + $0x48] sm:$0xff]   ;;  %v3947_v13 = vld [vmem:[%s5148_s1 + $0x40] sm:$0xff]   ;;  %v3953_v16 = vld [vmem:[%s5149_s0 + $0x10] ss:$8 sps:$4 sm:$0xff]  }
   0x6   :  { %157 = vmatpush1.bf16.msra.mxu0 %v3937_v2  ;;  %v3948_v14 = vld [vmem:[%s5149_s0] ss:$8 sps:$4 sm:$0xff]   ;;  %v3954_v17 = vld [vmem:[%s5149_s0 + $0x24] ss:$8 sps:$4 sm:$0xff]   ;;  %v213_v28 = vld [vmem:[%s5150_s2 + $0x10] sm:$0xff] }
   0x7   :  { %158 = vmatprep.subr.bf16.mxu0 %v4194_v0  ;;  %v3956_v18 = vld [vmem:[%s5149_s0 + $0x20] ss:$8 sps:$4 sm:$0xff]  }
   0x8   :  { %v211_v19 = vld [vmem:[%s5150_s2] sm:$0xff]  ;;  %v212_v23 = vld [vmem:[%s5150_s2 + $0x8] sm:$0xff] }
   0xa   :  { %159 = vmatpush1.bf16.msra.mxu0 %v3938_v3 }
   0xb   :  { %160 = vmatprep.subr.bf16.mxu0 %v4194_v0 }
   0xe   :  { %161 = vmatpush1.bf16.msra.mxu0 %v3939_v4 }
   0xf   :  { %162 = vmatprep.subr.bf16.mxu0 %v4194_v0 }
  0x12   :  { %163 = vmatpush1.bf16.msra.mxu0 %v3940_v6 }
  0x13   :  { %164 = vmatprep.subr.bf16.mxu0 %v4194_v0 }
  0x16   :  { %165 = vmatpush1.bf16.msra.mxu0 %v3941_v7 }
  0x17   :  { %166 = vmatprep.subr.bf16.mxu0 %v4194_v0 }
  0x1a   :  { %167 = vmatpush1.bf16.msra.mxu0 %v3942_v8 }
  0x1b   :  { %168 = vmatprep.subr.bf16.mxu0 %v4194_v0 }
  0x1e   :  { %169 = vmatpush1.bf16.msra.mxu0 %v3943_v9 }
  0x1f   :  { %178 = vmatprep.subr.bf16.mxu0 %v4194_v0 }
  0x22   :  { %179 = vmatpush2.bf16.msra.mxu0 %v3944_v10 }
  0x23   :  { %180 = vmatprep.subr.bf16.mxu0 %v4194_v0 }
  0x26   :  { %181 = vmatpush2.bf16.msra.mxu0 %v3945_v11 }
  0x27   :  { %182 = vmatprep.subr.bf16.mxu0 %v4194_v0 }
  0x2a   :  { %183 = vmatpush2.bf16.msra.mxu0 %v3946_v12 }
  0x2b   :  { %184 = vmatprep.subr.bf16.mxu0 %v4194_v0 }
  0x2e   :  { %185 = vmatpush2.bf16.msra.mxu0 %v3947_v13 }
  0x31   :  { %187 = vmatmul.mubr.bf16.vlgmr.msra.gmra.mxu0 %v3948_v14 }
  0x32   :  { %3339 = vmatprep.mubr.msk.bf16.mxu0 %vm144_vm0, %v3951_v15 }
  0x39   :  { %195 = vmatmul.mubr.bf16.gmra.mxu0 %v3953_v16 }
  0x3a   :  { %3340 = vmatprep.mubr.msk.bf16.mxu0 %vm144_vm0, %v3954_v17 }
  0x41   :  { %203 = vmatmul.mubr.bf16.gmra.mxu0 %v3956_v18 }
  0xf1   :  { %v188_v20 = vpop.f32.mrf.mxu0 }
  0xf2   :  { %v214_v21 = vadd.f32 %v211_v19, %v188_v20 }
  0xf3   :  { %v190_v22 = vpop.f32.mrf.mxu0 }
  0xf4   :  { %v223_v24 = vsel %vm222_vm1, %v214_v21, 0.0 }
  0xf5   :  { %224 = vadd.xlane.f32.xlu0 %v223_v24  ;;  %v191_v25 = vpop.f32.mrf.mxu0 }
  0xf6   :  { %v215_v26 = vadd.f32 %v212_v23, %v191_v25 }
  0xf7   :  { %v193_v27 = vpop.f32.mrf.mxu0 }
  0xf8   :  { %v226_v29 = vsel %vm222_vm1, %v215_v26, 0.0  ;;  %v3341_v27 = vld [vmem:[%s5150_s2 + $0x18] ss:$0 sm:$0xff] }
  0xf9   :  { %227 = vadd.xlane.f32.xlu0 %v226_v29  ;;  %v196_v30 = vpop.f32.mrf.mxu0 }
  0xfa   :  { %v216_v31 = vadd.f32 %v213_v28, %v196_v30 }
  0xfb   :  { %v198_v32 = vpop.f32.mrf.mxu0 }
  0xfc   :  { %v229_v33 = vsel %vm222_vm1, %v216_v31, 0.0 }
  0xfd   :  { %230 = vadd.xlane.f32.xlu1 %v229_v33  ;;  %v199_v34 = vpop.f32.mrf.mxu0 }
  0xfe   :  { %v217_v35 = vadd.f32 %v211_v19, %v199_v34 }
  0xff   :  { %v201_v36 = vpop.f32.mrf.mxu0 }
 0x100   :  { %v232_v37 = vsel %vm222_vm1, %v217_v35, 0.0 }
 0x101   :  { %233 = vadd.xlane.f32.xlu1 %v232_v37  ;;  %v204_v38 = vpop.f32.mrf.mxu0 }
 0x102   :  { %v218_v39 = vadd.f32 %v212_v23, %v204_v38 }
 0x103   :  { %v206_v40 = vpop.f32.mrf.mxu0 }
 0x104   :  { %v235_v41 = vsel %vm222_vm1, %v218_v39, 0.0 }
 0x105   :  { %236 = vadd.xlane.f32.xlu0 %v235_v41  ;;  %v207_v42 = vpop.f32.mrf.mxu0 }
 0x106   :  { %v219_v43 = vadd.f32 %v213_v28, %v207_v42 }
 0x107   :  { %v209_v44 = vpop.f32.mrf.mxu0 }
 0x108   :  { %v238_v45 = vsel %vm222_vm1, %v219_v43, 0.0 }
 0x109   :  { %239 = vadd.xlane.f32.xlu1 %v238_v45 }
 0x17e   :  { %v225_v46 = vpop.xlane.xlu0 %224 }
 0x17f   :  { %v242_v47 = vmul.f32 0.03125, %v225_v46 }
 0x181   :  { %v248_v48 = vsub.f32 %v214_v21, %v242_v47 }
 0x182   :  { %v228_v49 = vpop.xlane.xlu0 %227 }
 0x183   :  { %v243_v50 = vmul.f32 0.03125, %v228_v49  ;;  %v254_v51 = vmul.f32 %v248_v48, %v248_v48 }
 0x185   :  { %v249_v52 = vsub.f32 %v215_v26, %v243_v50  ;;  %v260_v53 = vsel %vm222_vm1, %v254_v51, 0.0 }
 0x186   :  { %v231_v54 = vpop.xlane.xlu1 %230  ;;  %261 = vadd.xlane.f32.xlu0 %v260_v53 }
 0x187   :  { %v244_v55 = vmul.f32 0.03125, %v231_v54  ;;  %v255_v56 = vmul.f32 %v249_v52, %v249_v52 }
 0x189   :  { %v250_v57 = vsub.f32 %v216_v31, %v244_v55  ;;  %v263_v58 = vsel %vm222_vm1, %v255_v56, 0.0  ;;  %v3342_v31 = vld [vmem:[%s5150_s2 + $0x19] ss:$0 sm:$0xff] }
 0x18a   :  { %v234_v59 = vpop.xlane.xlu1 %233  ;;  %264 = vadd.xlane.f32.xlu1 %v263_v58 }
 0x18b   :  { %v245_v60 = vmul.f32 0.03125, %v234_v59  ;;  %v256_v61 = vmul.f32 %v250_v57, %v250_v57 }
 0x18d   :  { %v251_v62 = vsub.f32 %v217_v35, %v245_v60  ;;  %v266_v63 = vsel %vm222_vm1, %v256_v61, 0.0 }
 0x18e   :  { %267 = vadd.xlane.f32.xlu0 %v266_v63  ;;  %v237_v0 = vpop.xlane.xlu0 %236 }
 0x18f   :  { %v246_v1 = vmul.f32 0.03125, %v237_v0  ;;  %v257_v2 = vmul.f32 %v251_v62, %v251_v62 }
 0x191   :  { %v252_v3 = vsub.f32 %v218_v39, %v246_v1  ;;  %v269_v4 = vsel %vm222_vm1, %v257_v2, 0.0 }
 0x192   :  { %270 = vadd.xlane.f32.xlu1 %v269_v4  ;;  %v240_v5 = vpop.xlane.xlu1 %239 }
 0x193   :  { %v247_v6 = vmul.f32 0.03125, %v240_v5  ;;  %v258_v7 = vmul.f32 %v252_v3, %v252_v3 }
 0x195   :  { %v253_v8 = vsub.f32 %v219_v43, %v247_v6  ;;  %v272_v9 = vsel %vm222_vm1, %v258_v7, 0.0 }
 0x196   :  { %273 = vadd.xlane.f32.xlu0 %v272_v9 }
 0x197   :  { %v259_v10 = vmul.f32 %v253_v8, %v253_v8 }
 0x199   :  { %v275_v11 = vsel %vm222_vm1, %v259_v10, 0.0 }
 0x19a   :  { %276 = vadd.xlane.f32.xlu1 %v275_v11 }
 0x20f   :  { %v262_v12 = vpop.xlane.xlu0 %261 }
 0x210   :  { %v278_v13 = vmul.f32 0.03125, %v262_v12 }
 0x212   :  { %v284_v14 = vadd.f32 1e-05, %v278_v13 }
 0x213   :  { %v265_v15 = vpop.xlane.xlu1 %264 }
 0x214   :  { %3988 = vrsqrt.f32 %v284_v14  ;;  %v279_v16 = vmul.f32 0.03125, %v265_v15 }
 0x216   :  { %v285_v17 = vadd.f32 1e-05, %v279_v16 }
 0x217   :  { %v268_v18 = vpop.xlane.xlu0 %267 }
 0x218   :  { %3990 = vrsqrt.f32 %v285_v17  ;;  %v280_v19 = vmul.f32 0.03125, %v268_v18 }
 0x21a   :  { %v286_v20 = vadd.f32 1e-05, %v280_v19 }
 0x21b   :  { %v271_v21 = vpop.xlane.xlu1 %270 }
 0x21c   :  { %3992 = vrsqrt.f32 %v286_v20  ;;  %v281_v22 = vmul.f32 0.03125, %v271_v21 }
 0x21e   :  { %v287_v23 = vadd.f32 1e-05, %v281_v22 }
 0x21f   :  { %v274_v24 = vpop.xlane.xlu0 %273 }
 0x220   :  { %3994 = vrsqrt.f32 %v287_v23  ;;  %v282_v25 = vmul.f32 0.03125, %v274_v24 }
 0x221   :  { %v3989_v26 = vpop.eup %3988 }
 0x222   :  { %v288_v28 = vadd.f32 1e-05, %v282_v25  ;;  %v296_v29 = vmul.f32 %v3989_v26, %v248_v48 }
 0x223   :  { %v277_v30 = vpop.xlane.xlu1 %276 }
 0x224   :  { %3996 = vrsqrt.f32 %v288_v28  ;;  %v283_v32 = vmul.f32 0.03125, %v277_v30  ;;  %v306_v33 = vmul.f32 %v3341_v27, %v296_v29  ;;  %v3957_v28 = vld [vmem:[%s5148_s1 + $0x68] sm:$0xff]   ;;  %v4195_v29 = vmov 0.0   ;;  %v3958_v30 = vld [vmem:[%s5148_s1 + $0x60] sm:$0xff]  }
 0x225   :  { %v3991_v34 = vpop.eup %3990  ;;  %3579 = vmatprep.subr.bf16.mxu1 %v4195_v29  ;;  %3583 = vmatprep.mubr.msk.bf16.mxu1 %vm4196_vm2, %v4195_v29 }
 0x226   :  { %v289_v35 = vadd.f32 1e-05, %v283_v32  ;;  %v4307_v36 = vadd.f32 %v3342_v31, %v306_v33  ;;  %v297_v37 = vmul.f32 %v3991_v34, %v249_v52  ;;  %3580 = vmatpush3.bf16.msra.mxu1 %v3957_v28 }
 0x227   :  { %3581 = vmatprep.subr.bf16.mxu1 %v4195_v29 }
 0x228   :  { %3998 = vrsqrt.f32 %v289_v35  ;;  %v327_v38 = vsel %vm222_vm1, %v4307_v36, 0.0  ;;  %v307_v39 = vmul.f32 %v3341_v27, %v297_v37 }
 0x229   :  { %v3993_v40 = vpop.eup %3992  ;;  %328 = vadd.xlane.f32.xlu0 %v327_v38 }
 0x22a   :  { %v4311_v41 = vadd.f32 %v3342_v31, %v307_v39  ;;  %v298_v42 = vmul.f32 %v3993_v40, %v250_v57  ;;  %3582 = vmatpush3.bf16.msra.mxu1 %v3958_v30 }
 0x22c   :  { %v330_v43 = vsel %vm222_vm1, %v4311_v41, 0.0  ;;  %v308_v44 = vmul.f32 %v3341_v27, %v298_v42 }
 0x22d   :  { %v3995_v45 = vpop.eup %3994  ;;  %331 = vadd.xlane.f32.xlu1 %v330_v43 }
 0x22e   :  { %v4315_v46 = vadd.f32 %v3342_v31, %v308_v44  ;;  %v299_v47 = vmul.f32 %v3995_v45, %v251_v62 }
 0x230   :  { %v333_v48 = vsel %vm222_vm1, %v4315_v46, 0.0  ;;  %v309_v49 = vmul.f32 %v3341_v27, %v299_v47 }
 0x231   :  { %v3997_v50 = vpop.eup %3996  ;;  %334 = vadd.xlane.f32.xlu0 %v333_v48 }
 0x232   :  { %v4319_v51 = vadd.f32 %v3342_v31, %v309_v49  ;;  %v300_v52 = vmul.f32 %v3997_v50, %v252_v3 }
 0x234   :  { %v336_v53 = vsel %vm222_vm1, %v4319_v51, 0.0  ;;  %v310_v54 = vmul.f32 %v3341_v27, %v300_v52 }
 0x235   :  { %v3999_v55 = vpop.eup %3998  ;;  %337 = vadd.xlane.f32.xlu1 %v336_v53  ;;  %v3343_v53 = vld [vmem:[%s5150_s2 + $0x1a] ss:$0 sm:$0xff] }
 0x236   :  { %v4323_v56 = vadd.f32 %v3342_v31, %v310_v54  ;;  %v301_v57 = vmul.f32 %v3999_v55, %v253_v8 }
 0x238   :  { %v339_v58 = vsel %vm222_vm1, %v4323_v56, 0.0  ;;  %v311_v59 = vmul.f32 %v3341_v27, %v301_v57 }
 0x239   :  { %340 = vadd.xlane.f32.xlu0 %v339_v58 }
 0x23a   :  { %v4327_v60 = vadd.f32 %v3342_v31, %v311_v59 }
 0x23c   :  { %v342_v61 = vsel %vm222_vm1, %v4327_v60, 0.0 }
 0x23d   :  { %343 = vadd.xlane.f32.xlu1 %v342_v61  ;;  %v3344_v61 = vld [vmem:[%s5150_s2 + $0x1b] ss:$0 sm:$0xff] }
 0x2b2   :  { %v329_v62 = vpop.xlane.xlu0 %328 }
 0x2b3   :  { %v345_v63 = vmul.f32 0.03125, %v329_v62 }
 0x2b5   :  { %v4332_v0 = vsub.f32 %v4307_v36, %v345_v63 }
 0x2b6   :  { %v332_v1 = vpop.xlane.xlu1 %331 }
 0x2b7   :  { %v346_v2 = vmul.f32 0.03125, %v332_v1  ;;  %v357_v3 = vmul.f32 %v4332_v0, %v4332_v0 }
 0x2b9   :  { %v4337_v4 = vsub.f32 %v4311_v41, %v346_v2  ;;  %v363_v5 = vsel %vm222_vm1, %v357_v3, 0.0 }
 0x2ba   :  { %364 = vadd.xlane.f32.xlu0 %v363_v5  ;;  %v335_v6 = vpop.xlane.xlu0 %334 }
 0x2bb   :  { %v347_v7 = vmul.f32 0.03125, %v335_v6  ;;  %v358_v8 = vmul.f32 %v4337_v4, %v4337_v4 }
 0x2bd   :  { %v4343_v9 = vsub.f32 %v4315_v46, %v347_v7  ;;  %v366_v10 = vsel %vm222_vm1, %v358_v8, 0.0 }
 0x2be   :  { %367 = vadd.xlane.f32.xlu1 %v366_v10  ;;  %v338_v11 = vpop.xlane.xlu1 %337 }
 0x2bf   :  { %v348_v12 = vmul.f32 0.03125, %v338_v11  ;;  %v359_v13 = vmul.f32 %v4343_v9, %v4343_v9 }
 0x2c1   :  { %v4349_v14 = vsub.f32 %v4319_v51, %v348_v12  ;;  %v369_v15 = vsel %vm222_vm1, %v359_v13, 0.0 }
 0x2c2   :  { %370 = vadd.xlane.f32.xlu0 %v369_v15  ;;  %v341_v16 = vpop.xlane.xlu0 %340 }
 0x2c3   :  { %v349_v17 = vmul.f32 0.03125, %v341_v16  ;;  %v360_v18 = vmul.f32 %v4349_v14, %v4349_v14 }
 0x2c5   :  { %v4355_v19 = vsub.f32 %v4323_v56, %v349_v17  ;;  %v372_v20 = vsel %vm222_vm1, %v360_v18, 0.0 }
 0x2c6   :  { %373 = vadd.xlane.f32.xlu1 %v372_v20  ;;  %v344_v21 = vpop.xlane.xlu1 %343 }
 0x2c7   :  { %v350_v22 = vmul.f32 0.03125, %v344_v21  ;;  %v361_v23 = vmul.f32 %v4355_v19, %v4355_v19 }
 0x2c9   :  { %v4361_v24 = vsub.f32 %v4327_v60, %v350_v22  ;;  %v375_v25 = vsel %vm222_vm1, %v361_v23, 0.0 }
 0x2ca   :  { %376 = vadd.xlane.f32.xlu0 %v375_v25 }
 0x2cb   :  { %v362_v26 = vmul.f32 %v4361_v24, %v4361_v24 }
 0x2cd   :  { %v378_v27 = vsel %vm222_vm1, %v362_v26, 0.0 }
 0x2ce   :  { %379 = vadd.xlane.f32.xlu1 %v378_v27 }
 0x343   :  { %v365_v31 = vpop.xlane.xlu0 %364 }
 0x344   :  { %v381_v32 = vmul.f32 0.03125, %v365_v31 }
 0x346   :  { %v387_v33 = vadd.f32 1e-05, %v381_v32 }
 0x347   :  { %v368_v34 = vpop.xlane.xlu1 %367 }
 0x348   :  { %4000 = vrsqrt.f32 %v387_v33  ;;  %v382_v35 = vmul.f32 0.03125, %v368_v34 }
 0x34a   :  { %v388_v37 = vadd.f32 1e-05, %v382_v35 }
 0x34b   :  { %v371_v38 = vpop.xlane.xlu0 %370 }
 0x34c   :  { %4002 = vrsqrt.f32 %v388_v37  ;;  %v383_v39 = vmul.f32 0.03125, %v371_v38 }
 0x34e   :  { %v389_v40 = vadd.f32 1e-05, %v383_v39 }
 0x34f   :  { %v374_v42 = vpop.xlane.xlu1 %373 }
 0x350   :  { %4004 = vrsqrt.f32 %v389_v40  ;;  %v384_v43 = vmul.f32 0.03125, %v374_v42 }
 0x352   :  { %v390_v44 = vadd.f32 1e-05, %v384_v43 }
 0x353   :  { %v377_v45 = vpop.xlane.xlu0 %376 }
 0x354   :  { %4006 = vrsqrt.f32 %v390_v44  ;;  %v385_v47 = vmul.f32 0.03125, %v377_v45 }
 0x355   :  { %v4001_v48 = vpop.eup %4000 }
 0x356   :  { %v391_v49 = vadd.f32 1e-05, %v385_v47  ;;  %v399_v50 = vmul.f32 %v4001_v48, %v4332_v0 }
 0x357   :  { %v380_v52 = vpop.xlane.xlu1 %379 }
 0x358   :  { %4008 = vrsqrt.f32 %v391_v49  ;;  %v386_v54 = vmul.f32 0.03125, %v380_v52  ;;  %v409_v59 = vmul.f32 %v3343_v53, %v399_v50 }
 0x359   :  { %v4003_v55 = vpop.eup %4002 }
 0x35a   :  { %v392_v57 = vadd.f32 1e-05, %v386_v54  ;;  %v400_v58 = vmul.f32 %v4003_v55, %v4337_v4  ;;  %v419_v0 = vadd.f32 %v3344_v61, %v409_v59 }
 0x35c   :  { %4010 = vrsqrt.f32 %v392_v57  ;;  %v410_v62 = vmul.f32 %v3343_v53, %v400_v58  ;;  %v322_v57 = vlaneseq }
 0x35d   :  { %v4005_v63 = vpop.eup %4004 }
 0x35e   :  { %v420_v1 = vadd.f32 %v3344_v61, %v410_v62  ;;  %v401_v2 = vmul.f32 %v4005_v63, %v4343_v9  ;;  %v4432_v59 = vand.u32 127, %v322_v57 }
 0x360   :  { %v429_v3 = vpack.c.bf16 %v420_v1, %v419_v0  ;;  %v411_v7 = vmul.f32 %v3343_v53, %v401_v2  ;;  %vm324_vm4 = vcmp.lt.s32.totalorder %v4432_v59, 17 }
 0x361   :  { %v4007_v5 = vpop.eup %4006 }
 0x362   :  { %3584 = vmatmul.mubr.msk.bf16.vlgmr.msra.gmra.mxu1 %vm222_vm1, %v429_v3  ;;  %v402_v6 = vmul.f32 %v4007_v5, %v4349_v14  ;;  %v421_v10 = vadd.f32 %v3344_v61, %v411_v7 }
 0x363   :  { %3587 = vmatprep.mubr.msk.bf16.mxu1 %vm4196_vm2, %v4195_v29 }
 0x364   :  { %v412_v4 = vmul.f32 %v3343_v53, %v402_v6 }
 0x365   :  { %v4009_v8 = vpop.eup %4008 }
 0x366   :  { %v422_v11 = vadd.f32 %v3344_v61, %v412_v4  ;;  %v403_v12 = vmul.f32 %v4009_v8, %v4355_v19  ;;  %v3345_v19 = vld [vmem:[%s5150_s2 + $0x1c] ss:$0 sm:$0xff] }
 0x368   :  { %v430_v13 = vpack.c.bf16 %v422_v11, %v421_v10  ;;  %v413_v16 = vmul.f32 %v3343_v53, %v403_v12 }
 0x369   :  { %v4011_v15 = vpop.eup %4010 }
 0x36a   :  { %3588 = vmatmul.mubr.msk.bf16.gmra.mxu1 %vm222_vm1, %v430_v13  ;;  %v404_v9 = vmul.f32 %v4011_v15, %v4361_v24  ;;  %v423_v17 = vadd.f32 %v3344_v61, %v413_v16 }
 0x36b   :  { %3591 = vmatprep.mubr.msk.bf16.mxu1 %vm4196_vm2, %v4195_v29 }
 0x36c   :  { %v414_v14 = vmul.f32 %v3343_v53, %v404_v9 }
 0x36e   :  { %v424_v18 = vadd.f32 %v3344_v61, %v414_v14 }
 0x370   :  { %v431_v20 = vpack.c.bf16 %v424_v18, %v423_v17 }
 0x372   :  { %3592 = vmatmul.mubr.msk.bf16.gmra.mxu1 %vm222_vm1, %v431_v20 }
 0x422   :  { %v492_v21 = vpop.f32.mrf.mxu1 }
 0x423   :  { %v493_v25 = vadd.f32 %v3345_v19, %v492_v21 }
 0x424   :  { %v3585_v22 = vpop.f32.mrf.mxu1 }
 0x426   :  { %v495_v23 = vpop.f32.mrf.mxu1 }
 0x427   :  { %v496_v26 = vadd.f32 %v3345_v19, %v495_v23 }
 0x428   :  { %v3586_v24 = vpop.f32.mrf.mxu1 }
 0x429   :  { %v4399_v27 = vpack.c.bf16 %v496_v26, %v493_v25 }
 0x42a   :  { %v500_v28 = vpop.f32.mrf.mxu1 }
 0x42b   :  { %v501_v30 = vadd.f32 %v3345_v19, %v500_v28  ;;  %521 = vrot.lane.b32.xlu1 %v4399_v27, %s4197_s13  ;;  %3599 = vmatprep.mubr.msk.bf16.mxu1 %vm525_vm3, %v4399_v27 }
 0x42c   :  { %v3589_v31 = vpop.f32.mrf.mxu1 }
 0x42d   :  { %v4405_v32 = vpack.c.bf16 %v501_v30, %v501_v30 }
 0x42e   :  { %v503_v33 = vpop.f32.mrf.mxu1 }
 0x42f   :  { %523 = vrot.lane.b32.xlu0 %v4405_v32, %s4197_s13  ;;  %v504_v44 = vadd.f32 %v3345_v19, %v503_v33 }
 0x430   :  { %v3590_v34 = vpop.f32.mrf.mxu1 }
 0x432   :  { %v508_v35 = vpop.f32.mrf.mxu1 }
 0x433   :  { %v509_v42 = vadd.f32 %v3345_v19, %v508_v35 }
 0x434   :  { %v3593_v37 = vpop.f32.mrf.mxu1 }
 0x435   :  { %v4413_v45 = vpack.c.bf16 %v509_v42, %v504_v44 }
 0x436   :  { %v511_v38 = vpop.f32.mrf.mxu1 }
 0x437   :  { %v512_v39 = vadd.f32 %v3345_v19, %v511_v38 }
 0x438   :  { %v3594_v40 = vpop.f32.mrf.mxu1 }
 0x439   :  { %v4409_v43 = vpack.c.bf16 %v512_v39, %v512_v39 }
 0x43b   :  { %590 = vrot.lane.b32.xlu1 %v4409_v43, %s4197_s13 }
 0x43f   :  { %588 = vrot.lane.b32.xlu1 %v4413_v45, %s4197_s13 }
 0x49d   :  { %v522_v49 = vpop.permute.xlu1 %521 }
 0x49e   :  { %v533_v50 = vsel %vm525_vm3, %v522_v49, 0 }
 0x4a1   :  { %v524_v47 = vpop.permute.xlu0 %523 }
 0x4a2   :  { %3873 = vmatprep.subr.msk.bf16.mxu1 %vm525_vm3, %v524_v47  ;;  %v536_v48 = vsel %vm525_vm3, %v524_v47, 0 }
 0x4a3   :  { %3596 = vmatpush3.bf16.xpose.msra.mxu1 %v536_v48 }
 0x4a4   :  { %3874 = vmatprep.subr.msk.bf16.mxu1 %vm525_vm3, %v522_v49 }
 0x4ab   :  { %3598 = vmatpush3.bf16.xpose.msra.mxu1 %v533_v50 }
 0x4ad   :  { %v591_v52 = vpop.permute.xlu1 %590 }
 0x4ae   :  { %3875 = vmatprep.subr.msk.bf16.mxu1 %vm525_vm3, %v591_v52  ;;  %v602_v53 = vsel %vm525_vm3, %v591_v52, 0 }
 0x4b1   :  { %v589_v54 = vpop.permute.xlu1 %588 }
 0x4b2   :  { %3600 = vmatmul.mubr.msk.bf16.vlgmr.msra.gmra.mxu1 %vm525_vm3, %v4405_v32  ;;  %v599_v55 = vsel %vm525_vm3, %v589_v54, 0 }
 0x4b3   :  { %3604 = vmatpush3.bf16.xpose.msra.mxu1 %v602_v53  ;;  %3607 = vmatprep.mubr.msk.bf16.mxu1 %vm525_vm3, %v4413_v45 }
 0x4b4   :  { %3876 = vmatprep.subr.msk.bf16.mxu1 %vm525_vm3, %v589_v54 }
 0x4bb   :  { %3606 = vmatpush3.bf16.xpose.msra.mxu1 %v599_v55 }
 0x4c2   :  { %3608 = vmatmul.mubr.msk.bf16.vlgmr.msra.gmra.mxu1 %vm525_vm3, %v4409_v43 }
 0x572   :  { %v3601_v58 = vpop.f32.mrf.mxu1 }
 0x573   :  { %v654_v62 = vmul.f32 0.25, %v3601_v58 }
 0x574   :  { %v572_v61 = vpop.f32.mrf.mxu1 }
 0x575   :  { %v652_v63 = vmul.f32 0.25, %v572_v61  ;;  %v662_v6 = vsel %vm324_vm4, %v654_v62, -1e+30 }
 0x576   :  { %v3602_v0 = vpop.f32.mrf.mxu1  ;;  %v673_v4 = vsel %vm666_vm5, %v662_v6, -inf }
 0x577   :  { %v660_v1 = vsel %vm324_vm4, %v652_v63, -1e+30 }
 0x578   :  { %v575_v2 = vpop.f32.mrf.mxu1  ;;  %v667_v3 = vsel %vm666_vm5, %v660_v1, -inf }
 0x579   :  { %v653_v5 = vmul.f32 0.25, %v575_v2  ;;  %668 = vmax.xlane.f32.xlu0 %v667_v3 }
 0x57b   :  { %v661_v7 = vsel %vm324_vm4, %v653_v5, -1e+30 }
 0x57c   :  { %v670_v8 = vsel %vm666_vm5, %v661_v7, -inf }
 0x57d   :  { %674 = vmax.xlane.f32.xlu0 %v673_v4  ;;  %671 = vmax.xlane.f32.xlu1 %v670_v8 }
 0x582   :  { %v3609_v10 = vpop.f32.mrf.mxu1 }
 0x583   :  { %v657_v11 = vmul.f32 0.25, %v3609_v10 }
 0x584   :  { %v638_v12 = vpop.f32.mrf.mxu1 }
 0x585   :  { %v655_v13 = vmul.f32 0.25, %v638_v12  ;;  %v665_v15 = vsel %vm324_vm4, %v657_v11, -1e+30 }
 0x586   :  { %v3610_v9 = vpop.f32.mrf.mxu1  ;;  %v682_v16 = vsel %vm666_vm5, %v665_v15, -inf }
 0x587   :  { %683 = vmax.xlane.f32.xlu1 %v682_v16  ;;  %v663_v14 = vsel %vm324_vm4, %v655_v13, -1e+30 }
 0x588   :  { %v641_v17 = vpop.f32.mrf.mxu1  ;;  %v676_v18 = vsel %vm666_vm5, %v663_v14, -inf }
 0x589   :  { %v656_v20 = vmul.f32 0.25, %v641_v17  ;;  %677 = vmax.xlane.f32.xlu0 %v676_v18 }
 0x58b   :  { %v4452_v21 = vsel %vm324_vm4, %v656_v20, -1e+30 }
 0x58c   :  { %v679_v19 = vsel %vm666_vm5, %v4452_v21, -inf }
 0x58d   :  { %680 = vmax.xlane.f32.xlu0 %v679_v19 }
 0x598   :  { %737 = vrot.lane.b32.xlu1 %v4399_v27, %s4198_s14 }
 0x59c   :  { %868 = vrot.lane.b32.xlu1 %v4405_v32, %s4199_s15 }
 0x5a0   :  { %802 = vrot.lane.b32.xlu1 %v4409_v43, %s4198_s14 }
 0x5a3   :  { %739 = vrot.lane.b32.xlu0 %v4405_v32, %s4198_s14 }
 0x5a4   :  { %866 = vrot.lane.b32.xlu1 %v4399_v27, %s4199_s15 }
 0x602   :  { %v669_v22 = vpop.xlane.xlu0 %668 }
 0x603   :  { %v685_v23 = vsub.f32 %v660_v1, %v669_v22 }
 0x605   :  { %v691_v30 = vmul.f32 1.442695, %v685_v23 }
 0x606   :  { %v675_v25 = vpop.xlane.xlu0 %674  ;;  %v672_v26 = vpop.xlane.xlu1 %671 }
 0x607   :  { %v687_v24 = vsub.f32 %v662_v6, %v675_v25  ;;  %v686_v28 = vsub.f32 %v661_v7, %v672_v26 }
 0x609   :  { %v695_v31 = vmul.f32 1.442695, %v687_v24  ;;  %v693_v33 = vmul.f32 1.442695, %v686_v28 }
 0x60b   :  { %4012 = vpow2.f32 %v695_v31 }
 0x60c   :  { %4014 = vpow2.f32 %v693_v33 }
 0x60d   :  { %4016 = vpow2.f32 %v691_v30 }
 0x610   :  { %v684_v34 = vpop.xlane.xlu1 %683 }
 0x611   :  { %v690_v35 = vsub.f32 %v665_v15, %v684_v34 }
 0x612   :  { %v678_v37 = vpop.xlane.xlu0 %677 }
 0x613   :  { %v701_v38 = vmul.f32 1.442695, %v690_v35  ;;  %v688_v39 = vsub.f32 %v663_v14, %v678_v37 }
 0x614   :  { %v738_v40 = vpop.permute.xlu1 %737 }
 0x615   :  { %4018 = vpow2.f32 %v701_v38  ;;  %v697_v42 = vmul.f32 1.442695, %v688_v39 }
 0x616   :  { %v681_v44 = vpop.xlane.xlu0 %680 }
 0x617   :  { %4020 = vpow2.f32 %v697_v42  ;;  %v689_v6 = vsub.f32 %v4452_v21, %v681_v44 }
 0x618   :  { %v4013_v47 = vpop.eup %4012  ;;  %v869_v48 = vpop.permute.xlu1 %868 }
 0x619   :  { %v4015_v49 = vpop.eup %4014  ;;  %3879 = vmatprep.subr.msk.bf16.mxu0 %vm525_vm3, %v869_v48  ;;  %v709_v50 = vsel %vm666_vm5, %v4013_v47, 0.0  ;;  %v880_v52 = vsel %vm525_vm3, %v869_v48, 0  ;;  %v699_v7 = vmul.f32 1.442695, %v689_v6 }
 0x61a   :  { %v4017_v53 = vpop.eup %4016  ;;  %710 = vadd.xlane.f32.xlu0 %v709_v50  ;;  %v740_v54 = vpop.permute.xlu0 %739  ;;  %v706_v55 = vsel %vm666_vm5, %v4015_v49, 0.0  ;;  %3628 = vmatpush3.bf16.xpose.msra.mxu0 %v880_v52 }
 0x61b   :  { %707 = vadd.xlane.f32.xlu1 %v706_v55  ;;  %3877 = vmatprep.subr.msk.bf16.mxu1 %vm748_vm6, %v740_v54  ;;  %v750_v58 = vsel %vm748_vm6, %v740_v54, 0  ;;  %v703_v62 = vsel %vm666_vm5, %v4017_v53, 0.0  ;;  %4022 = vpow2.f32 %v699_v7 }
 0x61c   :  { %3612 = vmatpush3.bf16.msra.mxu1 %v750_v58  ;;  %v803_v61 = vpop.permute.xlu1 %802 }
 0x61d   :  { %3613 = vmatprep.subr.bf16.mxu1 %v738_v40  ;;  %v812_v23 = vsel %vm748_vm6, %v803_v61, 0 }
 0x61e   :  { %704 = vadd.xlane.f32.xlu0 %v703_v62 }
 0x620   :  { %3614 = vmatpush3.bf16.msra.mxu1 %v738_v40  ;;  %v867_v63 = vpop.permute.xlu1 %866 }
 0x621   :  { %3878 = vmatprep.subr.msk.bf16.mxu1 %vm748_vm6, %v803_v61  ;;  %3880 = vmatprep.subr.msk.bf16.mxu0 %vm525_vm3, %v867_v63  ;;  %v877_v0 = vsel %vm525_vm3, %v867_v63, 0 }
 0x622   :  { %v4019_v1 = vpop.eup %4018  ;;  %3630 = vmatpush3.bf16.xpose.msra.mxu0 %v877_v0 }
 0x623   :  { %v718_v2 = vsel %vm666_vm5, %v4019_v1, 0.0 }
 0x624   :  { %v4021_v3 = vpop.eup %4020  ;;  %719 = vadd.xlane.f32.xlu1 %v718_v2 }
 0x625   :  { %v712_v5 = vsel %vm666_vm5, %v4021_v3, 0.0 }
 0x628   :  { %713 = vadd.xlane.f32.xlu1 %v712_v5  ;;  %v4023_v4 = vpop.eup %4022 }
 0x629   :  { %v715_v8 = vsel %vm666_vm5, %v4023_v4, 0.0 }
 0x634   :  { %800 = vrot.lane.b32.xlu0 %v4413_v45, %s4198_s14 }
 0x639   :  { %862 = vrot.lane.b32.xlu1 %v4399_v27, %s4200_s16 }
 0x63d   :  { %934 = vrot.lane.b32.xlu1 %v4413_v45, %s4199_s15 }
 0x641   :  { %932 = vrot.lane.b32.xlu1 %v4409_v43, %s4200_s16 }
 0x653   :  { %716 = vadd.xlane.f32.xlu0 %v715_v8 }
 0x669   :  { %936 = vrot.lane.b32.xlu0 %v4409_v43, %s4199_s15 }
 0x66d   :  { %864 = vrot.lane.b32.xlu0 %v4405_v32, %s4200_s16 }
 0x671   :  { %930 = vrot.lane.b32.xlu0 %v4413_v45, %s4200_s16 }
 0x6a3   :  { %v711_v10 = vpop.xlane.xlu0 %710 }
 0x6a4   :  { %v708_v11 = vpop.xlane.xlu1 %707  ;;  %4024 = vrcp.f32 %v711_v10 }
 0x6a5   :  { %4026 = vrcp.f32 %v708_v11 }
 0x6a7   :  { %v705_v12 = vpop.xlane.xlu0 %704 }
 0x6a8   :  { %4028 = vrcp.f32 %v705_v12 }
 0x6ab   :  { %v801_v25 = vpop.permute.xlu0 %800 }
 0x6ad   :  { %v720_v13 = vpop.xlane.xlu1 %719 }
 0x6ae   :  { %4030 = vrcp.f32 %v720_v13 }
 0x6b1   :  { %v714_v15 = vpop.xlane.xlu1 %713  ;;  %v4025_v9 = vpop.eup %4024 }
 0x6b2   :  { %v4027_v16 = vpop.eup %4026  ;;  %v729_v18 = vmul.f32 %v4025_v9, %v4013_v47  ;;  %4032 = vrcp.f32 %v714_v15 }
 0x6b3   :  { %v728_v21 = vmul.f32 %v4027_v16, %v4015_v49 }
 0x6b4   :  { %v734_v22 = vpack.c.bf16 %v729_v18, %v729_v18 }
 0x6b5   :  { %v4029_v14 = vpop.eup %4028  ;;  %v863_v17 = vpop.permute.xlu1 %862 }
 0x6b6   :  { %3631 = vmatprep.mubr.msk.bf16.mxu0 %vm525_vm3, %v863_v17  ;;  %v727_v20 = vmul.f32 %v4029_v14, %v4017_v53 }
 0x6b8   :  { %v733_v19 = vpack.c.bf16 %v728_v21, %v727_v20 }
 0x6b9   :  { %v935_v44 = vpop.permute.xlu1 %934 }
 0x6ba   :  { %3615 = vmatprep.mubr.msk.bf16.mxu1 %vm666_vm5, %v733_v19  ;;  %v945_v47 = vsel %vm525_vm3, %v935_v44, 0 }
 0x6bb   :  { %3616 = vmatmul.mubr.msk.bf16.vlgmr.msra.gmra.mxu1 %vm666_vm5, %v734_v22  ;;  %v4031_v30 = vpop.eup %4030 }
 0x6bc   :  { %3620 = vmatpush3.bf16.msra.mxu1 %v812_v23  ;;  %v732_v34 = vmul.f32 %v4031_v30, %v4019_v1 }
 0x6bd   :  { %3621 = vmatprep.subr.bf16.mxu1 %v801_v25  ;;  %v933_v48 = vpop.permute.xlu1 %932 }
 0x6be   :  { %v736_v39 = vpack.c.bf16 %v732_v34, %v732_v34 }
 0x6bf   :  { %v4033_v31 = vpop.eup %4032 }
 0x6c0   :  { %3622 = vmatpush3.bf16.msra.mxu1 %v801_v25  ;;  %v730_v35 = vmul.f32 %v4033_v31, %v4021_v3 }
 0x6dc   :  { %v717_v26 = vpop.xlane.xlu0 %716 }
 0x6dd   :  { %4034 = vrcp.f32 %v717_v26 }
 0x6e0   :  { %v937_v24 = vpop.permute.xlu0 %936 }
 0x6e1   :  { %3881 = vmatprep.subr.msk.bf16.mxu1 %vm525_vm3, %v937_v24  ;;  %v948_v42 = vsel %vm525_vm3, %v937_v24, 0 }
 0x6e4   :  { %v865_v28 = vpop.permute.xlu0 %864 }
 0x6e5   :  { %3632 = vmatmul.mubr.msk.bf16.vlgmr.msra.gmra.mxu0 %vm525_vm3, %v865_v28 }
 0x6e8   :  { %v931_v40 = vpop.permute.xlu0 %930 }
 0x6ea   :  { %v4035_v33 = vpop.eup %4034 }
 0x6eb   :  { %v731_v37 = vmul.f32 %v4035_v33, %v4023_v4 }
 0x6ed   :  { %v735_v38 = vpack.c.bf16 %v731_v37, %v730_v35 }
 0x6ef   :  { %3623 = vmatprep.mubr.msk.bf16.mxu1 %vm666_vm5, %v735_v38 }
 0x6f0   :  { %3624 = vmatmul.mubr.msk.bf16.vlgmr.msra.gmra.mxu1 %vm666_vm5, %v736_v39 }
 0x6f1   :  { %3636 = vmatpush3.bf16.xpose.msra.mxu1 %v948_v42  ;;  %3639 = vmatprep.mubr.msk.bf16.mxu1 %vm525_vm3, %v931_v40 }
 0x6f2   :  { %3882 = vmatprep.subr.msk.bf16.mxu1 %vm525_vm3, %v935_v44 }
 0x6f9   :  { %3638 = vmatpush3.bf16.xpose.msra.mxu1 %v945_v47 }
 0x700   :  { %3640 = vmatmul.mubr.msk.bf16.vlgmr.msra.gmra.mxu1 %vm525_vm3, %v933_v48 }
 0x77b   :  { %v4507_v49 = vpop.f32.mrf.mxu1 }
 0x77d   :  { %v4509_v50 = vpop.f32.mrf.mxu1 }
 0x77f   :  { %v3618_v52 = vpop.f32.mrf.mxu1 }
 0x781   :  { %v4516_v3 = vpop.f32.mrf.mxu1 }
 0x7a5   :  { %v3633_v53 = vpop.f32.mrf.mxu0 }
 0x7a6   :  { %v1000_v55 = vmul.f32 0.25, %v3633_v53 }
 0x7a7   :  { %v916_v54 = vpop.f32.mrf.mxu0 }
 0x7a8   :  { %v998_v58 = vmul.f32 0.25, %v916_v54  ;;  %v1006_v2 = vsel %vm324_vm4, %v1000_v55, -1e+30 }
 0x7a9   :  { %v3634_v61 = vpop.f32.mrf.mxu0  ;;  %v1016_v6 = vsel %vm666_vm5, %v1006_v2, -inf }
 0x7aa   :  { %v1004_v62 = vsel %vm324_vm4, %v998_v58, -1e+30 }
 0x7ab   :  { %v919_v63 = vpop.f32.mrf.mxu0  ;;  %v1010_v0 = vsel %vm666_vm5, %v1004_v62, -inf }
 0x7ac   :  { %v999_v1 = vmul.f32 0.25, %v919_v63  ;;  %1011 = vmax.xlane.f32.xlu0 %v1010_v0 }
 0x7ae   :  { %v1005_v5 = vsel %vm324_vm4, %v999_v1, -1e+30 }
 0x7af   :  { %v1013_v7 = vsel %vm666_vm5, %v1005_v5, -inf }
 0x7b0   :  { %v4522_v4 = vpop.f32.mrf.mxu1  ;;  %1017 = vmax.xlane.f32.xlu0 %v1016_v6  ;;  %1014 = vmax.xlane.f32.xlu1 %v1013_v7 }
 0x7b2   :  { %v4524_v8 = vpop.f32.mrf.mxu1 }
 0x7b4   :  { %v3626_v10 = vpop.f32.mrf.mxu1 }
 0x7b6   :  { %v4526_v11 = vpop.f32.mrf.mxu1 }
 0x7c0   :  { %v3641_v12 = vpop.f32.mrf.mxu1 }
 0x7c1   :  { %v1003_v13 = vmul.f32 0.25, %v3641_v12 }
 0x7c2   :  { %v984_v15 = vpop.f32.mrf.mxu1 }
 0x7c3   :  { %v1001_v9 = vmul.f32 0.25, %v984_v15  ;;  %v1009_v16 = vsel %vm324_vm4, %v1003_v13, -1e+30 }
 0x7c4   :  { %v3642_v14 = vpop.f32.mrf.mxu1  ;;  %v1025_v17 = vsel %vm666_vm5, %v1009_v16, -inf }
 0x7c5   :  { %1026 = vmax.xlane.f32.xlu1 %v1025_v17  ;;  %v1007_v18 = vsel %vm324_vm4, %v1001_v9, -1e+30 }
 0x7c6   :  { %v987_v20 = vpop.f32.mrf.mxu1  ;;  %v1019_v21 = vsel %vm666_vm5, %v1007_v18, -inf }
 0x7c7   :  { %v1002_v19 = vmul.f32 0.25, %v987_v20  ;;  %1020 = vmax.xlane.f32.xlu0 %v1019_v21 }
 0x7c9   :  { %v1008_v22 = vsel %vm324_vm4, %v1002_v19, -1e+30 }
 0x7ca   :  { %v1022_v23 = vsel %vm666_vm5, %v1008_v22, -inf }
 0x7cb   :  { %1023 = vmax.xlane.f32.xlu0 %v1022_v23 }
 0x835   :  { %v1012_v25 = vpop.xlane.xlu0 %1011 }
 0x836   :  { %v1028_v26 = vsub.f32 %v1004_v62, %v1012_v25 }
 0x838   :  { %v1034_v24 = vmul.f32 1.442695, %v1028_v26 }
 0x839   :  { %v1018_v28 = vpop.xlane.xlu0 %1017  ;;  %v1015_v30 = vpop.xlane.xlu1 %1014 }
 0x83a   :  { %4036 = vpow2.f32 %v1034_v24  ;;  %v1030_v31 = vsub.f32 %v1006_v2, %v1018_v28  ;;  %v1029_v33 = vsub.f32 %v1005_v5, %v1015_v30 }
 0x83c   :  { %v1038_v34 = vmul.f32 1.442695, %v1030_v31  ;;  %v1036_v35 = vmul.f32 1.442695, %v1029_v33 }
 0x83e   :  { %4038 = vpow2.f32 %v1038_v34 }
 0x83f   :  { %4040 = vpow2.f32 %v1036_v35 }
 0x847   :  { %v4037_v37 = vpop.eup %4036 }
 0x848   :  { %v1046_v38 = vsel %vm666_vm5, %v4037_v37, 0.0 }
 0x849   :  { %1047 = vadd.xlane.f32.xlu0 %v1046_v38  ;;  %v3960_v38 = vld [vmem:[%s5148_s1 + $0x70] sm:$0xff]  }
 0x84b   :  { %v4039_v39 = vpop.eup %4038 }
 0x84c   :  { %v4041_v40 = vpop.eup %4040  ;;  %v1052_v42 = vsel %vm666_vm5, %v4039_v39, 0.0 }
 0x84d   :  { %1053 = vadd.xlane.f32.xlu0 %v1052_v42  ;;  %v1049_v44 = vsel %vm666_vm5, %v4041_v40, 0.0 }
 0x84e   :  { %1050 = vadd.xlane.f32.xlu1 %v1049_v44  ;;  %v1027_v47 = vpop.xlane.xlu1 %1026 }
 0x84f   :  { %v1033_v48 = vsub.f32 %v1009_v16, %v1027_v47 }
 0x850   :  { %v1021_v52 = vpop.xlane.xlu0 %1020 }
 0x851   :  { %v1044_v53 = vmul.f32 1.442695, %v1033_v48  ;;  %v1031_v54 = vsub.f32 %v1007_v18, %v1021_v52 }
 0x853   :  { %4042 = vpow2.f32 %v1044_v53  ;;  %v1040_v55 = vmul.f32 1.442695, %v1031_v54 }
 0x854   :  { %v1024_v58 = vpop.xlane.xlu0 %1023 }
 0x855   :  { %4044 = vpow2.f32 %v1040_v55  ;;  %v1032_v61 = vsub.f32 %v1008_v22, %v1024_v58 }
 0x857   :  { %v1042_v62 = vmul.f32 1.442695, %v1032_v61 }
 0x859   :  { %4046 = vpow2.f32 %v1042_v62 }
 0x860   :  { %v4043_v63 = vpop.eup %4042 }
 0x861   :  { %v1061_v0 = vsel %vm666_vm5, %v4043_v63, 0.0 }
 0x862   :  { %v4045_v1 = vpop.eup %4044  ;;  %1062 = vadd.xlane.f32.xlu1 %v1061_v0 }
 0x863   :  { %v1055_v2 = vsel %vm666_vm5, %v4045_v1, 0.0 }
 0x866   :  { %v4047_v5 = vpop.eup %4046  ;;  %1056 = vadd.xlane.f32.xlu1 %v1055_v2 }
 0x867   :  { %v1058_v6 = vsel %vm666_vm5, %v4047_v5, 0.0 }
 0x868   :  { %1059 = vadd.xlane.f32.xlu0 %v1058_v6 }
 0x877   :  { %1080 = vrot.lane.b32.xlu1 %v4399_v27, %s4201_s17 }
 0x87b   :  { %1144 = vrot.lane.b32.xlu1 %v4409_v43, %s4201_s17 }
 0x87e   :  { %1082 = vrot.lane.b32.xlu0 %v4405_v32, %s4201_s17 }
 0x87f   :  { %1142 = vrot.lane.b32.xlu1 %v4413_v45, %s4201_s17 }
 0x8d2   :  { %v1048_v7 = vpop.xlane.xlu0 %1047 }
 0x8d3   :  { %4048 = vrcp.f32 %v1048_v7 }
 0x8d6   :  { %v1054_v15 = vpop.xlane.xlu0 %1053 }
 0x8d7   :  { %v1051_v10 = vpop.xlane.xlu1 %1050 }
 0x8d8   :  { %4050 = vrcp.f32 %v1051_v10 }
 0x8d9   :  { %4052 = vrcp.f32 %v1054_v15 }
 0x8e0   :  { %v4049_v12 = vpop.eup %4048 }
 0x8e1   :  { %v1070_v9 = vmul.f32 %v4049_v12, %v4037_v37  ;;  %v3959_v37 = vld [vmem:[%s5148_s1 + $0x78] sm:$0xff]  }
 0x8e5   :  { %v4051_v13 = vpop.eup %4050 }
 0x8e6   :  { %v1071_v16 = vmul.f32 %v4051_v13, %v4041_v40  ;;  %v4053_v17 = vpop.eup %4052 }
 0x8e7   :  { %v1072_v22 = vmul.f32 %v4053_v17, %v4039_v39 }
 0x8e8   :  { %v1076_v27 = vpack.c.bf16 %v1071_v16, %v1070_v9 }
 0x8e9   :  { %v1077_v26 = vpack.c.bf16 %v1072_v22, %v1072_v22 }
 0x8ea   :  { %3647 = vmatprep.mubr.msk.bf16.mxu1 %vm666_vm5, %v1076_v27 }
 0x8eb   :  { %v1063_v43 = vpop.xlane.xlu1 %1062 }
 0x8ec   :  { %4054 = vrcp.f32 %v1063_v43 }
 0x8ef   :  { %v1057_v14 = vpop.xlane.xlu1 %1056 }
 0x8f0   :  { %4056 = vrcp.f32 %v1057_v14 }
 0x8f1   :  { %v1060_v32 = vpop.xlane.xlu0 %1059 }
 0x8f2   :  { %4058 = vrcp.f32 %v1060_v32 }
 0x8f3   :  { %v1081_v45 = vpop.permute.xlu1 %1080 }
 0x8f5   :  { %v1083_v18 = vpop.permute.xlu0 %1082 }
 0x8f6   :  { %v1092_v20 = vsel %vm748_vm6, %v1083_v18, 0  ;;  %3883 = vmatprep.subr.msk.bf16.mxu1 %vm748_vm6, %v1083_v18 }
 0x8f7   :  { %3644 = vmatpush3.bf16.msra.mxu1 %v1092_v20  ;;  %v1145_v21 = vpop.permute.xlu1 %1144 }
 0x8f8   :  { %v1154_v19 = vsel %vm748_vm6, %v1145_v21, 0  ;;  %3645 = vmatprep.subr.bf16.mxu1 %v1081_v45  ;;  %3884 = vmatprep.subr.msk.bf16.mxu0 %vm748_vm6, %v1145_v21 }
 0x8f9   :  { %3652 = vmatpush3.bf16.msra.mxu0 %v1154_v19  ;;  %v4055_v25 = vpop.eup %4054 }
 0x8fa   :  { %v1075_v30 = vmul.f32 %v4055_v25, %v4043_v63 }
 0x8fb   :  { %3646 = vmatpush3.bf16.msra.mxu1 %v1081_v45  ;;  %v1143_v23 = vpop.permute.xlu1 %1142 }
 0x8fc   :  { %3653 = vmatprep.subr.bf16.mxu0 %v1143_v23  ;;  %3659 = vmatprep.subr.bf16.mxu1 %v4195_v29  ;;  %v1079_v35 = vpack.c.bf16 %v1075_v30, %v1075_v30 }
 0x8fd   :  { %v4057_v24 = vpop.eup %4056  ;;  %3654 = vmatpush3.bf16.msra.mxu0 %v1143_v23 }
 0x8fe   :  { %3648 = vmatmul.mubr.msk.bf16.vlgmr.msra.gmra.mxu1 %vm666_vm5, %v1077_v26  ;;  %3675 = vmatprep.subr.bf16.mxu0 %v4195_v29  ;;  %v1073_v31 = vmul.f32 %v4057_v24, %v4045_v1 }
 0x8ff   :  { %v4059_v28 = vpop.eup %4058  ;;  %3663 = vmatprep.mubr.msk.bf16.mxu1 %vm4196_vm2, %v4195_v29  ;;  %3660 = vmatpush3.bf16.msra.mxu1 %v3959_v37 }
 0x900   :  { %v1074_v33 = vmul.f32 %v4059_v28, %v4047_v5  ;;  %3661 = vmatprep.subr.bf16.mxu1 %v4195_v29 }
 0x902   :  { %v1078_v34 = vpack.c.bf16 %v1074_v33, %v1073_v31 }
 0x903   :  { %3662 = vmatpush3.bf16.msra.mxu1 %v3960_v38 }
 0x904   :  { %3655 = vmatprep.mubr.msk.bf16.mxu0 %vm666_vm5, %v1078_v34  ;;  %3691 = vmatprep.subr.bf16.mxu1 %v4195_v29 }
 0x905   :  { %3656 = vmatmul.mubr.msk.bf16.vlgmr.msra.gmra.mxu0 %vm666_vm5, %v1079_v35 }
 0x906   :  { %3679 = vmatprep.mubr.msk.bf16.mxu0 %vm4196_vm2, %v4195_v29 }
 0x9be   :  { %v3649_v39 = vpop.f32.mrf.mxu1 }
 0x9c0   :  { %v1128_v40 = vpop.f32.mrf.mxu1 }
 0x9c2   :  { %v3650_v42 = vpop.f32.mrf.mxu1 }
 0x9c4   :  { %v1131_v44 = vpop.f32.mrf.mxu1 }
 0x9c5   :  { %v3906_v47 = vpack.i.bf16 %v1131_v44, %v1128_v40  ;;  %v3657_v48 = vpop.f32.mrf.mxu0 }
 0x9c7   :  { %3907 = vrot.lane.b32.xlu0 %v3906_v47, %s4202_s22  ;;  %v1190_v52 = vpop.f32.mrf.mxu0 }
 0x9c8   :  { %v3911_v53 = vpack.i.bf16 %v1190_v52, %v3649_v39 }
 0x9c9   :  { %v3658_v54 = vpop.f32.mrf.mxu0 }
 0x9ca   :  { %3912 = vrot.lane.b32.xlu1 %v3911_v53, %s4202_s22 }
 0x9cb   :  { %v1193_v55 = vpop.f32.mrf.mxu0 }
 0x9cc   :  { %v3916_v58 = vpack.i.bf16 %v3657_v48, %v1193_v55 }
 0x9ce   :  { %3917 = vrot.lane.b32.xlu0 %v3916_v58, %s4202_s22 }
 0xa39   :  { %v3908_v61 = vpop.permute.xlu0 %3907 }
 0xa3a   :  { %v3910_v62 = vunpack.i.h.bf16 %v3908_v61  ;;  %v3909_v63 = vunpack.i.l.bf16 %v3908_v61 }
 0xa3c   :  { %v1229_v0 = vsel %vm525_vm3, %v4516_v3, %v3910_v62  ;;  %v1228_v1 = vsel %vm525_vm3, %v4509_v50, %v3909_v63  ;;  %v3913_v2 = vpop.permute.xlu1 %3912 }
 0xa3d   :  { %v1238_v5 = vpack.c.bf16 %v1229_v0, %v1228_v1  ;;  %v3915_v6 = vunpack.i.h.bf16 %v3913_v2  ;;  %v3914_v7 = vunpack.i.l.bf16 %v3913_v2 }
 0xa3f   :  { %3664 = vmatmul.mubr.msk.bf16.vlgmr.msra.gmra.mxu1 %vm222_vm1, %v1238_v5  ;;  %v1231_v10 = vsel %vm525_vm3, %v4524_v8, %v3915_v6  ;;  %v1230_v12 = vsel %vm525_vm3, %v4507_v49, %v3914_v7  ;;  %v3372_v8 = vld [vmem:[%s5150_s2 + $0x1d] ss:$0 sm:$0xff] }
 0xa40   :  { %3667 = vmatprep.mubr.msk.bf16.mxu1 %vm4196_vm2, %v4195_v29  ;;  %v3918_v13 = vpop.permute.xlu0 %3917  ;;  %v1239_v3 = vpack.c.bf16 %v1231_v10, %v1230_v12 }
 0xa41   :  { %v3920_v15 = vunpack.i.h.bf16 %v3918_v13  ;;  %v3919_v9 = vunpack.i.l.bf16 %v3918_v13 }
 0xa43   :  { %v1233_v50 = vsel %vm525_vm3, %v4522_v4, %v3920_v15  ;;  %v1232_v16 = vsel %vm525_vm3, %v4526_v11, %v3919_v9 }
 0xa44   :  { %v1240_v27 = vpack.c.bf16 %v1233_v50, %v1232_v16 }
 0xa47   :  { %3668 = vmatmul.mubr.msk.bf16.gmra.mxu1 %vm222_vm1, %v1239_v3 }
 0xa48   :  { %3671 = vmatprep.mubr.msk.bf16.mxu1 %vm4196_vm2, %v4195_v29 }
 0xa4f   :  { %3672 = vmatmul.mubr.msk.bf16.gmra.mxu1 %vm222_vm1, %v1240_v27 }
 0xa50   :  { %3707 = vmatprep.mubr.msk.bf16.mxu1 %vm4196_vm2, %v4195_v29 }
 0xaff   :  { %v1296_v49 = vpop.f32.mrf.mxu1 }
 0xb00   :  { %v1319_v43 = vadd.f32 %v1296_v49, %v4307_v36  ;;  %v3961_v49 = vld [vmem:[%s5148_s1 + $0x88] sm:$0xff]  }
 0xb01   :  { %v3665_v14 = vpop.f32.mrf.mxu1  ;;  %3676 = vmatpush3.bf16.msra.mxu0 %v3961_v49  ;;  %v3969_v49 = vld [vmem:[%s5148_s1 + $0x98] sm:$0xff]  }
 0xb02   :  { %v4601_v32 = vadd.f32 %v3372_v8, %v1319_v43  ;;  %3677 = vmatprep.subr.bf16.mxu0 %v4195_v29 }
 0xb03   :  { %v1299_v4 = vpop.f32.mrf.mxu1 }
 0xb04   :  { %v1320_v45 = vadd.f32 %v1299_v4, %v4311_v41  ;;  %v1338_v11 = vsel %vm222_vm1, %v4601_v32, 0.0 }
 0xb05   :  { %v3666_v17 = vpop.f32.mrf.mxu1  ;;  %1339 = vadd.xlane.f32.xlu1 %v1338_v11 }
 0xb06   :  { %v4606_v18 = vadd.f32 %v3372_v8, %v1320_v45 }
 0xb07   :  { %v1304_v20 = vpop.f32.mrf.mxu1 }
 0xb08   :  { %v1321_v21 = vadd.f32 %v1304_v20, %v4315_v46  ;;  %v1341_v19 = vsel %vm222_vm1, %v4606_v18, 0.0 }
 0xb09   :  { %v3669_v36 = vpop.f32.mrf.mxu1  ;;  %1342 = vadd.xlane.f32.xlu0 %v1341_v19 }
 0xb0a   :  { %v4611_v22 = vadd.f32 %v3372_v8, %v1321_v21 }
 0xb0b   :  { %v1307_v23 = vpop.f32.mrf.mxu1 }
 0xb0c   :  { %v1322_v41 = vadd.f32 %v1307_v23, %v4319_v51  ;;  %v1344_v25 = vsel %vm222_vm1, %v4611_v22, 0.0 }
 0xb0d   :  { %v3670_v26 = vpop.f32.mrf.mxu1  ;;  %1345 = vadd.xlane.f32.xlu0 %v1344_v25 }
 0xb0e   :  { %v4616_v24 = vadd.f32 %v3372_v8, %v1322_v41 }
 0xb0f   :  { %v1312_v28 = vpop.f32.mrf.mxu1 }
 0xb10   :  { %v1323_v46 = vadd.f32 %v1312_v28, %v4323_v56  ;;  %v1347_v30 = vsel %vm222_vm1, %v4616_v24, 0.0 }
 0xb11   :  { %1348 = vadd.xlane.f32.xlu0 %v1347_v30  ;;  %v3673_v31 = vpop.f32.mrf.mxu1 }
 0xb12   :  { %v4621_v33 = vadd.f32 %v3372_v8, %v1323_v46 }
 0xb13   :  { %v1315_v34 = vpop.f32.mrf.mxu1 }
 0xb14   :  { %v1324_v51 = vadd.f32 %v1315_v34, %v4327_v60  ;;  %v1350_v35 = vsel %vm222_vm1, %v4621_v33, 0.0  ;;  %v3373_v34 = vld [vmem:[%s5150_s2 + $0x1e] ss:$0 sm:$0xff] }
 0xb15   :  { %1351 = vadd.xlane.f32.xlu1 %v1350_v35  ;;  %v3674_v37 = vpop.f32.mrf.mxu1 }
 0xb16   :  { %v4626_v38 = vadd.f32 %v3372_v8, %v1324_v51  ;;  %v3962_v8 = vld [vmem:[%s5148_s1 + $0x80] sm:$0xff]  }
 0xb17   :  { %3678 = vmatpush3.bf16.msra.mxu0 %v3962_v8  ;;  %v3970_v8 = vld [vmem:[%s5148_s1 + $0x90] sm:$0xff]  }
 0xb18   :  { %v1353_v56 = vsel %vm222_vm1, %v4626_v38, 0.0  ;;  %3719 = vmatprep.subr.bf16.mxu0 %v4195_v29 }
 0xb19   :  { %1354 = vadd.xlane.f32.xlu0 %v1353_v56 }
 0xb8e   :  { %v1340_v39 = vpop.xlane.xlu1 %1339 }
 0xb8f   :  { %v1356_v40 = vmul.f32 0.03125, %v1340_v39 }
 0xb91   :  { %v1362_v42 = vsub.f32 %v4601_v32, %v1356_v40  ;;  %v3374_v40 = vld [vmem:[%s5150_s2 + $0x1f] ss:$0 sm:$0xff] }
 0xb92   :  { %v1343_v44 = vpop.xlane.xlu0 %1342 }
 0xb93   :  { %v1357_v47 = vmul.f32 0.03125, %v1343_v44  ;;  %v1368_v48 = vmul.f32 %v1362_v42, %v1362_v42 }
 0xb95   :  { %v1363_v60 = vsub.f32 %v4606_v18, %v1357_v47  ;;  %v1374_v52 = vsel %vm222_vm1, %v1368_v48, 0.0 }
 0xb96   :  { %v1346_v53 = vpop.xlane.xlu0 %1345  ;;  %1375 = vadd.xlane.f32.xlu1 %v1374_v52 }
 0xb97   :  { %v1358_v54 = vmul.f32 0.03125, %v1346_v53  ;;  %v1369_v55 = vmul.f32 %v1363_v60, %v1363_v60 }
 0xb99   :  { %v4634_v58 = vsub.f32 %v4611_v22, %v1358_v54  ;;  %v1377_v61 = vsel %vm222_vm1, %v1369_v55, 0.0 }
 0xb9a   :  { %v1349_v62 = vpop.xlane.xlu0 %1348  ;;  %1378 = vadd.xlane.f32.xlu0 %v1377_v61 }
 0xb9b   :  { %v1359_v63 = vmul.f32 0.03125, %v1349_v62  ;;  %v1370_v0 = vmul.f32 %v4634_v58, %v4634_v58 }
 0xb9d   :  { %v4640_v1 = vsub.f32 %v4616_v24, %v1359_v63  ;;  %v1380_v2 = vsel %vm222_vm1, %v1370_v0, 0.0 }
 0xb9e   :  { %1381 = vadd.xlane.f32.xlu1 %v1380_v2  ;;  %v1352_v5 = vpop.xlane.xlu1 %1351 }
 0xb9f   :  { %v1360_v6 = vmul.f32 0.03125, %v1352_v5  ;;  %v1371_v7 = vmul.f32 %v4640_v1, %v4640_v1 }
 0xba1   :  { %v4646_v10 = vsub.f32 %v4621_v33, %v1360_v6  ;;  %v1383_v12 = vsel %vm222_vm1, %v1371_v7, 0.0 }
 0xba2   :  { %1384 = vadd.xlane.f32.xlu0 %v1383_v12  ;;  %v1355_v13 = vpop.xlane.xlu0 %1354 }
 0xba3   :  { %v1361_v3 = vmul.f32 0.03125, %v1355_v13  ;;  %v1372_v15 = vmul.f32 %v4646_v10, %v4646_v10 }
 0xba5   :  { %v1367_v9 = vsub.f32 %v4626_v38, %v1361_v3  ;;  %v1386_v50 = vsel %vm222_vm1, %v1372_v15, 0.0  ;;  %v3964_v15 = vld [vmem:[%s5148_s1 + $0xc0] sm:$0xff]  }
 0xba6   :  { %1387 = vadd.xlane.f32.xlu1 %v1386_v50  ;;  %v3966_v50 = vld [vmem:[%s5148_s1 + $0xb0] sm:$0xff]  }
 0xba7   :  { %v1373_v16 = vmul.f32 %v1367_v9, %v1367_v9 }
 0xba9   :  { %v1389_v27 = vsel %vm222_vm1, %v1373_v16, 0.0  ;;  %v3967_v16 = vld [vmem:[%s5148_s1 + $0xa8] sm:$0xff]  }
 0xbaa   :  { %1390 = vadd.xlane.f32.xlu0 %v1389_v27  ;;  %v3968_v27 = vld [vmem:[%s5148_s1 + $0xa0] sm:$0xff]  }
 0xc1f   :  { %v1376_v43 = vpop.xlane.xlu1 %1375 }
 0xc20   :  { %v1392_v14 = vmul.f32 0.03125, %v1376_v43  ;;  %v3375_v43 = vld [vmem:[%s5150_s2 + $0x20] ss:$0 sm:$0xff] }
 0xc22   :  { %v1398_v4 = vadd.f32 1e-05, %v1392_v14 }
 0xc23   :  { %v1379_v45 = vpop.xlane.xlu0 %1378 }
 0xc24   :  { %4060 = vrsqrt.f32 %v1398_v4  ;;  %v1393_v11 = vmul.f32 0.03125, %v1379_v45 }
 0xc26   :  { %v1399_v17 = vadd.f32 1e-05, %v1393_v11 }
 0xc27   :  { %v1382_v20 = vpop.xlane.xlu1 %1381 }
 0xc28   :  { %4062 = vrsqrt.f32 %v1399_v17  ;;  %v1394_v21 = vmul.f32 0.03125, %v1382_v20 }
 0xc2a   :  { %v1400_v19 = vadd.f32 1e-05, %v1394_v21 }
 0xc2b   :  { %v1385_v36 = vpop.xlane.xlu0 %1384 }
 0xc2c   :  { %4064 = vrsqrt.f32 %v1400_v19  ;;  %v1395_v23 = vmul.f32 0.03125, %v1385_v36 }
 0xc2e   :  { %v1401_v41 = vadd.f32 1e-05, %v1395_v23 }
 0xc2f   :  { %v1388_v25 = vpop.xlane.xlu1 %1387 }
 0xc30   :  { %4066 = vrsqrt.f32 %v1401_v41  ;;  %v1396_v26 = vmul.f32 0.03125, %v1388_v25 }
 0xc31   :  { %v4061_v28 = vpop.eup %4060 }
 0xc32   :  { %v1410_v46 = vmul.f32 %v4061_v28, %v1362_v42  ;;  %v1402_v30 = vadd.f32 1e-05, %v1396_v26 }
 0xc33   :  { %v1391_v31 = vpop.xlane.xlu0 %1390 }
 0xc34   :  { %4068 = vrsqrt.f32 %v1402_v30  ;;  %v1397_v51 = vmul.f32 0.03125, %v1391_v31  ;;  %v1420_v39 = vmul.f32 %v3373_v34, %v1410_v46 }
 0xc35   :  { %v4063_v35 = vpop.eup %4062 }
 0xc36   :  { %v1411_v37 = vmul.f32 %v4063_v35, %v1363_v60  ;;  %v1403_v56 = vadd.f32 1e-05, %v1397_v51  ;;  %v1430_v42 = vadd.f32 %v3374_v40, %v1420_v39 }
 0xc38   :  { %4070 = vrsqrt.f32 %v1403_v56  ;;  %v1421_v44 = vmul.f32 %v3373_v34, %v1411_v37 }
 0xc39   :  { %v4065_v47 = vpop.eup %4064 }
 0xc3a   :  { %v1431_v48 = vadd.f32 %v3374_v40, %v1421_v44  ;;  %v1412_v52 = vmul.f32 %v4065_v47, %v4634_v58 }
 0xc3c   :  { %v1440_v53 = vpack.c.bf16 %v1431_v48, %v1430_v42  ;;  %v1422_v60 = vmul.f32 %v3373_v34, %v1412_v52 }
 0xc3d   :  { %v4067_v54 = vpop.eup %4066 }
 0xc3e   :  { %3680 = vmatmul.mubr.msk.bf16.vlgmr.msra.gmra.mxu0 %vm222_vm1, %v1440_v53  ;;  %v1413_v55 = vmul.f32 %v4067_v54, %v4640_v1  ;;  %v1432_v63 = vadd.f32 %v3374_v40, %v1422_v60 }
 0xc3f   :  { %3683 = vmatprep.mubr.msk.bf16.mxu0 %vm4196_vm2, %v4195_v29 }
 0xc40   :  { %v1423_v61 = vmul.f32 %v3373_v34, %v1413_v55 }
 0xc41   :  { %v4069_v62 = vpop.eup %4068 }
 0xc42   :  { %v1433_v0 = vadd.f32 %v3374_v40, %v1423_v61  ;;  %v1414_v2 = vmul.f32 %v4069_v62, %v4646_v10  ;;  %v3963_v10 = vld [vmem:[%s5148_s1 + $0xc8] sm:$0xff]  }
 0xc43   :  { %3692 = vmatpush3.bf16.msra.mxu1 %v3963_v10 }
 0xc44   :  { %v1441_v5 = vpack.c.bf16 %v1433_v0, %v1432_v63  ;;  %v1424_v7 = vmul.f32 %v3373_v34, %v1414_v2  ;;  %3693 = vmatprep.subr.bf16.mxu1 %v4195_v29 }
 0xc45   :  { %v4071_v6 = vpop.eup %4070 }
 0xc46   :  { %3684 = vmatmul.mubr.msk.bf16.gmra.mxu0 %vm222_vm1, %v1441_v5  ;;  %v1415_v58 = vmul.f32 %v4071_v6, %v1367_v9  ;;  %v1434_v12 = vadd.f32 %v3374_v40, %v1424_v7  ;;  %v3965_v9 = vld [vmem:[%s5148_s1 + $0xb8] sm:$0xff]  }
 0xc47   :  { %3687 = vmatprep.mubr.msk.bf16.mxu0 %vm4196_vm2, %v4195_v29  ;;  %3694 = vmatpush3.bf16.msra.mxu1 %v3964_v15 }
 0xc48   :  { %v1425_v1 = vmul.f32 %v3373_v34, %v1415_v58  ;;  %3695 = vmatprep.subr.bf16.mxu1 %v4195_v29 }
 0xc4a   :  { %v1435_v13 = vadd.f32 %v3374_v40, %v1425_v1 }
 0xc4b   :  { %3696 = vmatpush3.bf16.msra.mxu1 %v3965_v9 }
 0xc4c   :  { %v1442_v3 = vpack.c.bf16 %v1435_v13, %v1434_v12  ;;  %3697 = vmatprep.subr.bf16.mxu1 %v4195_v29 }
 0xc4e   :  { %3688 = vmatmul.mubr.msk.bf16.gmra.mxu0 %vm222_vm1, %v1442_v3 }
 0xc4f   :  { %3723 = vmatprep.mubr.msk.bf16.mxu0 %vm4196_vm2, %v4195_v29  ;;  %3698 = vmatpush3.bf16.msra.mxu1 %v3966_v50 }
 0xc50   :  { %3699 = vmatprep.subr.bf16.mxu1 %v4195_v29 }
 0xc53   :  { %3700 = vmatpush3.bf16.msra.mxu1 %v3967_v16 }
 0xc54   :  { %3701 = vmatprep.subr.bf16.mxu1 %v4195_v29 }
 0xc57   :  { %3702 = vmatpush3.bf16.msra.mxu1 %v3968_v27 }
 0xc58   :  { %3703 = vmatprep.subr.bf16.mxu1 %v4195_v29 }
 0xc5b   :  { %3704 = vmatpush3.bf16.msra.mxu1 %v3969_v49 }
 0xc5c   :  { %3705 = vmatprep.subr.bf16.mxu1 %v4195_v29 }
 0xc5f   :  { %3706 = vmatpush3.bf16.msra.mxu1 %v3970_v8 }
 0xcfe   :  { %v1503_v14 = vpop.f32.mrf.mxu0 }
 0xcff   :  { %v1504_v4 = vadd.f32 %v3375_v43, %v1503_v14 }
 0xd00   :  { %v3681_v45 = vpop.f32.mrf.mxu0 }
 0xd01   :  { %v3381_v11 = vmul.f32 -1.702, %v1504_v4 }
 0xd02   :  { %v1506_v17 = vpop.f32.mrf.mxu0 }
 0xd03   :  { %v1538_v20 = vmul.f32 1.442695, %v3381_v11  ;;  %v1507_v21 = vadd.f32 %v3375_v43, %v1506_v17  ;;  %v3395_v11 = vld [vmem:[%s5150_s2 + $0x21] ss:$0 sm:$0xff] }
 0xd04   :  { %v3682_v19 = vpop.f32.mrf.mxu0 }
 0xd05   :  { %4072 = vpow2.f32 %v1538_v20  ;;  %v3382_v36 = vmul.f32 -1.702, %v1507_v21 }
 0xd06   :  { %v1511_v23 = vpop.f32.mrf.mxu0 }
 0xd07   :  { %v1540_v41 = vmul.f32 1.442695, %v3382_v36  ;;  %v1512_v25 = vadd.f32 %v3375_v43, %v1511_v23 }
 0xd08   :  { %v3685_v26 = vpop.f32.mrf.mxu0 }
 0xd09   :  { %4074 = vpow2.f32 %v1540_v41  ;;  %v3383_v28 = vmul.f32 -1.702, %v1512_v25 }
 0xd0a   :  { %v1514_v46 = vpop.f32.mrf.mxu0 }
 0xd0b   :  { %v1542_v30 = vmul.f32 1.442695, %v3383_v28  ;;  %v1515_v31 = vadd.f32 %v3375_v43, %v1514_v46 }
 0xd0c   :  { %v3686_v34 = vpop.f32.mrf.mxu0 }
 0xd0d   :  { %4076 = vpow2.f32 %v1542_v30  ;;  %v3384_v51 = vmul.f32 -1.702, %v1515_v31 }
 0xd0e   :  { %v1519_v35 = vpop.f32.mrf.mxu0 }
 0xd0f   :  { %v1544_v37 = vmul.f32 1.442695, %v3384_v51  ;;  %v1520_v56 = vadd.f32 %v3375_v43, %v1519_v35 }
 0xd10   :  { %v3689_v39 = vpop.f32.mrf.mxu0 }
 0xd11   :  { %4078 = vpow2.f32 %v1544_v37  ;;  %v3385_v40 = vmul.f32 -1.702, %v1520_v56 }
 0xd12   :  { %v4073_v44 = vpop.eup %4072  ;;  %v1522_v47 = vpop.f32.mrf.mxu0 }
 0xd13   :  { %v1550_v42 = vadd.f32 1.0, %v4073_v44  ;;  %v1546_v48 = vmul.f32 1.442695, %v3385_v40  ;;  %v1523_v52 = vadd.f32 %v3375_v43, %v1522_v47 }
 0xd14   :  { %v3690_v53 = vpop.f32.mrf.mxu0 }
 0xd15   :  { %v3386_v54 = vmul.f32 -1.702, %v1523_v52  ;;  %4080 = vpow2.f32 %v1546_v48 }
 0xd16   :  { %v4075_v55 = vpop.eup %4074  ;;  %4082 = vrcp.f32 %v1550_v42 }
 0xd17   :  { %v1551_v60 = vadd.f32 1.0, %v4075_v55  ;;  %v1548_v61 = vmul.f32 1.442695, %v3386_v54 }
 0xd19   :  { %4084 = vrcp.f32 %v1551_v60 }
 0xd1a   :  { %v4077_v62 = vpop.eup %4076  ;;  %4086 = vpow2.f32 %v1548_v61 }
 0xd1b   :  { %v1552_v63 = vadd.f32 1.0, %v4077_v62 }
 0xd1d   :  { %4088 = vrcp.f32 %v1552_v63 }
 0xd1e   :  { %v4079_v0 = vpop.eup %4078 }
 0xd1f   :  { %v1553_v2 = vadd.f32 1.0, %v4079_v0 }
 0xd21   :  { %4090 = vrcp.f32 %v1553_v2 }
 0xd22   :  { %v4081_v5 = vpop.eup %4080 }
 0xd23   :  { %v4083_v6 = vpop.eup %4082  ;;  %v1554_v58 = vadd.f32 1.0, %v4081_v5 }
 0xd24   :  { %v1568_v12 = vmul.f32 %v4083_v6, %v1504_v4 }
 0xd25   :  { %4092 = vrcp.f32 %v1554_v58 }
 0xd26   :  { %v4085_v7 = vpop.eup %4084 }
 0xd27   :  { %v4087_v1 = vpop.eup %4086  ;;  %v1569_v13 = vmul.f32 %v4085_v7, %v1507_v21 }
 0xd28   :  { %v1555_v3 = vadd.f32 1.0, %v4087_v1 }
 0xd29   :  { %v1590_v10 = vpack.c.bf16 %v1569_v13, %v1568_v12 }
 0xd2a   :  { %4094 = vrcp.f32 %v1555_v3  ;;  %v4089_v15 = vpop.eup %4088 }
 0xd2b   :  { %3708 = vmatmul.mubr.bf16.vlgmr.msra.gmra.mxu1 %v1590_v10  ;;  %v1570_v50 = vmul.f32 %v4089_v15, %v1512_v25 }
 0xd2c   :  { %3711 = vmatprep.mubr.msk.bf16.mxu1 %vm4196_vm2, %v4195_v29 }
 0xd2e   :  { %v4091_v9 = vpop.eup %4090 }
 0xd2f   :  { %v1571_v16 = vmul.f32 %v4091_v9, %v1515_v31 }
 0xd31   :  { %v1591_v27 = vpack.c.bf16 %v1571_v16, %v1570_v50 }
 0xd32   :  { %v4093_v49 = vpop.eup %4092 }
 0xd33   :  { %3712 = vmatmul.mubr.bf16.gmra.mxu1 %v1591_v27  ;;  %v1572_v43 = vmul.f32 %v4093_v49, %v1520_v56 }
 0xd34   :  { %3715 = vmatprep.mubr.msk.bf16.mxu1 %vm4196_vm2, %v4195_v29 }
 0xd37   :  { %v4095_v8 = vpop.eup %4094 }
 0xd38   :  { %v1573_v14 = vmul.f32 %v4095_v8, %v1523_v52 }
 0xd3a   :  { %v1592_v4 = vpack.c.bf16 %v1573_v14, %v1572_v43 }
 0xd3c   :  { %3716 = vmatmul.mubr.bf16.gmra.mxu1 %v1592_v4 }
 0xdeb   :  { %v1675_v45 = vpop.f32.mrf.mxu1 }
 0xdec   :  { %v1698_v17 = vadd.f32 %v1675_v45, %v4601_v32  ;;  %v3971_v45 = vld [vmem:[%s5148_s1 + $0xd8] sm:$0xff]  }
 0xded   :  { %v3709_v20 = vpop.f32.mrf.mxu1  ;;  %3720 = vmatpush3.bf16.msra.mxu0 %v3971_v45 }
 0xdee   :  { %v4722_v21 = vadd.f32 %v3395_v11, %v1698_v17  ;;  %3721 = vmatprep.subr.bf16.mxu0 %v4195_v29 }
 0xdef   :  { %v1678_v19 = vpop.f32.mrf.mxu1 }
 0xdf0   :  { %v1699_v36 = vadd.f32 %v1678_v19, %v4606_v18  ;;  %v1717_v23 = vsel %vm222_vm1, %v4722_v21, 0.0 }
 0xdf1   :  { %1718 = vadd.xlane.f32.xlu1 %v1717_v23  ;;  %v3710_v41 = vpop.f32.mrf.mxu1 }
 0xdf2   :  { %v4727_v25 = vadd.f32 %v3395_v11, %v1699_v36 }
 0xdf3   :  { %v1683_v26 = vpop.f32.mrf.mxu1 }
 0xdf4   :  { %v1700_v28 = vadd.f32 %v1683_v26, %v4611_v22  ;;  %v1720_v46 = vsel %vm222_vm1, %v4727_v25, 0.0 }
 0xdf5   :  { %1721 = vadd.xlane.f32.xlu0 %v1720_v46  ;;  %v3713_v32 = vpop.f32.mrf.mxu1 }
 0xdf6   :  { %v4732_v30 = vadd.f32 %v3395_v11, %v1700_v28 }
 0xdf7   :  { %v1686_v31 = vpop.f32.mrf.mxu1 }
 0xdf8   :  { %v1701_v18 = vadd.f32 %v1686_v31, %v4616_v24  ;;  %v1723_v34 = vsel %vm222_vm1, %v4732_v30, 0.0 }
 0xdf9   :  { %1724 = vadd.xlane.f32.xlu1 %v1723_v34  ;;  %v3714_v51 = vpop.f32.mrf.mxu1 }
 0xdfa   :  { %v4737_v35 = vadd.f32 %v3395_v11, %v1701_v18 }
 0xdfc   :  { %v1691_v37 = vpop.f32.mrf.mxu1  ;;  %v1726_v22 = vsel %vm222_vm1, %v4737_v35, 0.0 }
 0xdfd   :  { %v1702_v56 = vadd.f32 %v1691_v37, %v4621_v33  ;;  %1727 = vadd.xlane.f32.xlu0 %v1726_v22 }
 0xdfe   :  { %v3717_v39 = vpop.f32.mrf.mxu1 }
 0xdff   :  { %v4742_v40 = vadd.f32 %v3395_v11, %v1702_v56  ;;  %v3396_v56 = vld [vmem:[%s5150_s2 + $0x22] ss:$0 sm:$0xff] }
 0xe00   :  { %v1694_v44 = vpop.f32.mrf.mxu1 }
 0xe01   :  { %v1703_v24 = vadd.f32 %v1694_v44, %v4626_v38  ;;  %v1729_v47 = vsel %vm222_vm1, %v4742_v40, 0.0 }
 0xe02   :  { %1730 = vadd.xlane.f32.xlu1 %v1729_v47  ;;  %v3718_v42 = vpop.f32.mrf.mxu1 }
 0xe03   :  { %v4747_v48 = vadd.f32 %v3395_v11, %v1703_v24  ;;  %v3972_v11 = vld [vmem:[%s5148_s1 + $0xd0] sm:$0xff]  }
 0xe04   :  { %3722 = vmatpush3.bf16.msra.mxu0 %v3972_v11 }
 0xe05   :  { %v1732_v52 = vsel %vm222_vm1, %v4747_v48, 0.0 }
 0xe06   :  { %1733 = vadd.xlane.f32.xlu0 %v1732_v52 }
 0xe7a   :  { %v1719_v53 = vpop.xlane.xlu1 %1718 }
 0xe7b   :  { %v1735_v33 = vmul.f32 0.03125, %v1719_v53 }
 0xe7d   :  { %v1741_v54 = vsub.f32 %v4722_v21, %v1735_v33  ;;  %v3397_v33 = vld [vmem:[%s5150_s2 + $0x23] ss:$0 sm:$0xff] }
 0xe7e   :  { %v1722_v55 = vpop.xlane.xlu0 %1721 }
 0xe7f   :  { %v1736_v60 = vmul.f32 0.03125, %v1722_v55  ;;  %v1747_v61 = vmul.f32 %v1741_v54, %v1741_v54 }
 0xe81   :  { %v1742_v38 = vsub.f32 %v4727_v25, %v1736_v60  ;;  %v1753_v62 = vsel %vm222_vm1, %v1747_v61, 0.0 }
 0xe82   :  { %v1725_v63 = vpop.xlane.xlu1 %1724  ;;  %1754 = vadd.xlane.f32.xlu1 %v1753_v62 }
 0xe83   :  { %v1737_v0 = vmul.f32 0.03125, %v1725_v63  ;;  %v1748_v2 = vmul.f32 %v1742_v38, %v1742_v38 }
 0xe85   :  { %v4755_v5 = vsub.f32 %v4732_v30, %v1737_v0  ;;  %v1756_v6 = vsel %vm222_vm1, %v1748_v2, 0.0 }
 0xe86   :  { %v1728_v58 = vpop.xlane.xlu0 %1727  ;;  %1757 = vadd.xlane.f32.xlu0 %v1756_v6 }
 0xe87   :  { %v1738_v7 = vmul.f32 0.03125, %v1728_v58  ;;  %v1749_v1 = vmul.f32 %v4755_v5, %v4755_v5 }
 0xe89   :  { %v1744_v12 = vsub.f32 %v4737_v35, %v1738_v7  ;;  %v1759_v13 = vsel %vm222_vm1, %v1749_v1, 0.0 }
 0xe8a   :  { %1760 = vadd.xlane.f32.xlu1 %v1759_v13 }
 0xe8b   :  { %v1731_v3 = vpop.xlane.xlu1 %1730  ;;  %v1750_v10 = vmul.f32 %v1744_v12, %v1744_v12 }
 0xe8c   :  { %v1739_v15 = vmul.f32 0.03125, %v1731_v3 }
 0xe8d   :  { %v1762_v9 = vsel %vm222_vm1, %v1750_v10, 0.0 }
 0xe8e   :  { %v1745_v50 = vsub.f32 %v4742_v40, %v1739_v15  ;;  %1763 = vadd.xlane.f32.xlu0 %v1762_v9 }
 0xe8f   :  { %v1734_v16 = vpop.xlane.xlu0 %1733 }
 0xe90   :  { %v1740_v27 = vmul.f32 0.03125, %v1734_v16  ;;  %v1751_v49 = vmul.f32 %v1745_v50, %v1745_v50 }
 0xe92   :  { %v1746_v8 = vsub.f32 %v4747_v48, %v1740_v27  ;;  %v1765_v43 = vsel %vm222_vm1, %v1751_v49, 0.0 }
 0xe93   :  { %1766 = vadd.xlane.f32.xlu1 %v1765_v43 }
 0xe94   :  { %v1752_v14 = vmul.f32 %v1746_v8, %v1746_v8 }
 0xe96   :  { %v1768_v4 = vsel %vm222_vm1, %v1752_v14, 0.0 }
 0xe97   :  { %1769 = vadd.xlane.f32.xlu0 %v1768_v4 }
 0xf0b   :  { %v1755_v17 = vpop.xlane.xlu1 %1754 }
 0xf0c   :  { %v1771_v20 = vmul.f32 0.03125, %v1755_v17 }
 0xf0e   :  { %v1777_v19 = vadd.f32 1e-05, %v1771_v20 }
 0xf0f   :  { %v1758_v36 = vpop.xlane.xlu0 %1757 }
 0xf10   :  { %4096 = vrsqrt.f32 %v1777_v19  ;;  %v1772_v23 = vmul.f32 0.03125, %v1758_v36 }
 0xf12   :  { %v1778_v41 = vadd.f32 1e-05, %v1772_v23 }
 0xf13   :  { %v1761_v26 = vpop.xlane.xlu1 %1760 }
 0xf14   :  { %4098 = vrsqrt.f32 %v1778_v41  ;;  %v1773_v28 = vmul.f32 0.03125, %v1761_v26 }
 0xf16   :  { %v1779_v46 = vadd.f32 1e-05, %v1773_v28 }
 0xf17   :  { %v1764_v32 = vpop.xlane.xlu0 %1763 }
 0xf18   :  { %4100 = vrsqrt.f32 %v1779_v46  ;;  %v1774_v31 = vmul.f32 0.03125, %v1764_v32 }
 0xf1a   :  { %v1780_v18 = vadd.f32 1e-05, %v1774_v31 }
 0xf1c   :  { %4102 = vrsqrt.f32 %v1780_v18  ;;  %v1767_v34 = vpop.xlane.xlu1 %1766 }
 0xf1d   :  { %v4097_v51 = vpop.eup %4096  ;;  %v1775_v37 = vmul.f32 0.03125, %v1767_v34 }
 0xf1e   :  { %v1789_v22 = vmul.f32 %v4097_v51, %v1741_v54 }
 0xf1f   :  { %v1781_v39 = vadd.f32 1e-05, %v1775_v37 }
 0xf20   :  { %v1770_v44 = vpop.xlane.xlu0 %1769  ;;  %v1799_v42 = vmul.f32 %v3396_v56, %v1789_v22 }
 0xf21   :  { %v4099_v24 = vpop.eup %4098  ;;  %4104 = vrsqrt.f32 %v1781_v39  ;;  %v1776_v47 = vmul.f32 0.03125, %v1770_v44 }
 0xf22   :  { %v1790_v52 = vmul.f32 %v4099_v24, %v1742_v38  ;;  %v1809_v54 = vadd.f32 %v3397_v33, %v1799_v42 }
 0xf23   :  { %v1782_v53 = vadd.f32 1e-05, %v1776_v47 }
 0xf24   :  { %v1800_v55 = vmul.f32 %v3396_v56, %v1790_v52 }
 0xf25   :  { %v4101_v60 = vpop.eup %4100  ;;  %4106 = vrsqrt.f32 %v1782_v53 }
 0xf26   :  { %v1810_v61 = vadd.f32 %v3397_v33, %v1800_v55  ;;  %v1791_v62 = vmul.f32 %v4101_v60, %v4755_v5 }
 0xf28   :  { %v1819_v63 = vpack.c.bf16 %v1810_v61, %v1809_v54  ;;  %v1801_v6 = vmul.f32 %v3396_v56, %v1791_v62 }
 0xf29   :  { %v4103_v0 = vpop.eup %4102 }
 0xf2a   :  { %3724 = vmatmul.mubr.msk.bf16.vlgmr.msra.gmra.mxu0 %vm222_vm1, %v1819_v63  ;;  %v1792_v2 = vmul.f32 %v4103_v0, %v1744_v12  ;;  %v1811_v7 = vadd.f32 %v3397_v33, %v1801_v6 }
 0xf2b   :  { %3727 = vmatprep.mubr.msk.bf16.mxu0 %vm4196_vm2, %v4195_v29 }
 0xf2c   :  { %v1802_v38 = vmul.f32 %v3396_v56, %v1792_v2 }
 0xf2e   :  { %v4105_v58 = vpop.eup %4104  ;;  %v1812_v1 = vadd.f32 %v3397_v33, %v1802_v38 }
 0xf2f   :  { %v1793_v13 = vmul.f32 %v4105_v58, %v1745_v50  ;;  %v3398_v50 = vld [vmem:[%s5150_s2 + $0x24] ss:$0 sm:$0xff] }
 0xf30   :  { %v1820_v3 = vpack.c.bf16 %v1812_v1, %v1811_v7 }
 0xf31   :  { %v1803_v15 = vmul.f32 %v3396_v56, %v1793_v13 }
 0xf32   :  { %v4107_v10 = vpop.eup %4106  ;;  %3728 = vmatmul.mubr.msk.bf16.gmra.mxu0 %vm222_vm1, %v1820_v3 }
 0xf33   :  { %3731 = vmatprep.mubr.msk.bf16.mxu0 %vm4196_vm2, %v4195_v29  ;;  %v1794_v5 = vmul.f32 %v4107_v10, %v1746_v8  ;;  %v1813_v12 = vadd.f32 %v3397_v33, %v1803_v15 }
 0xf35   :  { %v1804_v9 = vmul.f32 %v3396_v56, %v1794_v5 }
 0xf37   :  { %v1814_v16 = vadd.f32 %v3397_v33, %v1804_v9 }
 0xf39   :  { %v1821_v27 = vpack.c.bf16 %v1814_v16, %v1813_v12 }
 0xf3b   :  { %3732 = vmatmul.mubr.msk.bf16.gmra.mxu0 %vm222_vm1, %v1821_v27 }
 0xfea   :  { %v1882_v49 = vpop.f32.mrf.mxu0 }
 0xfeb   :  { %v1883_v4 = vadd.f32 %v3398_v50, %v1882_v49 }
 0xfec   :  { %v3725_v43 = vpop.f32.mrf.mxu0 }
 0xfee   :  { %v1885_v14 = vpop.f32.mrf.mxu0 }
 0xfef   :  { %v1886_v45 = vadd.f32 %v3398_v50, %v1885_v14 }
 0xff0   :  { %v3726_v11 = vpop.f32.mrf.mxu0 }
 0xff1   :  { %v4791_v17 = vpack.c.bf16 %v1886_v45, %v1883_v4 }
 0xff2   :  { %v1890_v8 = vpop.f32.mrf.mxu0 }
 0xff3   :  { %v1891_v20 = vadd.f32 %v3398_v50, %v1890_v8  ;;  %1911 = vrot.lane.b32.xlu0 %v4791_v17, %s4197_s13  ;;  %3739 = vmatprep.mubr.msk.bf16.mxu0 %vm525_vm3, %v4791_v17 }
 0xff4   :  { %v3729_v19 = vpop.f32.mrf.mxu0 }
 0xff5   :  { %v4797_v36 = vpack.c.bf16 %v1891_v20, %v1891_v20 }
 0xff6   :  { %v1893_v23 = vpop.f32.mrf.mxu0 }
 0xff7   :  { %1913 = vrot.lane.b32.xlu1 %v4797_v36, %s4197_s13  ;;  %v1894_v28 = vadd.f32 %v3398_v50, %v1893_v23 }
 0xff8   :  { %v3730_v41 = vpop.f32.mrf.mxu0 }
 0xffb   :  { %v1898_v26 = vpop.f32.mrf.mxu0 }
 0xffc   :  { %v1899_v46 = vadd.f32 %v3398_v50, %v1898_v26 }
 0xffd   :  { %v3733_v32 = vpop.f32.mrf.mxu0 }
 0xffe   :  { %v4801_v31 = vpack.c.bf16 %v1899_v46, %v1894_v28 }
 0xfff   :  { %v1901_v18 = vpop.f32.mrf.mxu0 }
0x1000   :  { %v1902_v34 = vadd.f32 %v3398_v50, %v1901_v18  ;;  %3747 = vmatprep.mubr.msk.bf16.mxu1 %vm525_vm3, %v4801_v31 }
0x1001   :  { %v3734_v51 = vpop.f32.mrf.mxu0 }
0x1002   :  { %v4805_v37 = vpack.c.bf16 %v1902_v34, %v1902_v34 }
0x1004   :  { %1979 = vrot.lane.b32.xlu1 %v4805_v37, %s4197_s13 }
0x1008   :  { %1977 = vrot.lane.b32.xlu1 %v4801_v31, %s4197_s13 }
0x1065   :  { %v1912_v39 = vpop.permute.xlu0 %1911 }
0x1066   :  { %v1922_v44 = vsel %vm525_vm3, %v1912_v39, 0 }
0x1069   :  { %v1914_v22 = vpop.permute.xlu1 %1913 }
0x106a   :  { %v1925_v56 = vsel %vm525_vm3, %v1914_v22, 0  ;;  %3885 = vmatprep.subr.msk.bf16.mxu0 %vm525_vm3, %v1914_v22 }
0x106b   :  { %3736 = vmatpush3.bf16.xpose.msra.mxu0 %v1925_v56 }
0x106c   :  { %3886 = vmatprep.subr.msk.bf16.mxu0 %vm525_vm3, %v1912_v39 }
0x1073   :  { %3738 = vmatpush3.bf16.xpose.msra.mxu0 %v1922_v44 }
0x1076   :  { %v1980_v24 = vpop.permute.xlu1 %1979 }
0x1077   :  { %v1991_v47 = vsel %vm525_vm3, %v1980_v24, 0  ;;  %3887 = vmatprep.subr.msk.bf16.mxu1 %vm525_vm3, %v1980_v24 }
0x1078   :  { %3744 = vmatpush3.bf16.xpose.msra.mxu1 %v1991_v47 }
0x107a   :  { %v1978_v42 = vpop.permute.xlu1 %1977  ;;  %3740 = vmatmul.mubr.msk.bf16.vlgmr.msra.gmra.mxu0 %vm525_vm3, %v4797_v36 }
0x107b   :  { %3888 = vmatprep.subr.msk.bf16.mxu1 %vm525_vm3, %v1978_v42  ;;  %v1988_v52 = vsel %vm525_vm3, %v1978_v42, 0 }
0x1080   :  { %3746 = vmatpush3.bf16.xpose.msra.mxu1 %v1988_v52 }
0x1087   :  { %3748 = vmatmul.mubr.msk.bf16.vlgmr.msra.gmra.mxu1 %vm525_vm3, %v4805_v37 }
0x113a   :  { %v3741_v53 = vpop.f32.mrf.mxu0 }
0x113b   :  { %v2043_v63 = vmul.f32 0.25, %v3741_v53 }
0x113c   :  { %v1961_v33 = vpop.f32.mrf.mxu0 }
0x113d   :  { %v2041_v55 = vmul.f32 0.25, %v1961_v33  ;;  %v2049_v38 = vsel %vm324_vm4, %v2043_v63, -1e+30 }
0x113e   :  { %v3742_v60 = vpop.f32.mrf.mxu0  ;;  %v2059_v7 = vsel %vm666_vm5, %v2049_v38, -inf }
0x113f   :  { %v2047_v54 = vsel %vm324_vm4, %v2041_v55, -1e+30 }
0x1140   :  { %v1964_v61 = vpop.f32.mrf.mxu0  ;;  %v2053_v62 = vsel %vm666_vm5, %v2047_v54, -inf }
0x1141   :  { %v2042_v0 = vmul.f32 0.25, %v1964_v61  ;;  %2054 = vmax.xlane.f32.xlu1 %v2053_v62 }
0x1143   :  { %v2048_v2 = vsel %vm324_vm4, %v2042_v0, -1e+30 }
0x1144   :  { %v2056_v6 = vsel %vm666_vm5, %v2048_v2, -inf }
0x1145   :  { %2057 = vmax.xlane.f32.xlu0 %v2056_v6 }
0x1147   :  { %v3749_v58 = vpop.f32.mrf.mxu1 }
0x1148   :  { %v2046_v13 = vmul.f32 0.25, %v3749_v58 }
0x1149   :  { %v2027_v1 = vpop.f32.mrf.mxu1  ;;  %2060 = vmax.xlane.f32.xlu0 %v2059_v7 }
0x114a   :  { %v2044_v3 = vmul.f32 0.25, %v2027_v1  ;;  %v2052_v9 = vsel %vm324_vm4, %v2046_v13, -1e+30 }
0x114b   :  { %v3750_v10 = vpop.f32.mrf.mxu1  ;;  %v2068_v12 = vsel %vm666_vm5, %v2052_v9, -inf }
0x114c   :  { %v2050_v5 = vsel %vm324_vm4, %v2044_v3, -1e+30 }
0x114d   :  { %v2062_v15 = vsel %vm666_vm5, %v2050_v5, -inf  ;;  %v2030_v16 = vpop.f32.mrf.mxu1 }
0x114e   :  { %2063 = vmax.xlane.f32.xlu0 %v2062_v15  ;;  %v2045_v27 = vmul.f32 0.25, %v2030_v16 }
0x1150   :  { %v2051_v49 = vsel %vm324_vm4, %v2045_v27, -1e+30 }
0x1151   :  { %v2065_v50 = vsel %vm666_vm5, %v2051_v49, -inf }
0x1152   :  { %2069 = vmax.xlane.f32.xlu0 %v2068_v12  ;;  %2125 = vrot.lane.b32.xlu1 %v4797_v36, %s4198_s14 }
0x1156   :  { %2253 = vrot.lane.b32.xlu1 %v4797_v36, %s4199_s15 }
0x115a   :  { %2187 = vrot.lane.b32.xlu1 %v4805_v37, %s4198_s14 }
0x1168   :  { %2123 = vrot.lane.b32.xlu0 %v4791_v17, %s4198_s14 }
0x117e   :  { %2066 = vmax.xlane.f32.xlu1 %v2065_v50 }
0x118f   :  { %2185 = vrot.lane.b32.xlu1 %v4801_v31, %s4198_s14 }
0x11ca   :  { %v2055_v43 = vpop.xlane.xlu1 %2054 }
0x11cb   :  { %v2071_v8 = vsub.f32 %v2047_v54, %v2055_v43 }
0x11cd   :  { %v2077_v26 = vmul.f32 1.442695, %v2071_v8 }
0x11ce   :  { %v2126_v14 = vpop.permute.xlu1 %2125  ;;  %v2058_v4 = vpop.xlane.xlu0 %2057 }
0x11cf   :  { %v2135_v45 = vsel %vm748_vm6, %v2126_v14, 0  ;;  %v2072_v11 = vsub.f32 %v2048_v2, %v2058_v4  ;;  %3889 = vmatprep.subr.msk.bf16.mxu0 %vm748_vm6, %v2126_v14 }
0x11d0   :  { %3752 = vmatpush3.bf16.msra.mxu0 %v2135_v45 }
0x11d1   :  { %v2079_v20 = vmul.f32 1.442695, %v2072_v11 }
0x11d2   :  { %v4853_v19 = vpop.permute.xlu1 %2253  ;;  %v2061_v23 = vpop.xlane.xlu0 %2060 }
0x11d3   :  { %4108 = vpow2.f32 %v2079_v20  ;;  %v2073_v41 = vsub.f32 %v2049_v38, %v2061_v23  ;;  %v2265_v14 = vsel %vm525_vm3, %v4853_v19, 0 }
0x11d5   :  { %v2081_v28 = vmul.f32 1.442695, %v2073_v41 }
0x11d6   :  { %v2188_v46 = vpop.permute.xlu1 %2187 }
0x11d7   :  { %4110 = vpow2.f32 %v2081_v28  ;;  %v2197_v32 = vsel %vm748_vm6, %v2188_v46, 0  ;;  %v2064_v18 = vpop.xlane.xlu0 %2063  ;;  %3890 = vmatprep.subr.msk.bf16.mxu1 %vm748_vm6, %v2188_v46 }
0x11d8   :  { %3760 = vmatpush3.bf16.msra.mxu1 %v2197_v32  ;;  %4112 = vpow2.f32 %v2077_v26  ;;  %v2074_v34 = vsub.f32 %v2050_v5, %v2064_v18 }
0x11da   :  { %v2083_v56 = vmul.f32 1.442695, %v2074_v34 }
0x11db   :  { %v2070_v51 = vpop.xlane.xlu0 %2069 }
0x11dc   :  { %v2076_v22 = vsub.f32 %v2052_v9, %v2070_v51 }
0x11de   :  { %v2087_v39 = vmul.f32 1.442695, %v2076_v22 }
0x11df   :  { %v2124_v44 = vpop.permute.xlu0 %2123 }
0x11e0   :  { %v4109_v24 = vpop.eup %4108  ;;  %4114 = vpow2.f32 %v2087_v39  ;;  %3753 = vmatprep.subr.bf16.mxu0 %v2124_v44 }
0x11e1   :  { %3754 = vmatpush3.bf16.msra.mxu0 %v2124_v44  ;;  %v2092_v47 = vsel %vm666_vm5, %v4109_v24, 0.0  ;;  %4116 = vpow2.f32 %v2083_v56 }
0x11e2   :  { %3891 = vmatprep.subr.msk.bf16.mxu0 %vm525_vm3, %v4853_v19  ;;  %2093 = vadd.xlane.f32.xlu0 %v2092_v47 }
0x11e4   :  { %v4111_v42 = vpop.eup %4110 }
0x11e5   :  { %v2095_v52 = vsel %vm666_vm5, %v4111_v42, 0.0  ;;  %v4113_v53 = vpop.eup %4112 }
0x11e6   :  { %2096 = vadd.xlane.f32.xlu1 %v2095_v52  ;;  %v2089_v33 = vsel %vm666_vm5, %v4113_v53, 0.0 }
0x11ea   :  { %2090 = vadd.xlane.f32.xlu1 %v2089_v33 }
0x11ed   :  { %v4115_v55 = vpop.eup %4114 }
0x11ee   :  { %v2104_v60 = vsel %vm666_vm5, %v4115_v55, 0.0  ;;  %v4117_v54 = vpop.eup %4116 }
0x11ef   :  { %2105 = vadd.xlane.f32.xlu0 %v2104_v60  ;;  %v2098_v61 = vsel %vm666_vm5, %v4117_v54, 0.0 }
0x11f3   :  { %2099 = vadd.xlane.f32.xlu0 %v2098_v61 }
0x11fb   :  { %2321 = vrot.lane.b32.xlu1 %v4805_v37, %s4199_s15 }
0x1207   :  { %v2067_v62 = vpop.xlane.xlu1 %2066 }
0x1208   :  { %v2075_v63 = vsub.f32 %v2051_v49, %v2067_v62 }
0x1209   :  { %2251 = vrot.lane.b32.xlu0 %v4791_v17, %s4199_s15 }
0x120a   :  { %v2085_v0 = vmul.f32 1.442695, %v2075_v63 }
0x120b   :  { %v2186_v2 = vpop.permute.xlu1 %2185 }
0x120c   :  { %3761 = vmatprep.subr.bf16.mxu1 %v2186_v2  ;;  %4118 = vpow2.f32 %v2085_v0 }
0x120d   :  { %2247 = vrot.lane.b32.xlu0 %v4791_v17, %s4200_s16  ;;  %3762 = vmatpush3.bf16.msra.mxu1 %v2186_v2 }
0x1211   :  { %2319 = vrot.lane.b32.xlu0 %v4801_v31, %s4199_s15 }
0x1215   :  { %2317 = vrot.lane.b32.xlu0 %v4805_v37, %s4200_s16 }
0x1219   :  { %v4119_v6 = vpop.eup %4118 }
0x121a   :  { %v2101_v38 = vsel %vm666_vm5, %v4119_v6, 0.0 }
0x121f   :  { %2102 = vadd.xlane.f32.xlu1 %v2101_v38 }
0x1230   :  { %2249 = vrot.lane.b32.xlu1 %v4797_v36, %s4200_s16 }
0x1234   :  { %2315 = vrot.lane.b32.xlu1 %v4801_v31, %s4200_s16 }
0x126b   :  { %v2094_v58 = vpop.xlane.xlu0 %2093 }
0x126f   :  { %v2097_v7 = vpop.xlane.xlu1 %2096 }
0x1270   :  { %4120 = vrcp.f32 %v2097_v7 }
0x1271   :  { %4122 = vrcp.f32 %v2094_v58 }
0x1273   :  { %v2091_v1 = vpop.xlane.xlu1 %2090 }
0x1274   :  { %4124 = vrcp.f32 %v2091_v1 }
0x1277   :  { %v2322_v13 = vpop.permute.xlu1 %2321 }
0x1278   :  { %v2106_v3 = vpop.xlane.xlu0 %2105  ;;  %3893 = vmatprep.subr.msk.bf16.mxu1 %vm525_vm3, %v2322_v13  ;;  %v2333_v18 = vsel %vm525_vm3, %v2322_v13, 0 }
0x1279   :  { %4126 = vrcp.f32 %v2106_v3 }
0x127c   :  { %v2100_v10 = vpop.xlane.xlu0 %2099 }
0x127d   :  { %v4121_v5 = vpop.eup %4120  ;;  %4128 = vrcp.f32 %v2100_v10 }
0x127e   :  { %v4123_v15 = vpop.eup %4122  ;;  %v2115_v16 = vmul.f32 %v4121_v5, %v4111_v42 }
0x127f   :  { %v2114_v49 = vmul.f32 %v4123_v15, %v4109_v24 }
0x1280   :  { %v2252_v12 = vpop.permute.xlu0 %2251  ;;  %v2120_v43 = vpack.c.bf16 %v2115_v16, %v2115_v16 }
0x1281   :  { %v4125_v9 = vpop.eup %4124  ;;  %v2262_v45 = vsel %vm525_vm3, %v2252_v12, 0 }
0x1282   :  { %v2113_v27 = vmul.f32 %v4125_v9, %v4113_v53 }
0x1284   :  { %v2119_v50 = vpack.c.bf16 %v2114_v49, %v2113_v27  ;;  %v2248_v4 = vpop.permute.xlu0 %2247 }
0x1286   :  { %3755 = vmatprep.mubr.msk.bf16.mxu0 %vm666_vm5, %v2119_v50  ;;  %v4127_v20 = vpop.eup %4126 }
0x1287   :  { %3756 = vmatmul.mubr.msk.bf16.vlgmr.msra.gmra.mxu0 %vm666_vm5, %v2120_v43  ;;  %v2118_v41 = vmul.f32 %v4127_v20, %v4115_v55 }
0x1288   :  { %3768 = vmatpush3.bf16.xpose.msra.mxu0 %v2265_v14  ;;  %3771 = vmatprep.mubr.msk.bf16.mxu0 %vm525_vm3, %v2248_v4  ;;  %v2320_v51 = vpop.permute.xlu0 %2319 }
0x1289   :  { %3892 = vmatprep.subr.msk.bf16.mxu0 %vm525_vm3, %v2252_v12  ;;  %v2122_v32 = vpack.c.bf16 %v2118_v41, %v2118_v41  ;;  %v2330_v22 = vsel %vm525_vm3, %v2320_v51, 0 }
0x128a   :  { %v4129_v19 = vpop.eup %4128 }
0x128b   :  { %v2116_v26 = vmul.f32 %v4129_v19, %v4117_v54 }
0x128c   :  { %v2318_v56 = vpop.permute.xlu0 %2317 }
0x1290   :  { %3770 = vmatpush3.bf16.xpose.msra.mxu0 %v2262_v45 }
0x12a8   :  { %v2103_v11 = vpop.xlane.xlu1 %2102 }
0x12a9   :  { %4130 = vrcp.f32 %v2103_v11 }
0x12ac   :  { %v2250_v8 = vpop.permute.xlu1 %2249 }
0x12ad   :  { %3772 = vmatmul.mubr.msk.bf16.vlgmr.msra.gmra.mxu0 %vm525_vm3, %v2250_v8 }
0x12b0   :  { %v2316_v34 = vpop.permute.xlu1 %2315 }
0x12b6   :  { %v4131_v23 = vpop.eup %4130 }
0x12b7   :  { %v2117_v28 = vmul.f32 %v4131_v23, %v4119_v6 }
0x12b9   :  { %v2121_v46 = vpack.c.bf16 %v2117_v28, %v2116_v26 }
0x12bb   :  { %3763 = vmatprep.mubr.msk.bf16.mxu1 %vm666_vm5, %v2121_v46 }
0x12bc   :  { %3764 = vmatmul.mubr.msk.bf16.vlgmr.msra.gmra.mxu1 %vm666_vm5, %v2122_v32 }
0x12bd   :  { %3776 = vmatpush3.bf16.xpose.msra.mxu1 %v2333_v18  ;;  %3779 = vmatprep.mubr.msk.bf16.mxu1 %vm525_vm3, %v2316_v34 }
0x12be   :  { %3894 = vmatprep.subr.msk.bf16.mxu1 %vm525_vm3, %v2320_v51 }
0x12c5   :  { %3778 = vmatpush3.bf16.xpose.msra.mxu1 %v2330_v22 }
0x12cc   :  { %3780 = vmatmul.mubr.msk.bf16.vlgmr.msra.gmra.mxu1 %vm525_vm3, %v2318_v56 }
0x1347   :  { %v4895_v39 = vpop.f32.mrf.mxu0 }
0x1349   :  { %v4897_v44 = vpop.f32.mrf.mxu0 }
0x134b   :  { %v3758_v24 = vpop.f32.mrf.mxu0 }
0x134d   :  { %v4899_v47 = vpop.f32.mrf.mxu0 }
0x136d   :  { %v3773_v42 = vpop.f32.mrf.mxu0 }
0x136e   :  { %v2385_v61 = vmul.f32 0.25, %v3773_v42 }
0x136f   :  { %v2301_v52 = vpop.f32.mrf.mxu0 }
0x1370   :  { %v2383_v53 = vmul.f32 0.25, %v2301_v52  ;;  %v2391_v2 = vsel %vm324_vm4, %v2385_v61, -1e+30 }
0x1371   :  { %v3774_v33 = vpop.f32.mrf.mxu0  ;;  %v2401_v6 = vsel %vm666_vm5, %v2391_v2, -inf }
0x1372   :  { %v2389_v55 = vsel %vm324_vm4, %v2383_v53, -1e+30 }
0x1373   :  { %v2304_v60 = vpop.f32.mrf.mxu0  ;;  %v2395_v54 = vsel %vm666_vm5, %v2389_v55, -inf }
0x1374   :  { %v2384_v62 = vmul.f32 0.25, %v2304_v60  ;;  %2396 = vmax.xlane.f32.xlu1 %v2395_v54 }
0x1376   :  { %v2390_v63 = vsel %vm324_vm4, %v2384_v62, -1e+30 }
0x1377   :  { %v2398_v0 = vsel %vm666_vm5, %v2390_v63, -inf }
0x1378   :  { %2399 = vmax.xlane.f32.xlu0 %v2398_v0 }
0x137c   :  { %v4910_v38 = vpop.f32.mrf.mxu1  ;;  %2402 = vmax.xlane.f32.xlu0 %v2401_v6 }
0x137e   :  { %v4912_v58 = vpop.f32.mrf.mxu1 }
0x1380   :  { %v3766_v7 = vpop.f32.mrf.mxu1 }
0x1382   :  { %v4914_v1 = vpop.f32.mrf.mxu1 }
0x138c   :  { %v3781_v13 = vpop.f32.mrf.mxu1 }
0x138d   :  { %v2388_v10 = vmul.f32 0.25, %v3781_v13 }
0x138e   :  { %v2369_v3 = vpop.f32.mrf.mxu1 }
0x138f   :  { %v2386_v5 = vmul.f32 0.25, %v2369_v3  ;;  %v2394_v27 = vsel %vm324_vm4, %v2388_v10, -1e+30 }
0x1390   :  { %v3782_v15 = vpop.f32.mrf.mxu1  ;;  %v2410_v43 = vsel %vm666_vm5, %v2394_v27, -inf }
0x1391   :  { %v2392_v9 = vsel %vm324_vm4, %v2386_v5, -1e+30 }
0x1392   :  { %v2372_v12 = vpop.f32.mrf.mxu1  ;;  %v2404_v16 = vsel %vm666_vm5, %v2392_v9, -inf }
0x1393   :  { %v2387_v49 = vmul.f32 0.25, %v2372_v12  ;;  %2405 = vmax.xlane.f32.xlu0 %v2404_v16 }
0x1395   :  { %v2393_v50 = vsel %vm324_vm4, %v2387_v49, -1e+30 }
0x1396   :  { %v2407_v14 = vsel %vm666_vm5, %v2393_v50, -inf }
0x1397   :  { %2411 = vmax.xlane.f32.xlu0 %v2410_v43  ;;  %2408 = vmax.xlane.f32.xlu1 %v2407_v14 }
0x13a8   :  { %2467 = vrot.lane.b32.xlu1 %v4797_v36, %s4201_s17 }
0x13fd   :  { %v2397_v4 = vpop.xlane.xlu1 %2396 }
0x13fe   :  { %v2413_v8 = vsub.f32 %v2389_v55, %v2397_v4 }
0x1400   :  { %v2419_v41 = vmul.f32 1.442695, %v2413_v8 }
0x1401   :  { %v2400_v45 = vpop.xlane.xlu0 %2399 }
0x1402   :  { %v2414_v11 = vsub.f32 %v2390_v63, %v2400_v45 }
0x1404   :  { %v2421_v20 = vmul.f32 1.442695, %v2414_v11 }
0x1405   :  { %v2403_v19 = vpop.xlane.xlu0 %2402 }
0x1406   :  { %4132 = vpow2.f32 %v2421_v20  ;;  %v2415_v23 = vsub.f32 %v2391_v2, %v2403_v19 }
0x1408   :  { %v2423_v59 = vmul.f32 1.442695, %v2415_v23 }
0x140a   :  { %4134 = vpow2.f32 %v2423_v59  ;;  %v3973_v59 = vld [vmem:[%s5148_s1 + $0xe8] sm:$0xff]  }
0x140b   :  { %4136 = vpow2.f32 %v2419_v41 }
0x1413   :  { %v4133_v26 = vpop.eup %4132 }
0x1414   :  { %v2434_v28 = vsel %vm666_vm5, %v4133_v26, 0.0 }
0x1415   :  { %2435 = vadd.xlane.f32.xlu0 %v2434_v28 }
0x1417   :  { %v4135_v46 = vpop.eup %4134 }
0x1418   :  { %v2437_v32 = vsel %vm666_vm5, %v4135_v46, 0.0  ;;  %v4137_v36 = vpop.eup %4136 }
0x1419   :  { %2438 = vadd.xlane.f32.xlu1 %v2437_v32  ;;  %v2431_v34 = vsel %vm666_vm5, %v4137_v36, 0.0 }
0x141c   :  { %v2406_v18 = vpop.xlane.xlu0 %2405 }
0x141d   :  { %2432 = vadd.xlane.f32.xlu1 %v2431_v34  ;;  %v2416_v51 = vsub.f32 %v2392_v9, %v2406_v18 }
0x141f   :  { %v2425_v42 = vmul.f32 1.442695, %v2416_v51 }
0x1420   :  { %v2412_v22 = vpop.xlane.xlu0 %2411  ;;  %v2409_v56 = vpop.xlane.xlu1 %2408 }
0x1421   :  { %v2418_v24 = vsub.f32 %v2394_v27, %v2412_v22  ;;  %v2417_v62 = vsub.f32 %v2393_v50, %v2409_v56 }
0x1423   :  { %v2429_v52 = vmul.f32 1.442695, %v2418_v24  ;;  %v2427_v63 = vmul.f32 1.442695, %v2417_v62 }
0x1424   :  { %v2468_v53 = vpop.permute.xlu1 %2467 }
0x1425   :  { %4138 = vpow2.f32 %v2429_v52  ;;  %v2477_v33 = vsel %vm748_vm6, %v2468_v53, 0  ;;  %3895 = vmatprep.subr.msk.bf16.mxu0 %vm748_vm6, %v2468_v53 }
0x1426   :  { %3784 = vmatpush3.bf16.msra.mxu0 %v2477_v33  ;;  %4140 = vpow2.f32 %v2425_v42 }
0x1427   :  { %4142 = vpow2.f32 %v2427_v63 }
0x142e   :  { %2529 = vrot.lane.b32.xlu1 %v4805_v37, %s4201_s17 }
0x1432   :  { %v4139_v55 = vpop.eup %4138 }
0x1433   :  { %v2446_v60 = vsel %vm666_vm5, %v4139_v55, 0.0  ;;  %v4141_v54 = vpop.eup %4140 }
0x1434   :  { %2447 = vadd.xlane.f32.xlu0 %v2446_v60  ;;  %v2440_v61 = vsel %vm666_vm5, %v4141_v54, 0.0  ;;  %v4143_v0 = vpop.eup %4142 }
0x1435   :  { %v2443_v2 = vsel %vm666_vm5, %v4143_v0, 0.0 }
0x1438   :  { %2441 = vadd.xlane.f32.xlu0 %v2440_v61 }
0x144e   :  { %2465 = vrot.lane.b32.xlu0 %v4791_v17, %s4201_s17 }
0x1452   :  { %2444 = vadd.xlane.f32.xlu1 %v2443_v2 }
0x1463   :  { %2527 = vrot.lane.b32.xlu1 %v4801_v31, %s4201_s17 }
0x149e   :  { %v2436_v37 = vpop.xlane.xlu0 %2435 }
0x149f   :  { %4144 = vrcp.f32 %v2436_v37 }
0x14a2   :  { %v2439_v6 = vpop.xlane.xlu1 %2438 }
0x14a6   :  { %v2433_v7 = vpop.xlane.xlu1 %2432 }
0x14a7   :  { %4146 = vrcp.f32 %v2433_v7 }
0x14a8   :  { %4148 = vrcp.f32 %v2439_v6 }
0x14aa   :  { %v2530_v13 = vpop.permute.xlu1 %2529 }
0x14ab   :  { %v2539_v3 = vsel %vm748_vm6, %v2530_v13, 0  ;;  %3896 = vmatprep.subr.msk.bf16.mxu1 %vm748_vm6, %v2530_v13 }
0x14ac   :  { %3792 = vmatpush3.bf16.msra.mxu1 %v2539_v3  ;;  %v4145_v10 = vpop.eup %4144 }
0x14ad   :  { %v2456_v15 = vmul.f32 %v4145_v10, %v4133_v26  ;;  %v3974_v26 = vld [vmem:[%s5148_s1 + $0xe0] sm:$0xff]  }
0x14b4   :  { %v4147_v5 = vpop.eup %4146 }
0x14b5   :  { %v2455_v17 = vmul.f32 %v4147_v5, %v4137_v36  ;;  %v4149_v12 = vpop.eup %4148 }
0x14b6   :  { %v2457_v27 = vmul.f32 %v4149_v12, %v4135_v46 }
0x14b7   :  { %v2461_v9 = vpack.c.bf16 %v2456_v15, %v2455_v17 }
0x14b8   :  { %v2462_v50 = vpack.c.bf16 %v2457_v27, %v2457_v27 }
0x14b9   :  { %3787 = vmatprep.mubr.msk.bf16.mxu0 %vm666_vm5, %v2461_v9 }
0x14bd   :  { %v2448_v31 = vpop.xlane.xlu0 %2447 }
0x14be   :  { %4150 = vrcp.f32 %v2448_v31 }
0x14c1   :  { %v2442_v16 = vpop.xlane.xlu0 %2441 }
0x14c2   :  { %4152 = vrcp.f32 %v2442_v16 }
0x14c5   :  { %v2466_v49 = vpop.permute.xlu0 %2465 }
0x14c6   :  { %3785 = vmatprep.subr.bf16.mxu0 %v2466_v49 }
0x14c7   :  { %3786 = vmatpush3.bf16.msra.mxu0 %v2466_v49 }
0x14c8   :  { %3799 = vmatprep.subr.bf16.mxu0 %v4195_v29 }
0x14ca   :  { %3788 = vmatmul.mubr.msk.bf16.vlgmr.msra.gmra.mxu0 %vm666_vm5, %v2462_v50 }
0x14cb   :  { %3803 = vmatprep.mubr.msk.bf16.mxu0 %vm4196_vm2, %v4195_v29  ;;  %v4151_v4 = vpop.eup %4150  ;;  %3800 = vmatpush3.bf16.msra.mxu0 %v3973_v59 }
0x14cc   :  { %v2460_v8 = vmul.f32 %v4151_v4, %v4139_v55  ;;  %3801 = vmatprep.subr.bf16.mxu0 %v4195_v29 }
0x14ce   :  { %v2464_v41 = vpack.c.bf16 %v2460_v8, %v2460_v8 }
0x14cf   :  { %v4153_v45 = vpop.eup %4152  ;;  %3802 = vmatpush3.bf16.msra.mxu0 %v3974_v26 }
0x14d0   :  { %v2458_v20 = vmul.f32 %v4153_v45, %v4141_v54  ;;  %3831 = vmatprep.subr.bf16.mxu0 %v4195_v29 }
0x14db   :  { %v2445_v43 = vpop.xlane.xlu1 %2444 }
0x14dc   :  { %4154 = vrcp.f32 %v2445_v43 }
0x14df   :  { %v2528_v14 = vpop.permute.xlu1 %2527 }
0x14e0   :  { %3793 = vmatprep.subr.bf16.mxu1 %v2528_v14 }
0x14e1   :  { %3794 = vmatpush3.bf16.msra.mxu1 %v2528_v14 }
0x14e2   :  { %3815 = vmatprep.subr.bf16.mxu1 %v4195_v29 }
0x14e9   :  { %v4155_v11 = vpop.eup %4154 }
0x14ea   :  { %v2459_v19 = vmul.f32 %v4155_v11, %v4143_v0 }
0x14ec   :  { %v2463_v23 = vpack.c.bf16 %v2459_v19, %v2458_v20 }
0x14ee   :  { %3795 = vmatprep.mubr.msk.bf16.mxu1 %vm666_vm5, %v2463_v23 }
0x14ef   :  { %3796 = vmatmul.mubr.msk.bf16.vlgmr.msra.gmra.mxu1 %vm666_vm5, %v2464_v41 }
0x14f0   :  { %3819 = vmatprep.mubr.msk.bf16.mxu1 %vm4196_vm2, %v4195_v29 }
0x158a   :  { %v3789_v28 = vpop.f32.mrf.mxu0 }
0x158c   :  { %v2513_v46 = vpop.f32.mrf.mxu0 }
0x158e   :  { %v3790_v32 = vpop.f32.mrf.mxu0 }
0x1590   :  { %v2516_v36 = vpop.f32.mrf.mxu0 }
0x1591   :  { %v3921_v18 = vpack.i.bf16 %v2516_v36, %v2513_v46 }
0x1593   :  { %3922 = vrot.lane.b32.xlu1 %v3921_v18, %s4202_s22 }
0x15af   :  { %v3797_v34 = vpop.f32.mrf.mxu1 }
0x15b1   :  { %v2575_v51 = vpop.f32.mrf.mxu1 }
0x15b2   :  { %v3926_v22 = vpack.i.bf16 %v2575_v51, %v3789_v28 }
0x15b3   :  { %v3798_v56 = vpop.f32.mrf.mxu1 }
0x15b4   :  { %3927 = vrot.lane.b32.xlu0 %v3926_v22, %s4202_s22 }
0x15b5   :  { %v2578_v24 = vpop.f32.mrf.mxu1 }
0x15b6   :  { %v3931_v42 = vpack.i.bf16 %v3797_v34, %v2578_v24 }
0x15b8   :  { %3932 = vrot.lane.b32.xlu1 %v3931_v42, %s4202_s22 }
0x1605   :  { %v3923_v52 = vpop.permute.xlu1 %3922 }
0x1606   :  { %v3925_v53 = vunpack.i.h.bf16 %v3923_v52  ;;  %v3924_v33 = vunpack.i.l.bf16 %v3923_v52 }
0x1608   :  { %v2614_v55 = vsel %vm525_vm3, %v4899_v47, %v3925_v53  ;;  %v2613_v60 = vsel %vm525_vm3, %v4897_v44, %v3924_v33 }
0x1609   :  { %v2623_v54 = vpack.c.bf16 %v2614_v55, %v2613_v60 }
0x160b   :  { %3804 = vmatmul.mubr.msk.bf16.vlgmr.msra.gmra.mxu0 %vm222_vm1, %v2623_v54  ;;  %v3975_v54 = vld [vmem:[%s5148_s1 + $0xf8] sm:$0xff]  }
0x160c   :  { %3807 = vmatprep.mubr.msk.bf16.mxu0 %vm4196_vm2, %v4195_v29  ;;  %3816 = vmatpush3.bf16.msra.mxu1 %v3975_v54 }
0x160d   :  { %3817 = vmatprep.subr.bf16.mxu1 %v4195_v29 }
0x1626   :  { %v3928_v61 = vpop.permute.xlu0 %3927 }
0x1627   :  { %v3930_v62 = vunpack.i.h.bf16 %v3928_v61  ;;  %v3929_v63 = vunpack.i.l.bf16 %v3928_v61 }
0x1629   :  { %v2616_v0 = vsel %vm525_vm3, %v4912_v58, %v3930_v62  ;;  %v2615_v2 = vsel %vm525_vm3, %v4895_v39, %v3929_v63  ;;  %v3425_v58 = vld [vmem:[%s5150_s2 + $0x25] ss:$0 sm:$0xff] }
0x162a   :  { %v2624_v37 = vpack.c.bf16 %v2616_v0, %v2615_v2  ;;  %v3933_v47 = vpop.permute.xlu1 %3932  ;;  %v3976_v0 = vld [vmem:[%s5148_s1 + $0xf0] sm:$0xff]  }
0x162b   :  { %v3935_v6 = vunpack.i.h.bf16 %v3933_v47  ;;  %v3934_v7 = vunpack.i.l.bf16 %v3933_v47  ;;  %3818 = vmatpush3.bf16.msra.mxu1 %v3976_v0 }
0x162c   :  { %3808 = vmatmul.mubr.msk.bf16.gmra.mxu0 %vm222_vm1, %v2624_v37  ;;  %3859 = vmatprep.subr.bf16.mxu1 %v4195_v29 }
0x162d   :  { %3811 = vmatprep.mubr.msk.bf16.mxu0 %vm4196_vm2, %v4195_v29  ;;  %v2618_v44 = vsel %vm525_vm3, %v4910_v38, %v3935_v6  ;;  %v2617_v13 = vsel %vm525_vm3, %v4914_v1, %v3934_v7 }
0x162e   :  { %v2625_v3 = vpack.c.bf16 %v2618_v44, %v2617_v13 }
0x1634   :  { %3812 = vmatmul.mubr.msk.bf16.gmra.mxu0 %vm222_vm1, %v2625_v3 }
0x1635   :  { %3847 = vmatprep.mubr.msk.bf16.mxu0 %vm4196_vm2, %v4195_v29 }
0x16cb   :  { %v2681_v39 = vpop.f32.mrf.mxu0 }
0x16cc   :  { %v2704_v10 = vadd.f32 %v2681_v39, %v4722_v21 }
0x16cd   :  { %v3805_v5 = vpop.f32.mrf.mxu0 }
0x16ce   :  { %v4989_v17 = vadd.f32 %v3425_v58, %v2704_v10 }
0x16cf   :  { %v2684_v38 = vpop.f32.mrf.mxu0 }
0x16d0   :  { %v2705_v15 = vadd.f32 %v2684_v38, %v4727_v25  ;;  %v2723_v1 = vsel %vm222_vm1, %v4989_v17, 0.0 }
0x16d1   :  { %2724 = vadd.xlane.f32.xlu0 %v2723_v1  ;;  %v3806_v9 = vpop.f32.mrf.mxu0 }
0x16d2   :  { %v4994_v31 = vadd.f32 %v3425_v58, %v2705_v15 }
0x16d4   :  { %v2726_v12 = vsel %vm222_vm1, %v4994_v31, 0.0 }
0x16d5   :  { %2727 = vadd.xlane.f32.xlu1 %v2726_v12 }
0x16ec   :  { %v2689_v16 = vpop.f32.mrf.mxu0 }
0x16ed   :  { %v2706_v21 = vadd.f32 %v2689_v16, %v4732_v30  ;;  %v3426_v16 = vld [vmem:[%s5150_s2 + $0x26] ss:$0 sm:$0xff] }
0x16ee   :  { %v3809_v27 = vpop.f32.mrf.mxu0 }
0x16ef   :  { %v4999_v49 = vadd.f32 %v3425_v58, %v2706_v21 }
0x16f0   :  { %v2692_v50 = vpop.f32.mrf.mxu0 }
0x16f1   :  { %v2707_v25 = vadd.f32 %v2692_v50, %v4737_v35  ;;  %v2729_v43 = vsel %vm222_vm1, %v4999_v49, 0.0 }
0x16f2   :  { %2730 = vadd.xlane.f32.xlu0 %v2729_v43  ;;  %v3810_v14 = vpop.f32.mrf.mxu0 }
0x16f3   :  { %v5004_v4 = vadd.f32 %v3425_v58, %v2707_v25  ;;  %v3427_v25 = vld [vmem:[%s5150_s2 + $0x27] ss:$0 sm:$0xff] }
0x16f4   :  { %v2697_v45 = vpop.f32.mrf.mxu0 }
0x16f5   :  { %v2708_v11 = vadd.f32 %v2697_v45, %v4742_v40  ;;  %v2732_v8 = vsel %vm222_vm1, %v5004_v4, 0.0 }
0x16f6   :  { %2733 = vadd.xlane.f32.xlu0 %v2732_v8  ;;  %v3813_v30 = vpop.f32.mrf.mxu0 }
0x16f7   :  { %v5009_v20 = vadd.f32 %v3425_v58, %v2708_v11 }
0x16f8   :  { %v2700_v19 = vpop.f32.mrf.mxu0 }
0x16f9   :  { %v2709_v35 = vadd.f32 %v2700_v19, %v4747_v48  ;;  %v2735_v23 = vsel %vm222_vm1, %v5009_v20, 0.0 }
0x16fa   :  { %2736 = vadd.xlane.f32.xlu0 %v2735_v23  ;;  %v3814_v41 = vpop.f32.mrf.mxu0 }
0x16fb   :  { %v5014_v59 = vadd.f32 %v3425_v58, %v2709_v35 }
0x16fd   :  { %v2738_v40 = vsel %vm222_vm1, %v5014_v59, 0.0 }
0x16fe   :  { %2739 = vadd.xlane.f32.xlu1 %v2738_v40 }
0x175a   :  { %v2725_v26 = vpop.xlane.xlu0 %2724 }
0x175b   :  { %v2741_v28 = vmul.f32 0.03125, %v2725_v26 }
0x175d   :  { %v2747_v46 = vsub.f32 %v4989_v17, %v2741_v28 }
0x175e   :  { %v2728_v32 = vpop.xlane.xlu1 %2727 }
0x175f   :  { %v2742_v36 = vmul.f32 0.03125, %v2728_v32  ;;  %v2753_v18 = vmul.f32 %v2747_v46, %v2747_v46 }
0x1761   :  { %v2748_v48 = vsub.f32 %v4994_v31, %v2742_v36  ;;  %v2759_v34 = vsel %vm222_vm1, %v2753_v18, 0.0 }
0x1762   :  { %2760 = vadd.xlane.f32.xlu0 %v2759_v34 }
0x1763   :  { %v2754_v51 = vmul.f32 %v2748_v48, %v2748_v48 }
0x1765   :  { %v2762_v22 = vsel %vm222_vm1, %v2754_v51, 0.0 }
0x1766   :  { %2763 = vadd.xlane.f32.xlu1 %v2762_v22 }
0x177b   :  { %v2731_v56 = vpop.xlane.xlu0 %2730 }
0x177c   :  { %v2743_v24 = vmul.f32 0.03125, %v2731_v56 }
0x177e   :  { %v5023_v42 = vsub.f32 %v4999_v49, %v2743_v24 }
0x177f   :  { %v2734_v52 = vpop.xlane.xlu0 %2733 }
0x1780   :  { %v2744_v53 = vmul.f32 0.03125, %v2734_v52  ;;  %v2755_v33 = vmul.f32 %v5023_v42, %v5023_v42 }
0x1782   :  { %v5028_v55 = vsub.f32 %v5004_v4, %v2744_v53  ;;  %v2765_v60 = vsel %vm222_vm1, %v2755_v33, 0.0 }
0x1783   :  { %2766 = vadd.xlane.f32.xlu0 %v2765_v60  ;;  %v2737_v61 = vpop.xlane.xlu0 %2736 }
0x1784   :  { %v2745_v62 = vmul.f32 0.03125, %v2737_v61  ;;  %v2756_v63 = vmul.f32 %v5028_v55, %v5028_v55 }
0x1786   :  { %v2751_v2 = vsub.f32 %v5009_v20, %v2745_v62  ;;  %v2768_v37 = vsel %vm222_vm1, %v2756_v63, 0.0 }
0x1787   :  { %2769 = vadd.xlane.f32.xlu1 %v2768_v37  ;;  %v2740_v47 = vpop.xlane.xlu1 %2739 }
0x1788   :  { %v2746_v6 = vmul.f32 0.03125, %v2740_v47  ;;  %v2757_v7 = vmul.f32 %v2751_v2, %v2751_v2  ;;  %v3979_v47 = vld [vmem:[%s5148_s1 + $0x128] sm:$0xff]  }
0x178a   :  { %v2752_v44 = vsub.f32 %v5014_v59, %v2746_v6  ;;  %v2771_v13 = vsel %vm222_vm1, %v2757_v7, 0.0  ;;  %v3980_v6 = vld [vmem:[%s5148_s1 + $0x120] sm:$0xff]   ;;  %v3981_v7 = vld [vmem:[%s5148_s1 + $0x118] sm:$0xff]  }
0x178b   :  { %2772 = vadd.xlane.f32.xlu0 %v2771_v13  ;;  %v3983_v13 = vld [vmem:[%s5148_s1 + $0x108] sm:$0xff]  }
0x178c   :  { %v2758_v3 = vmul.f32 %v2752_v44, %v2752_v44 }
0x178e   :  { %v2774_v39 = vsel %vm222_vm1, %v2758_v3, 0.0  ;;  %v3984_v3 = vld [vmem:[%s5148_s1 + $0x100] sm:$0xff]  }
0x178f   :  { %2775 = vadd.xlane.f32.xlu1 %v2774_v39  ;;  %v3428_v39 = vld [vmem:[%s5150_s2 + $0x28] ss:$0 sm:$0xff] }
0x17eb   :  { %v2761_v58 = vpop.xlane.xlu0 %2760 }
0x17ec   :  { %v2777_v10 = vmul.f32 0.03125, %v2761_v58 }
0x17ee   :  { %v2783_v5 = vadd.f32 1e-05, %v2777_v10 }
0x17ef   :  { %v2764_v38 = vpop.xlane.xlu1 %2763 }
0x17f0   :  { %4156 = vrsqrt.f32 %v2783_v5  ;;  %v2778_v15 = vmul.f32 0.03125, %v2764_v38 }
0x17f2   :  { %v2784_v1 = vadd.f32 1e-05, %v2778_v15 }
0x17f4   :  { %4158 = vrsqrt.f32 %v2784_v1 }
0x17fd   :  { %v4157_v9 = vpop.eup %4156 }
0x17fe   :  { %v2795_v12 = vmul.f32 %v4157_v9, %v2747_v46 }
0x1800   :  { %v2805_v50 = vmul.f32 %v3426_v16, %v2795_v12 }
0x1801   :  { %v4159_v21 = vpop.eup %4158 }
0x1802   :  { %v2796_v27 = vmul.f32 %v4159_v21, %v2748_v48  ;;  %v2815_v14 = vadd.f32 %v3427_v25, %v2805_v50 }
0x1804   :  { %v2806_v43 = vmul.f32 %v3426_v16, %v2796_v27 }
0x1806   :  { %v2816_v45 = vadd.f32 %v3427_v25, %v2806_v43 }
0x1808   :  { %v2825_v11 = vpack.c.bf16 %v2816_v45, %v2815_v14 }
0x180a   :  { %3820 = vmatmul.mubr.msk.bf16.vlgmr.msra.gmra.mxu1 %vm222_vm1, %v2825_v11 }
0x180b   :  { %3823 = vmatprep.mubr.msk.bf16.mxu1 %vm4196_vm2, %v4195_v29 }
0x180c   :  { %v2767_v8 = vpop.xlane.xlu0 %2766 }
0x180d   :  { %v2779_v30 = vmul.f32 0.03125, %v2767_v8 }
0x180f   :  { %v2785_v19 = vadd.f32 1e-05, %v2779_v30 }
0x1810   :  { %v2770_v35 = vpop.xlane.xlu1 %2769 }
0x1811   :  { %4160 = vrsqrt.f32 %v2785_v19  ;;  %v2780_v23 = vmul.f32 0.03125, %v2770_v35 }
0x1813   :  { %v2786_v41 = vadd.f32 1e-05, %v2780_v23 }
0x1814   :  { %v2773_v40 = vpop.xlane.xlu0 %2772 }
0x1815   :  { %4162 = vrsqrt.f32 %v2786_v41  ;;  %v2781_v26 = vmul.f32 0.03125, %v2773_v40 }
0x1817   :  { %v2787_v28 = vadd.f32 1e-05, %v2781_v26 }
0x1818   :  { %v2776_v46 = vpop.xlane.xlu1 %2775 }
0x1819   :  { %4164 = vrsqrt.f32 %v2787_v28  ;;  %v2782_v32 = vmul.f32 0.03125, %v2776_v46 }
0x181b   :  { %v2788_v36 = vadd.f32 1e-05, %v2782_v32 }
0x181d   :  { %4166 = vrsqrt.f32 %v2788_v36 }
0x181e   :  { %v4161_v18 = vpop.eup %4160 }
0x181f   :  { %v2797_v48 = vmul.f32 %v4161_v18, %v5023_v42 }
0x1821   :  { %v2807_v22 = vmul.f32 %v3426_v16, %v2797_v48 }
0x1822   :  { %v4163_v34 = vpop.eup %4162 }
0x1823   :  { %v2798_v51 = vmul.f32 %v4163_v34, %v5028_v55  ;;  %v2817_v52 = vadd.f32 %v3427_v25, %v2807_v22  ;;  %v3977_v55 = vld [vmem:[%s5148_s1 + $0x138] sm:$0xff]  }
0x1824   :  { %3832 = vmatpush3.bf16.msra.mxu0 %v3977_v55 }
0x1825   :  { %v2808_v56 = vmul.f32 %v3426_v16, %v2798_v51  ;;  %3833 = vmatprep.subr.bf16.mxu0 %v4195_v29 }
0x1826   :  { %v4165_v24 = vpop.eup %4164 }
0x1827   :  { %v2818_v53 = vadd.f32 %v3427_v25, %v2808_v56  ;;  %v2799_v33 = vmul.f32 %v4165_v24, %v2751_v2  ;;  %v3978_v2 = vld [vmem:[%s5148_s1 + $0x130] sm:$0xff]  }
0x1828   :  { %3834 = vmatpush3.bf16.msra.mxu0 %v3978_v2 }
0x1829   :  { %v2826_v60 = vpack.c.bf16 %v2818_v53, %v2817_v52  ;;  %v2809_v62 = vmul.f32 %v3426_v16, %v2799_v33  ;;  %3835 = vmatprep.subr.bf16.mxu0 %v4195_v29 }
0x182a   :  { %v4167_v54 = vpop.eup %4166 }
0x182b   :  { %3824 = vmatmul.mubr.msk.bf16.gmra.mxu1 %vm222_vm1, %v2826_v60  ;;  %v2800_v61 = vmul.f32 %v4167_v54, %v2752_v44  ;;  %v2819_v42 = vadd.f32 %v3427_v25, %v2809_v62  ;;  %v3982_v44 = vld [vmem:[%s5148_s1 + $0x110] sm:$0xff]  }
0x182c   :  { %3827 = vmatprep.mubr.msk.bf16.mxu1 %vm4196_vm2, %v4195_v29  ;;  %3836 = vmatpush3.bf16.msra.mxu0 %v3979_v47 }
0x182d   :  { %v2810_v63 = vmul.f32 %v3426_v16, %v2800_v61  ;;  %3837 = vmatprep.subr.bf16.mxu0 %v4195_v29 }
0x182f   :  { %v2820_v0 = vadd.f32 %v3427_v25, %v2810_v63 }
0x1830   :  { %3838 = vmatpush3.bf16.msra.mxu0 %v3980_v6 }
0x1831   :  { %v2827_v37 = vpack.c.bf16 %v2820_v0, %v2819_v42  ;;  %3839 = vmatprep.subr.bf16.mxu0 %v4195_v29 }
0x1833   :  { %3828 = vmatmul.mubr.msk.bf16.gmra.mxu1 %vm222_vm1, %v2827_v37 }
0x1834   :  { %3863 = vmatprep.mubr.msk.bf16.mxu1 %vm4196_vm2, %v4195_v29  ;;  %3840 = vmatpush3.bf16.msra.mxu0 %v3981_v7 }
0x1835   :  { %3841 = vmatprep.subr.bf16.mxu0 %v4195_v29 }
0x1838   :  { %3842 = vmatpush3.bf16.msra.mxu0 %v3982_v44 }
0x1839   :  { %3843 = vmatprep.subr.bf16.mxu0 %v4195_v29 }
0x183c   :  { %3844 = vmatpush3.bf16.msra.mxu0 %v3983_v13 }
0x183d   :  { %3845 = vmatprep.subr.bf16.mxu0 %v4195_v29 }
0x1840   :  { %3846 = vmatpush3.bf16.msra.mxu0 %v3984_v3 }
0x18ca   :  { %v2888_v58 = vpop.f32.mrf.mxu1 }
0x18cb   :  { %v2889_v10 = vadd.f32 %v3428_v39, %v2888_v58 }
0x18cc   :  { %v3821_v5 = vpop.f32.mrf.mxu1 }
0x18cd   :  { %v3434_v38 = vmul.f32 -1.702, %v2889_v10 }
0x18ce   :  { %v2891_v15 = vpop.f32.mrf.mxu1 }
0x18cf   :  { %v2923_v1 = vmul.f32 1.442695, %v3434_v38  ;;  %v2892_v9 = vadd.f32 %v3428_v39, %v2891_v15 }
0x18d0   :  { %v3822_v12 = vpop.f32.mrf.mxu1 }
0x18d1   :  { %4168 = vpow2.f32 %v2923_v1  ;;  %v3435_v16 = vmul.f32 -1.702, %v2892_v9  ;;  %v3101_v1 = vshrl.u32 %v322_v57, 7 }
0x18d3   :  { %v2925_v21 = vmul.f32 1.442695, %v3435_v16  ;;  %v3448_v16 = vld [vmem:[%s5150_s2 + $0x29] ss:$0 sm:$0xff]  ;;  %vm3104_vm7 = vcmp.eq.s32.totalorder %v3101_v1, 0 }
0x18d4   :  { %v3985_v1 = vld [vmem:[%s5148_s1 + $0x148] sm:$0xff]  }
0x18d5   :  { %4170 = vpow2.f32 %v2925_v21  ;;  %3860 = vmatpush3.bf16.msra.mxu1 %v3985_v1 }
0x18d6   :  { %3861 = vmatprep.subr.bf16.mxu1 %v4195_v29 }
0x18de   :  { %v4169_v27 = vpop.eup %4168 }
0x18df   :  { %v2935_v50 = vadd.f32 1.0, %v4169_v27 }
0x18e1   :  { %4172 = vrcp.f32 %v2935_v50  ;;  %v3449_v50 = vsel %vm3104_vm7, 1.0, %v4195_v29 }
0x18e2   :  { %v4171_v25 = vpop.eup %4170 }
0x18e3   :  { %v2936_v43 = vadd.f32 1.0, %v4171_v25 }
0x18e5   :  { %4174 = vrcp.f32 %v2936_v43 }
0x18eb   :  { %v2896_v14 = vpop.f32.mrf.mxu1 }
0x18ec   :  { %v2897_v45 = vadd.f32 %v3428_v39, %v2896_v14 }
0x18ed   :  { %v3825_v11 = vpop.f32.mrf.mxu1 }
0x18ee   :  { %v3436_v8 = vmul.f32 -1.702, %v2897_v45  ;;  %v4173_v19 = vpop.eup %4172 }
0x18ef   :  { %v2899_v30 = vpop.f32.mrf.mxu1  ;;  %v2953_v28 = vmul.f32 %v4173_v19, %v2889_v10 }
0x18f0   :  { %v2927_v35 = vmul.f32 1.442695, %v3436_v8  ;;  %v2900_v23 = vadd.f32 %v3428_v39, %v2899_v30 }
0x18f1   :  { %v3826_v41 = vpop.f32.mrf.mxu1 }
0x18f2   :  { %v4175_v40 = vpop.eup %4174  ;;  %4176 = vpow2.f32 %v2927_v35  ;;  %v3437_v26 = vmul.f32 -1.702, %v2900_v23 }
0x18f3   :  { %v2954_v46 = vmul.f32 %v4175_v40, %v2892_v9  ;;  %v2904_v32 = vpop.f32.mrf.mxu1 }
0x18f4   :  { %v2929_v36 = vmul.f32 1.442695, %v3437_v26  ;;  %v2905_v18 = vadd.f32 %v3428_v39, %v2904_v32 }
0x18f5   :  { %v2975_v48 = vpack.c.bf16 %v2954_v46, %v2953_v28  ;;  %v3829_v34 = vpop.f32.mrf.mxu1 }
0x18f6   :  { %4178 = vpow2.f32 %v2929_v36  ;;  %v3438_v51 = vmul.f32 -1.702, %v2905_v18 }
0x18f7   :  { %3848 = vmatmul.mubr.bf16.vlgmr.msra.gmra.mxu0 %v2975_v48  ;;  %v2907_v22 = vpop.f32.mrf.mxu1 }
0x18f8   :  { %v2931_v56 = vmul.f32 1.442695, %v3438_v51  ;;  %v2908_v24 = vadd.f32 %v3428_v39, %v2907_v22  ;;  %3851 = vmatprep.mubr.msk.bf16.mxu0 %vm4196_vm2, %v4195_v29 }
0x18f9   :  { %v3830_v52 = vpop.f32.mrf.mxu1 }
0x18fa   :  { %4180 = vpow2.f32 %v2931_v56  ;;  %v3439_v53 = vmul.f32 -1.702, %v2908_v24 }
0x18fc   :  { %v2933_v33 = vmul.f32 1.442695, %v3439_v53 }
0x18fe   :  { %4182 = vpow2.f32 %v2933_v33 }
0x18ff   :  { %v4177_v60 = vpop.eup %4176 }
0x1900   :  { %v2937_v54 = vadd.f32 1.0, %v4177_v60 }
0x1902   :  { %4184 = vrcp.f32 %v2937_v54 }
0x1903   :  { %v4179_v61 = vpop.eup %4178 }
0x1904   :  { %v2938_v62 = vadd.f32 1.0, %v4179_v61 }
0x1906   :  { %4186 = vrcp.f32 %v2938_v62 }
0x1907   :  { %v4181_v63 = vpop.eup %4180 }
0x1908   :  { %v2939_v42 = vadd.f32 1.0, %v4181_v63 }
0x190a   :  { %4188 = vrcp.f32 %v2939_v42 }
0x190b   :  { %v4183_v0 = vpop.eup %4182 }
0x190c   :  { %v2940_v37 = vadd.f32 1.0, %v4183_v0 }
0x190e   :  { %4190 = vrcp.f32 %v2940_v37 }
0x190f   :  { %v4185_v55 = vpop.eup %4184 }
0x1910   :  { %v2955_v47 = vmul.f32 %v4185_v55, %v2897_v45 }
0x1913   :  { %v4187_v2 = vpop.eup %4186 }
0x1914   :  { %v2956_v6 = vmul.f32 %v4187_v2, %v2900_v23 }
0x1916   :  { %v2976_v7 = vpack.c.bf16 %v2956_v6, %v2955_v47 }
0x1917   :  { %v4189_v44 = vpop.eup %4188 }
0x1918   :  { %3852 = vmatmul.mubr.bf16.gmra.mxu0 %v2976_v7  ;;  %v2957_v3 = vmul.f32 %v4189_v44, %v2905_v18 }
0x1919   :  { %3855 = vmatprep.mubr.msk.bf16.mxu0 %vm4196_vm2, %v4195_v29 }
0x191b   :  { %v4191_v13 = vpop.eup %4190 }
0x191c   :  { %v2958_v39 = vmul.f32 %v4191_v13, %v2908_v24 }
0x191e   :  { %v2977_v58 = vpack.c.bf16 %v2958_v39, %v2957_v3 }
0x1920   :  { %3856 = vmatmul.mubr.bf16.gmra.mxu0 %v2977_v58 }
0x19b7   :  { %v3060_v10 = vpop.f32.mrf.mxu0 }
0x19b8   :  { %v3083_v12 = vadd.f32 %v3060_v10, %v4989_v17 }
0x19b9   :  { %v3849_v5 = vpop.f32.mrf.mxu0 }
0x19ba   :  { %v3094_v27 = vadd.f32 %v3448_v16, %v3083_v12 }
0x19bb   :  { %v3063_v38 = vpop.f32.mrf.mxu0 }
0x19bc   :  { %v3084_v9 = vadd.f32 %v3063_v38, %v4994_v31  ;;  %v3113_v14 = vmul.f32 %v3449_v50, %v3094_v27 }
0x19bd   :  { %v3850_v15 = vpop.f32.mrf.mxu0 }
0x19be   :  { %v3095_v21 = vadd.f32 %v3448_v16, %v3084_v9  ;;  %v3119_v17 = vsel %vm222_vm1, %v3113_v14, 0.0  ;;  %v3986_v9 = vld [vmem:[%s5148_s1 + $0x140] sm:$0xff]   ;;  %v3451_v14 = vld [vmem:[%s5150_s2 + $0x2b] ss:$0 sm:$0xff] }
0x19bf   :  { %3862 = vmatpush3.bf16.msra.mxu1 %v3986_v9 }
0x19c0   :  { %v3114_v25 = vmul.f32 0.0, %v3095_v21  ;;  %3867 = vmatprep.subr.bf16.mxu1 %v4195_v29 }
0x19c2   :  { %v3120_v57 = vsel %vm222_vm1, %v3114_v25, 0.0 }
0x19c3   :  { %v3121_v35 = vadd.f32 %v3120_v57, %v3119_v17 }
0x19d8   :  { %v3068_v43 = vpop.f32.mrf.mxu0 }
0x19d9   :  { %v3085_v45 = vadd.f32 %v3068_v43, %v4999_v49 }
0x19da   :  { %v3853_v11 = vpop.f32.mrf.mxu0 }
0x19db   :  { %v3096_v31 = vadd.f32 %v3448_v16, %v3085_v45 }
0x19dc   :  { %v3071_v8 = vpop.f32.mrf.mxu0 }
0x19dd   :  { %v3115_v30 = vmul.f32 0.0, %v3096_v31  ;;  %v3086_v19 = vadd.f32 %v3071_v8, %v5004_v4 }
0x19de   :  { %v3854_v23 = vpop.f32.mrf.mxu0 }
0x19df   :  { %v3122_v41 = vsel %vm222_vm1, %v3115_v30, 0.0  ;;  %v3097_v28 = vadd.f32 %v3448_v16, %v3086_v19 }
0x19e0   :  { %v3123_v40 = vadd.f32 %v3122_v41, %v3121_v35  ;;  %v3076_v26 = vpop.f32.mrf.mxu0 }
0x19e1   :  { %v3087_v46 = vadd.f32 %v3076_v26, %v5009_v20  ;;  %v3116_v48 = vmul.f32 %v3449_v50, %v3097_v28  ;;  %v3450_v50 = vld [vmem:[%s5150_s2 + $0x2a] ss:$0 sm:$0xff]  ;;  %v3987_v26 = vld [vmem:[%s5148_s1 + $0x150] sm:$0xff]  }
0x19e2   :  { %v3857_v49 = vpop.f32.mrf.mxu0  ;;  %v3124_v36 = vrot.slane %v3123_v40, 4 }
0x19e3   :  { %v3098_v32 = vadd.f32 %v3448_v16, %v3087_v46  ;;  %v3130_v52 = vsel %vm222_vm1, %v3116_v48, 0.0 }
0x19e4   :  { %v3079_v18 = vpop.f32.mrf.mxu0  ;;  %v3125_v24 = vadd.f32 %v3124_v36, %v3123_v40 }
0x19e5   :  { %v3117_v34 = vmul.f32 0.0, %v3098_v32  ;;  %v3088_v51 = vadd.f32 %v3079_v18, %v5014_v59  ;;  %v3455_v18 = vld [vmem:[%s5150_s2 + $0x2c] ss:$0 sm:$0xff] }
0x19e6   :  { %v3858_v22 = vpop.f32.mrf.mxu0  ;;  %v3126_v20 = vrot.slane %v3125_v24, 2 }
0x19e7   :  { %v3131_v4 = vsel %vm222_vm1, %v3117_v34, 0.0  ;;  %v3099_v56 = vadd.f32 %v3448_v16, %v3088_v51 }
0x19e8   :  { %v3132_v33 = vadd.f32 %v3131_v4, %v3130_v52  ;;  %v3127_v63 = vadd.f32 %v3126_v20, %v3125_v24 }
0x19e9   :  { %v3118_v53 = vmul.f32 0.0, %v3099_v56 }
0x19ea   :  { %v3128_v0 = vrot.slane %v3127_v63, 1 }
0x19eb   :  { %v3133_v60 = vsel %vm222_vm1, %v3118_v53, 0.0 }
0x19ec   :  { %v3134_v54 = vadd.f32 %v3133_v60, %v3132_v33  ;;  %v3129_v55 = vadd.f32 %v3128_v0, %v3127_v63 }
0x19ee   :  { %v3135_v61 = vrot.slane %v3134_v54, 4 }
0x19f0   :  { %v3136_v62 = vadd.f32 %v3135_v61, %v3134_v54 }
0x19f2   :  { %v3137_v42 = vrot.slane %v3136_v62, 2 }
0x19f4   :  { %v3138_v37 = vadd.f32 %v3137_v42, %v3136_v62 }
0x19f6   :  { %v3139_v59 = vrot.slane %v3138_v37, 1 }
0x19f8   :  { %v3140_v2 = vadd.f32 %v3139_v59, %v3138_v37 }
0x19fa   :  { %v3146_v47 = vsel %vm3145_vm8, %v3140_v2, %v3129_v55 }
0x19fb   :  { %v3149_v6 = vsel %vm3148_vm9, %v3146_v47, 0.0 }
0x19fc   :  { %3150 = vadd.xlane.f32.xlu0 %v3149_v6 }
0x1a85   :  { %v3151_v7 = vpop.xlane.xlu0 %3150 }
0x1a86   :  { %v3152_v44 = vmul.f32 0.03125, %v3151_v7 }
0x1a88   :  { %v3154_v13 = vrot.slane %v3152_v44, 1  ;;  %v3157_v3 = vsub.f32 %v3129_v55, %v3152_v44 }
0x1a8a   :  { %v3158_v39 = vsub.f32 %v3140_v2, %v3154_v13  ;;  %v3159_v10 = vmul.f32 %v3157_v3, %v3157_v3 }
0x1a8c   :  { %v3160_v58 = vmul.f32 %v3158_v39, %v3158_v39 }
0x1a8e   :  { %v3163_v5 = vrot.slane %v3160_v58, 7 }
0x1a90   :  { %v3164_v38 = vsel %vm3145_vm8, %v3163_v5, %v3159_v10 }
0x1a91   :  { %v3166_v15 = vsel %vm3148_vm9, %v3164_v38, 0.0 }
0x1a92   :  { %3167 = vadd.xlane.f32.xlu1 %v3166_v15 }
0x1b1b   :  { %v3168_v12 = vpop.xlane.xlu1 %3167 }
0x1b1c   :  { %v3169_v16 = vmul.f32 0.03125, %v3168_v12 }
0x1b1e   :  { %v3170_v21 = vadd.f32 1e-05, %v3169_v16 }
0x1b20   :  { %4192 = vrsqrt.f32 %v3170_v21 }
0x1b2d   :  { %v4193_v27 = vpop.eup %4192 }
0x1b2e   :  { %v3173_v25 = vrot.slane %v4193_v27, 1  ;;  %v3176_v43 = vmul.f32 %v4193_v27, %v3157_v3 }
0x1b30   :  { %v3177_v45 = vmul.f32 %v3173_v25, %v3158_v39  ;;  %v3182_v11 = vmul.f32 %v3450_v50, %v3176_v43 }
0x1b32   :  { %v3183_v57 = vmul.f32 %v3450_v50, %v3177_v45  ;;  %v3188_v31 = vadd.f32 %v3451_v14, %v3182_v11 }
0x1b34   :  { %v3189_v8 = vadd.f32 %v3451_v14, %v3183_v57  ;;  %v3194_v17 = vpack.c.bf16 %v3188_v31, %v3188_v31 }
0x1b36   :  { %v3195_v30 = vpack.c.bf16 %v3189_v8, %v3189_v8  ;;  %v3198_v35 = vunpack.c.l.b16 %v3194_v17 }
0x1b38   :  { %v3199_v19 = vunpack.c.l.b16 %v3195_v30 }
0x1b3a   :  { %v3200_v23 = vrot.slane %v3199_v19, 7 }
0x1b3c   :  { %v3201_v41 = vsel %vm3145_vm8, %v3200_v23, %v3198_v35 }
0x1b3d   :  { %v3202_v40 = vpack.c.b16 %v3201_v41, %v3201_v41 }
0x1b3f   :  { %3864 = vmatmul.mubr.msk.bf16.vlgmr.msra.gmra.mxu1 %vm222_vm1, %v3202_v40 }
0x1b40   :  { %3869 = vmatprep.mubr.msk.bf16.mxu1 %vm4196_vm2, %v4195_v29  ;;  %3868 = vmatpush3.bf16.msra.mxu1 %v3987_v26 }
0x1bff   :  { %v3252_v28 = vpop.f32.mrf.mxu1 }
0x1c00   :  { %v3260_v46 = vpack.c.bf16 %v3252_v28, %v3252_v28 }
0x1c01   :  { %v3865_v49 = vpop.f32.mrf.mxu1 }
0x1c02   :  { %3870 = vmatmul.mubr.msk.bf16.vlgmr.msra.gmra.mxu1 %vm525_vm3, %v3260_v46 }
0x1c03   :  { %v3255_v32 = vpop.f32.mrf.mxu1 }
0x1c05   :  { %v3866_v36 = vpop.f32.mrf.mxu1 }
0x1cc2   :  { %v3309_v48 = vpop.f32.mrf.mxu1 }
0x1cc3   :  { %v3310_v34 = vadd.f32 %v3455_v18, %v3309_v48 }
0x1cc4   :  { %v3871_v51 = vpop.f32.mrf.mxu1 }
0x1cc5   :  { %3315 = vst [vmem:[%s5151_s3] sm:$0x3] %v3310_v34 }
0x1cc6   :  { %v3312_v29 = vpop.f32.mrf.mxu1 }
0x1cc8   :  { %v3872_v22 = vpop.f32.mrf.mxu1 }

</bundles_post_ra>
